<compile_context>
chip_gen: v7x
topology: tpu7x:2x2x1
jax: 0.10.0
libtpu: 0.0.40
codegen_flags: <defaults>
</compile_context>

<pallas_src>
import functools

import jax
import jax.numpy as jnp
import numpy as np
from jax.experimental import pallas as pl
from jax.experimental.pallas import tpu as pltpu


# ----------------------------------------------------------------------------
# Pallas kernels
# ----------------------------------------------------------------------------

def _stem_gap_kernel(p_ref, w_ref, b_ref, a_ref, o_ref, acc_ref, *, inv_hw):
    """Fused conv3x3 (as im2col matmul) + PReLU + global-average-pool.

    p_ref:   (N, tr, Kpad)  patches row-tile (all images)
    w_ref:   (Kpad, Cpad)   conv weight matrix (lane-padded channels)
    b_ref:   (1, Cpad)      conv bias
    a_ref:   (1, Cpad)      PReLU alpha
    o_ref:   (N, Cpad)      pooled output (written on last grid step)
    acc_ref: (N, Cpad)      f32 spatial-sum accumulator (VMEM scratch)
    """
    r = pl.program_id(0)

    @pl.when(r == 0)
    def _init():
        acc_ref[...] = jnp.zeros_like(acc_ref)

    w = w_ref[...]
    b = b_ref[...]
    a = a_ref[...]
    n_img = p_ref.shape[0]
    partial = []
    for n in range(n_img):                      # static unroll over batch
        y = jnp.dot(p_ref[n], w, preferred_element_type=jnp.float32)  # (tr, Cpad)
        y = y + b
        y = jnp.where(y > 0.0, y, a * y)                              # PReLU
        partial.append(jnp.sum(y, axis=0, keepdims=True))             # (1, Cpad)
    acc_ref[...] += jnp.concatenate(partial, axis=0)                  # (N, Cpad)

    @pl.when(r == pl.num_programs(0) - 1)
    def _finalize():
        o_ref[...] = acc_ref[...] * inv_hw


def _head_kernel(x_ref, fw_ref, fb_ref, ww_ref, wb_ref, o_ref):
    """Fused feature-linear + classifier-fc output tile.

    x_ref:  (Mpad, Cpad)  pooled backbone descriptor
    fw_ref: (Cpad, F)     feature weight (f32)
    fb_ref: (1, F)        feature bias
    ww_ref: (F, tn)       fc weight tile (bf16, pre-transposed/pre-padded)
    wb_ref: (1, tn)       fc bias tile
    o_ref:  (Mpad, tn)    logits tile
    """
    feat = jnp.dot(x_ref[...], fw_ref[...],
                   preferred_element_type=jnp.float32) + fb_ref[...]   # (M, F)
    w = ww_ref[...].astype(jnp.float32)                                # bf16 -> f32
    y = jnp.dot(feat, w, preferred_element_type=jnp.float32) + wb_ref[...]
    o_ref[...] = y.astype(o_ref.dtype)


# ----------------------------------------------------------------------------
# Pallas wrappers
# ----------------------------------------------------------------------------

def pallas_stem(patches, conv_w, conv_b, alpha, *, tr):
    """patches: (N, HW, Kpad) -> pooled (N, Cpad)."""
    N, HW, Kp = patches.shape
    Cp = conv_w.shape[1]
    assert HW % tr == 0, (HW, tr)
    kernel = functools.partial(_stem_gap_kernel, inv_hw=1.0 / HW)
    return pl.pallas_call(
        kernel,
        out_shape=jax.ShapeDtypeStruct((N, Cp), jnp.float32),
        grid=(HW // tr,),
        in_specs=[
            pl.BlockSpec((N, tr, Kp), lambda r: (0, r, 0)),
            pl.BlockSpec((Kp, Cp), lambda r: (0, 0)),
            pl.BlockSpec((1, Cp), lambda r: (0, 0)),
            pl.BlockSpec((1, Cp), lambda r: (0, 0)),
        ],
        out_specs=pl.BlockSpec((N, Cp), lambda r: (0, 0)),
        scratch_shapes=[pltpu.VMEM((N, Cp), jnp.float32)],
        compiler_params=pltpu.CompilerParams(
            dimension_semantics=("arbitrary",)),   # accumulator across row tiles
    )(patches, conv_w, conv_b, alpha)


def pallas_head(pooled, feat_w, feat_b, fc_w, fc_b, *, tn):
    """pooled: (Mpad, Cpad) -> logits (Mpad, Npad); tiled over output columns."""
    M, Cp = pooled.shape
    F = feat_w.shape[1]
    Np = fc_w.shape[1]
    assert Np % tn == 0, (Np, tn)
    return pl.pallas_call(
        _head_kernel,
        out_shape=jax.ShapeDtypeStruct((M, Np), jnp.float32),
        grid=(Np // tn,),
        in_specs=[
            pl.BlockSpec((M, Cp), lambda j: (0, 0)),
            pl.BlockSpec((Cp, F), lambda j: (0, 0)),
            pl.BlockSpec((1, F), lambda j: (0, 0)),
            pl.BlockSpec((F, tn), lambda j: (0, j)),
            pl.BlockSpec((1, tn), lambda j: (0, j)),
        ],
        out_specs=pl.BlockSpec((M, tn), lambda j: (0, j)),
        compiler_params=pltpu.CompilerParams(
            dimension_semantics=("parallel",)),    # megacore-shardable on v7x
    )(pooled, feat_w, feat_b, fc_w, fc_b)


# ----------------------------------------------------------------------------
# Glue (plain JAX): im2col, padding, parameter construction / preparation
# ----------------------------------------------------------------------------

def _round_up(v, m):
    return (v + m - 1) // m * m


def _pick_row_tile(hw):
    for t in (128, 64, 32, 16, 8):
        if hw % t == 0:
            return t
    return hw


def _pick_fc_tile(n_pad):
    for t in (2048, 1024, 512):
        if n_pad % t == 0:
            return t
    return 512


def im2col_3x3(x_nhwc, *, k_pad=None):
    """3x3, stride 1, pad 1 patches. Returns (N, H*W, Kpad), ordered (kh, kw, cin)."""
    N, H, W, C = x_nhwc.shape
    xp = jnp.pad(x_nhwc, ((0, 0), (1, 1), (1, 1), (0, 0)))
    cols = []
    for dh in range(3):
        for dw in range(3):
            cols.append(xp[:, dh:dh + H, dw:dw + W, :])
    patches = jnp.concatenate(cols, axis=-1).reshape(N, H * W, 9 * C)
    if k_pad is not None and k_pad > 9 * C:
        patches = jnp.pad(patches, ((0, 0), (0, 0), (0, k_pad - 9 * C)))
    return patches


def init_params(key, *, cin=3, chid=16, feat_dim=512, num_classes=10177):
    """Raw parameters in PyTorch layouts."""
    k1, k2, k3, k4, k5, k6 = jax.random.split(key, 6)
    return {
        "conv_w": 0.1 * jax.random.normal(k1, (chid, cin, 3, 3), jnp.float32),
        "conv_b": 0.1 * jax.random.normal(k2, (chid,), jnp.float32),
        # TODO(synk): nn.PReLU() default uses a single shared alpha; per-channel here.
        "prelu_alpha": jnp.full((chid,), 0.25, jnp.float32),
        "feat_w": 0.05 * jax.random.normal(k3, (feat_dim, chid), jnp.float32),   # torch (out, in)
        "feat_b": 0.05 * jax.random.normal(k4, (feat_dim,), jnp.float32),
        "fc_w": 0.02 * jax.random.normal(k5, (num_classes, feat_dim), jnp.float32),  # torch (out, in)
        "fc_b": 0.02 * jax.random.normal(k6, (num_classes,), jnp.float32),
    }


def prepare_params(params, *, num_classes):
    """One-time weight prep: transpose, zero-pad, lane-align, bf16-cast fc weight.

    Runs ONCE at load time (outside the jitted forward) so the ~20 MB fc weight
    is never transposed or padded per call.
    """
    chid, cin = params["conv_w"].shape[0], params["conv_w"].shape[1]
    feat_dim = params["feat_b"].shape[0]
    k_raw = 9 * cin
    k_pad = _round_up(k_raw, 32)        # packed contraction dim for the stem
    c_pad = _round_up(chid, 128)        # lane-dense stem output channels

    conv_w = jnp.transpose(params["conv_w"], (2, 3, 1, 0)).reshape(k_raw, chid)
    conv_w = jnp.zeros((k_pad, c_pad), jnp.float32).at[:k_raw, :chid].set(conv_w)
    conv_b = jnp.zeros((1, c_pad), jnp.float32).at[:, :chid].set(params["conv_b"][None, :])
    alpha = jnp.zeros((1, c_pad), jnp.float32).at[:, :chid].set(params["prelu_alpha"][None, :])

    feat_w = jnp.zeros((c_pad, feat_dim), jnp.float32).at[:chid, :].set(
        jnp.transpose(params["feat_w"]))
    feat_b = params["feat_b"].reshape(1, feat_dim).astype(jnp.float32)

    n_pad = _round_up(num_classes, 512)
    # fc weight: pre-transposed to (512, Npad), zero-padded, stored bf16
    # (fc is HBM-bandwidth bound; accumulation stays f32 in-kernel).
    fc_w = jnp.zeros((feat_dim, n_pad), jnp.float32).at[:, :num_classes].set(
        jnp.transpose(params["fc_w"])).astype(jnp.bfloat16)
    fc_b = jnp.zeros((1, n_pad), jnp.float32).at[:, :num_classes].set(
        params["fc_b"][None, :])

    return {
        "conv_w": conv_w, "conv_b": conv_b, "prelu_alpha": alpha,
        "feat_w": feat_w, "feat_b": feat_b,
        "fc_w": fc_w, "fc_b": fc_b,
    }


def face_model_forward(images_nchw, prep, *, num_classes, tn):
    """Pallas forward pass.  images_nchw: (N, 3, H, W) float32 -> (N, num_classes)."""
    N, _, H, W = images_nchw.shape
    k_pad = prep["conv_w"].shape[0]
    c_pad = prep["conv_w"].shape[1]

    # NCHW -> NHWC, im2col patches (padded contraction dim)
    x = jnp.transpose(images_nchw, (0, 2, 3, 1))
    patches = im2col_3x3(x, k_pad=k_pad)                       # (N, HW, Kpad)

    # fused conv3x3 + PReLU + global average pool
    tr = _pick_row_tile(H * W)
    pooled = pallas_stem(patches, prep["conv_w"], prep["conv_b"],
                         prep["prelu_alpha"], tr=tr)           # (N, Cpad)

    # pad batch rows to a sublane multiple (tiny)
    m_pad = _round_up(max(N, 8), 8)
    pooled_p = jnp.zeros((m_pad, c_pad), jnp.float32).at[:N].set(pooled)

    # fused feature-linear (Cpad -> 512) + classifier fc (512 -> num_classes)
    logits_p = pallas_head(pooled_p, prep["feat_w"], prep["feat_b"],
                           prep["fc_w"], prep["fc_b"], tn=tn)  # (Mpad, Npad)

    return logits_p[:N, :num_classes]


# ----------------------------------------------------------------------------
# Pure-JAX reference (same prepared weights, for a correctness sanity check)
# ----------------------------------------------------------------------------

def reference_forward(images_nchw, prep, *, num_classes):
    x = jnp.transpose(images_nchw, (0, 2, 3, 1))
    patches = im2col_3x3(x, k_pad=prep["conv_w"].shape[0])     # (N, HW, Kpad)
    y = patches @ prep["conv_w"] + prep["conv_b"]              # (N, HW, Cpad)
    y = jnp.where(y > 0, y, prep["prelu_alpha"] * y)
    pooled = y.mean(axis=1)                                    # (N, Cpad)
    feat = pooled @ prep["feat_w"] + prep["feat_b"]            # (N, 512)
    logits = feat @ prep["fc_w"].astype(jnp.float32) + prep["fc_b"]
    return logits[:, :num_classes]


# ----------------------------------------------------------------------------
if __name__ == "__main__":
    NUM_CLASSES = 10177   # module default

    # deterministic small input: batch=2, 3-channel 16x16 images (NCHW)
    images = jax.random.normal(jax.random.PRNGKey(0), (2, 3, 16, 16), jnp.float32)

    raw_params = init_params(jax.random.PRNGKey(42), num_classes=NUM_CLASSES)
    prep = prepare_params(raw_params, num_classes=NUM_CLASSES)   # one-time
    prep = jax.block_until_ready(prep)

    tn = _pick_fc_tile(prep["fc_w"].shape[1])                    # 2048 for 10240
    fwd = jax.jit(functools.partial(face_model_forward,
                                    num_classes=NUM_CLASSES, tn=tn))
    logits = jax.block_until_ready(fwd(images, prep))

    assert logits.shape == (2, NUM_CLASSES), logits.shape

    ref = reference_forward(images, prep, num_classes=NUM_CLASSES)
    np.testing.assert_allclose(np.asarray(logits), np.asarray(ref),
                               rtol=1e-3, atol=1e-3)

    print("KERNEL_OK")
</pallas_src>

<mosaic_0001>
module attributes {stable_mosaic.version = 11 : i64} {
  func.func @_stem_gap_kernel(%arg0: i32, %arg1: memref<2x128x32xf32, #tpu.memory_space<vmem>>, %arg2: memref<32x128xf32, #tpu.memory_space<vmem>>, %arg3: memref<1x128xf32, #tpu.memory_space<vmem>>, %arg4: memref<1x128xf32, #tpu.memory_space<vmem>>, %arg5: memref<2x128xf32, #tpu.memory_space<vmem>>, %arg6: memref<2x128xf32, #tpu.memory_space<vmem>>) attributes {dimension_semantics = [#tpu.dimension_semantics<arbitrary>], iteration_bounds = array<i64: 2>, scalar_prefetch = 0 : i64, scratch_operands = 1 : i64, tpu.core_type = #tpu.core_type<tc>, window_params = [{transform_indices = @transform_0, window_bounds = array<i64: 2, 128, 32>}, {pipeline_mode = #tpu.pipeline_mode<synchronous>, transform_indices = @transform_1, window_bounds = array<i64: 32, 128>}, {pipeline_mode = #tpu.pipeline_mode<synchronous>, transform_indices = @transform_2, window_bounds = array<i64: 1, 128>}, {pipeline_mode = #tpu.pipeline_mode<synchronous>, transform_indices = @transform_3, window_bounds = array<i64: 1, 128>}, {pipeline_mode = #tpu.pipeline_mode<synchronous>, transform_indices = @transform_4, window_bounds = array<i64: 2, 128>}]} {
    %c0_i32 = arith.constant 0 : i32
    %0 = arith.cmpi eq, %arg0, %c0_i32 : i32
    %1 = arith.extui %0 : i1 to i32
    %c0_i32_0 = arith.constant 0 : i32
    %2 = arith.cmpi ne, %1, %c0_i32_0 : i32
    scf.if %2 {
      %cst_21 = arith.constant 0.000000e+00 : f32
      %37 = vector.broadcast %cst_21 : f32 to vector<2x128xf32>
      %c0_22 = arith.constant 0 : index
      %c0_23 = arith.constant 0 : index
      %38 = vector.load %arg6[%c0_22, %c0_23] : memref<2x128xf32, #tpu.memory_space<vmem>>, vector<2x128xf32>
      tpu.vector_store %arg6[%c0_22, %c0_23], %37 {strides = array<i32>} : memref<2x128xf32, #tpu.memory_space<vmem>>, vector<2x128xf32>,
    } else {
    }
    %c0 = arith.constant 0 : index
    %c0_1 = arith.constant 0 : index
    %3 = vector.load %arg2[%c0, %c0_1] : memref<32x128xf32, #tpu.memory_space<vmem>>, vector<32x128xf32>
    %c0_2 = arith.constant 0 : index
    %c0_3 = arith.constant 0 : index
    %4 = vector.load %arg3[%c0_2, %c0_3] : memref<1x128xf32, #tpu.memory_space<vmem>>, vector<1x128xf32>
    %c0_4 = arith.constant 0 : index
    %c0_5 = arith.constant 0 : index
    %5 = vector.load %arg4[%c0_4, %c0_5] : memref<1x128xf32, #tpu.memory_space<vmem>>, vector<1x128xf32>
    %c0_6 = arith.constant 0 : index
    %c0_7 = arith.constant 0 : index
    %c0_8 = arith.constant 0 : index
    %6 = vector.load %arg1[%c0_6, %c0_7, %c0_8] : memref<2x128x32xf32, #tpu.memory_space<vmem>>, vector<1x128x32xf32>
    %7 = vector.shape_cast %6 : vector<1x128x32xf32> to vector<128x32xf32>
    %cst = arith.constant dense<0.000000e+00> : vector<128x128xf32>
    %8 = tpu.matmul %7, %3, %cst {dimension_numbers = #tpu.dot_dimension_numbers<[1], [0], [0], [1], [0, 0, 1, 1], [], []>} : vector<128x32xf32>, vector<32x128xf32>, vector<128x128xf32> -> vector<128x128xf32>
    %9 = vector.broadcast %4 : vector<1x128xf32> to vector<128x128xf32>
    %10 = arith.addf %8, %9 : vector<128x128xf32>
    %cst_9 = arith.constant 0.000000e+00 : f32
    %11 = vector.broadcast %cst_9 : f32 to vector<128x128xf32>
    %12 = arith.cmpf ogt, %10, %11 : vector<128x128xf32>
    %13 = vector.broadcast %5 : vector<1x128xf32> to vector<128x128xf32>
    %14 = arith.mulf %13, %10 : vector<128x128xf32>
    %15 = arith.select %12, %10, %14 : vector<128x128xi1>, vector<128x128xf32>
    %cst_10 = arith.constant dense<0.000000e+00> : vector<128xf32>
    %16 = vector.multi_reduction <add>, %15, %cst_10 [0] : vector<128x128xf32> to vector<128xf32>
    %17 = vector.shape_cast %16 : vector<128xf32> to vector<1x128xf32>
    %c1 = arith.constant 1 : index
    %c0_11 = arith.constant 0 : index
    %c0_12 = arith.constant 0 : index
    %18 = vector.load %arg1[%c1, %c0_11, %c0_12] : memref<2x128x32xf32, #tpu.memory_space<vmem>>, vector<1x128x32xf32>
    %19 = vector.shape_cast %18 : vector<1x128x32xf32> to vector<128x32xf32>
    %cst_13 = arith.constant dense<0.000000e+00> : vector<128x128xf32>
    %20 = tpu.matmul %19, %3, %cst_13 {dimension_numbers = #tpu.dot_dimension_numbers<[1], [0], [0], [1], [0, 0, 1, 1], [], []>} : vector<128x32xf32>, vector<32x128xf32>, vector<128x128xf32> -> vector<128x128xf32>
    %21 = vector.broadcast %4 : vector<1x128xf32> to vector<128x128xf32>
    %22 = arith.addf %20, %21 : vector<128x128xf32>
    %cst_14 = arith.constant 0.000000e+00 : f32
    %23 = vector.broadcast %cst_14 : f32 to vector<128x128xf32>
    %24 = arith.cmpf ogt, %22, %23 : vector<128x128xf32>
    %25 = vector.broadcast %5 : vector<1x128xf32> to vector<128x128xf32>
    %26 = arith.mulf %25, %22 : vector<128x128xf32>
    %27 = arith.select %24, %22, %26 : vector<128x128xi1>, vector<128x128xf32>
    %cst_15 = arith.constant dense<0.000000e+00> : vector<128xf32>
    %28 = vector.multi_reduction <add>, %27, %cst_15 [0] : vector<128x128xf32> to vector<128xf32>
    %29 = vector.shape_cast %28 : vector<128xf32> to vector<1x128xf32>
    %c0_16 = arith.constant 0 : index
    %c0_17 = arith.constant 0 : index
    %30 = vector.load %arg6[%c0_16, %c0_17] : memref<2x128xf32, #tpu.memory_space<vmem>>, vector<2x128xf32>
    %31 = tpu.concatenate %17, %29 in 0 : vector<1x128xf32>, vector<1x128xf32> -> vector<2x128xf32>
    %32 = arith.addf %30, %31 : vector<2x128xf32>
    %c0_18 = arith.constant 0 : index
    %c0_19 = arith.constant 0 : index
    %33 = vector.load %arg6[%c0_18, %c0_19] : memref<2x128xf32, #tpu.memory_space<vmem>>, vector<2x128xf32>
    tpu.vector_store %arg6[%c0_18, %c0_19], %32 {strides = array<i32>} : memref<2x128xf32, #tpu.memory_space<vmem>>, vector<2x128xf32>,
    %c1_i32 = arith.constant 1 : i32
    %34 = arith.cmpi eq, %arg0, %c1_i32 : i32
    %35 = arith.extui %34 : i1 to i32
    %c0_i32_20 = arith.constant 0 : i32
    %36 = arith.cmpi ne, %35, %c0_i32_20 : i32
    scf.if %36 {
      %c0_21 = arith.constant 0 : index
      %c0_22 = arith.constant 0 : index
      %37 = vector.load %arg6[%c0_21, %c0_22] : memref<2x128xf32, #tpu.memory_space<vmem>>, vector<2x128xf32>
      %cst_23 = arith.constant 3.906250e-03 : f32
      %38 = vector.broadcast %cst_23 : f32 to vector<2x128xf32>
      %39 = arith.mulf %37, %38 : vector<2x128xf32>
      %c0_24 = arith.constant 0 : index
      %c0_25 = arith.constant 0 : index
      %40 = vector.load %arg5[%c0_24, %c0_25] : memref<2x128xf32, #tpu.memory_space<vmem>>, vector<2x128xf32>
      tpu.vector_store %arg5[%c0_24, %c0_25], %39 {strides = array<i32>} : memref<2x128xf32, #tpu.memory_space<vmem>>, vector<2x128xf32>,
    } else {
    }
    return
  }
  func.func @transform_0(%arg0: i32) -> (i32, i32, i32) {
    %c0_i32 = arith.constant 0 : i32
    %c0_i32_0 = arith.constant 0 : i32
    %c0_i32_1 = arith.constant 0 : i32
    return %c0_i32, %arg0, %c0_i32_0 : i32, i32, i32
  }
  func.func @transform_1(%arg0: i32) -> (i32, i32) {
    %c0_i32 = arith.constant 0 : i32
    %c0_i32_0 = arith.constant 0 : i32
    %c0_i32_1 = arith.constant 0 : i32
    return %c0_i32, %c0_i32_0 : i32, i32
  }
  func.func @transform_2(%arg0: i32) -> (i32, i32) {
    %c0_i32 = arith.constant 0 : i32
    %c0_i32_0 = arith.constant 0 : i32
    %c0_i32_1 = arith.constant 0 : i32
    return %c0_i32, %c0_i32_0 : i32, i32
  }
  func.func @transform_3(%arg0: i32) -> (i32, i32) {
    %c0_i32 = arith.constant 0 : i32
    %c0_i32_0 = arith.constant 0 : i32
    %c0_i32_1 = arith.constant 0 : i32
    return %c0_i32, %c0_i32_0 : i32, i32
  }
  func.func @transform_4(%arg0: i32) -> (i32, i32) {
    %c0_i32 = arith.constant 0 : i32
    %c0_i32_0 = arith.constant 0 : i32
    %c0_i32_1 = arith.constant 0 : i32
    return %c0_i32, %c0_i32_0 : i32, i32
  }
}

module attributes {stable_mosaic.version = 11 : i64} {
  func.func @_head_kernel(%arg0: i32, %arg1: memref<8x128xf32, #tpu.memory_space<vmem>>, %arg2: memref<128x512xf32, #tpu.memory_space<vmem>>, %arg3: memref<1x512xf32, #tpu.memory_space<vmem>>, %arg4: memref<512x2048xbf16, #tpu.memory_space<vmem>>, %arg5: memref<1x2048xf32, #tpu.memory_space<vmem>>, %arg6: memref<8x2048xf32, #tpu.memory_space<vmem>>) attributes {dimension_semantics = [#tpu.dimension_semantics<parallel>], iteration_bounds = array<i64: 5>, scalar_prefetch = 0 : i64, scratch_operands = 0 : i64, tpu.core_type = #tpu.core_type<tc>, window_params = [{pipeline_mode = #tpu.pipeline_mode<synchronous>, transform_indices = @transform_0, window_bounds = array<i64: 8, 128>}, {pipeline_mode = #tpu.pipeline_mode<synchronous>, transform_indices = @transform_1, window_bounds = array<i64: 128, 512>}, {pipeline_mode = #tpu.pipeline_mode<synchronous>, transform_indices = @transform_2, window_bounds = array<i64: 1, 512>}, {transform_indices = @transform_3, window_bounds = array<i64: 512, 2048>}, {transform_indices = @transform_4, window_bounds = array<i64: 1, 2048>}, {transform_indices = @transform_5, window_bounds = array<i64: 8, 2048>}]} {
    %c0 = arith.constant 0 : index
    %c0_0 = arith.constant 0 : index
    %0 = vector.load %arg1[%c0, %c0_0] : memref<8x128xf32, #tpu.memory_space<vmem>>, vector<8x128xf32>
    %c0_1 = arith.constant 0 : index
    %c0_2 = arith.constant 0 : index
    %1 = vector.load %arg2[%c0_1, %c0_2] : memref<128x512xf32, #tpu.memory_space<vmem>>, vector<128x512xf32>
    %cst = arith.constant dense<0.000000e+00> : vector<8x512xf32>
    %2 = tpu.matmul %0, %1, %cst {dimension_numbers = #tpu.dot_dimension_numbers<[1], [0], [0], [1], [0, 0, 1, 1], [], []>} : vector<8x128xf32>, vector<128x512xf32>, vector<8x512xf32> -> vector<8x512xf32>
    %c0_3 = arith.constant 0 : index
    %c0_4 = arith.constant 0 : index
    %3 = vector.load %arg3[%c0_3, %c0_4] : memref<1x512xf32, #tpu.memory_space<vmem>>, vector<1x512xf32>
    %4 = vector.broadcast %3 : vector<1x512xf32> to vector<8x512xf32>
    %5 = arith.addf %2, %4 : vector<8x512xf32>
    %c0_5 = arith.constant 0 : index
    %c0_6 = arith.constant 0 : index
    %6 = vector.load %arg4[%c0_5, %c0_6] : memref<512x2048xbf16, #tpu.memory_space<vmem>>, vector<512x2048xbf16>
    %7 = arith.extf %6 : vector<512x2048xbf16> to vector<512x2048xf32>
    %cst_7 = arith.constant dense<0.000000e+00> : vector<8x2048xf32>
    %8 = tpu.matmul %5, %7, %cst_7 {dimension_numbers = #tpu.dot_dimension_numbers<[1], [0], [0], [1], [0, 0, 1, 1], [], []>} : vector<8x512xf32>, vector<512x2048xf32>, vector<8x2048xf32> -> vector<8x2048xf32>
    %c0_8 = arith.constant 0 : index
    %c0_9 = arith.constant 0 : index
    %9 = vector.load %arg5[%c0_8, %c0_9] : memref<1x2048xf32, #tpu.memory_space<vmem>>, vector<1x2048xf32>
    %10 = vector.broadcast %9 : vector<1x2048xf32> to vector<8x2048xf32>
    %11 = arith.addf %8, %10 : vector<8x2048xf32>
    %c0_10 = arith.constant 0 : index
    %c0_11 = arith.constant 0 : index
    %12 = vector.load %arg6[%c0_10, %c0_11] : memref<8x2048xf32, #tpu.memory_space<vmem>>, vector<8x2048xf32>
    tpu.vector_store %arg6[%c0_10, %c0_11], %11 {strides = array<i32>} : memref<8x2048xf32, #tpu.memory_space<vmem>>, vector<8x2048xf32>,
    return
  }
  func.func @transform_0(%arg0: i32) -> (i32, i32) {
    %c0_i32 = arith.constant 0 : i32
    %c0_i32_0 = arith.constant 0 : i32
    %c0_i32_1 = arith.constant 0 : i32
    return %c0_i32, %c0_i32_0 : i32, i32
  }
  func.func @transform_1(%arg0: i32) -> (i32, i32) {
    %c0_i32 = arith.constant 0 : i32
    %c0_i32_0 = arith.constant 0 : i32
    %c0_i32_1 = arith.constant 0 : i32
    return %c0_i32, %c0_i32_0 : i32, i32
  }
  func.func @transform_2(%arg0: i32) -> (i32, i32) {
    %c0_i32 = arith.constant 0 : i32
    %c0_i32_0 = arith.constant 0 : i32
    %c0_i32_1 = arith.constant 0 : i32
    return %c0_i32, %c0_i32_0 : i32, i32
  }
  func.func @transform_3(%arg0: i32) -> (i32, i32) {
    %c0_i32 = arith.constant 0 : i32
    %c0_i32_0 = arith.constant 0 : i32
    return %c0_i32, %arg0 : i32, i32
  }
  func.func @transform_4(%arg0: i32) -> (i32, i32) {
    %c0_i32 = arith.constant 0 : i32
    %c0_i32_0 = arith.constant 0 : i32
    return %c0_i32, %arg0 : i32, i32
  }
  func.func @transform_5(%arg0: i32) -> (i32, i32) {
    %c0_i32 = arith.constant 0 : i32
    %c0_i32_0 = arith.constant 0 : i32
    return %c0_i32, %arg0 : i32, i32
  }
}

</mosaic_0001>

<bundles_post_ra>
// kernel: face_model_forward.2
= control target key start
LH: loop header
LB: loop body
LE: loop exit
PB: predicated region body
PF: predicated region fallthrough
CT: control target
= control target key end

     0   :  { %9 = vsyncpa [#allocation5], 0  ;;  %s1796_s0 = inlined_call_operand.vmem [shape: f32[2,256,32], index: 0, kind: input, shape index: {}]   ;;  %s1797_s1 = inlined_call_operand.hbm [shape: f32[32,128], index: 1, kind: input, shape index: {}]   ;;  %s1798_s2 = inlined_call_operand.hbm [shape: f32[1,128], index: 2, kind: input, shape index: {}]   ;;  %s1799_s3 = inlined_call_operand.hbm [shape: f32[1,128], index: 3, kind: input, shape index: {}]   ;;  %s1800_s4 = inlined_call_operand.vmem [shape: f32[2,128], index: 4, kind: output, shape index: {}]  }
   0x1   :  { %10 = vsyncpa [#allocation7], 0  ;;  %s1435_s15 = smov 0   ;;  %s1437_s16 = smov 0  }
   0x2   :  { %s1439_s17 = smov 0  }
   0x3 LB: > { %s1451_s18 = sadd.s32 4294967295, %s1402_s17   ;;  %s1454_s19 = sadd.s32 1, %s1402_s17   ;;  %s1402_s17 = sphi %s1439_s17, %s1816_s17   ;;  %s1398_s16 = sphi %s1437_s16, %s1815_s16   ;;  %s1394_s15 = sphi %s1435_s15, %s1814_s15  }
   0x4   : > { %s20_s20 = ssub.s32 %s1402_s17, %s1454_s19  ;;  %s23_s21 = sadd.s32 1, %s1398_s16 }
   0x5   : > { %p21_p0 = scmp.eq.s32.totalorder %s20_s20, 0  ;;  %p30_p1 = scmp.ne.s32.totalorder %s1398_s16, %s1394_s15 }
   0x6   : > { %p31_p2 = scmp.eq.s32.totalorder %s1402_s17, 0  ;;  %p1042_p3 = scmp.ge.s32.totalorder %s1402_s17, 1 }
   0x7   : > { %s1464_s22 = scalar_select %p21_p0, %s1398_s16, %s23_s21  }
   0x8   : > { %p1466_p4 = por %p31_p2, %p30_p1  ;;  %p131_p5 = scmp.lt.s32.totalorder %s1402_s17, 3 }
   0x9   : > { %p1801_p7 = scmp.eq.s32.totalorder %s1451_s18, 0  ;;  %s1404_s25 = smov [#allocation6]  }
   0xa   : > { %s1803_s23 = scalar_select %p1466_p4, 1, 0 }
   0xb   : > { %p1473_p8 = pnand %p1042_p3, %p131_p5  ;;  %s157_s26 = sshll.u32 %s1404_s25, 4  ;;  %s158_s26 = int_to_ptr.vmem [resolvable:$true] %s157_s26 }
   0xc   : > { %s1405_s27 = smov [#allocation4]   ;;  %s1406_s30 = smov [#allocation8]  }
   0xd   : > { %s1804_s24 = scalar_select %p1473_p8, 1, 0 }
   0xe   : > { %p1242_p9 = pneg %p1473_p8  ;;  %s143_s28 = sshll.u32 %s1405_s27, 4  ;;  %s1485_s28 = int_to_ptr.vmem [resolvable:$true] %s143_s28 }
   0xf   : > { %s1487_s5 = sshll.u32 %s1406_s30, 4  ;;  %s1288_s8 = scalar_lea.hbm %s1798_s2, 16  ;;  %s169_s5 = int_to_ptr.vmem [resolvable:$true] %s1487_s5 }
  0x10   : > { %p1481_p10 = pnand %p1801_p7, %p1242_p9  ;;  %p1289_p11 = scmp.ne.s32.totalorder %s1798_s2, %s1288_s8 }
  0x11   : > { %p1295_p1 = scmp.lt.u32.totalorder %s1288_s8, %s1798_s2 }
  0x12   : > { %p1497_p12 = pneg %p1481_p10 }
  0x14   : > { %p1291_p13 = pnand %p1497_p12, %p1289_p11 }
  0x16   : > { %p1292_p0 = pneg %p1291_p13 }
  0x18   : > { %p1297_p2 = pnand %p1295_p1, %p1292_p0 }
  0x1a   : > { %1300 = shalt.err (!%p1297_p2)
}
  0x1b   : > { %s1301_s14 = scalar_lea.vmem %s158_s26, 16  ;;  %s1308_s20 = scalar_lea.vmem %s158_s26, 32 }
  0x1c   : > { %p1302_p3 = scmp.ne.s32.totalorder %s158_s26, %s1301_s14  ;;  %p1309_p6 = scmp.lt.s32.totalorder %s158_s26, %s158_s26 }
  0x1d   : > { %p1310_p7 = scmp.lt.s32.totalorder %s1308_s20, %s1301_s14 }
  0x1e   : > { %p1304_p5 = pnand %p1302_p3, %p1497_p12 }
  0x1f   : > { %p1311_p8 = por %p1310_p7, %p1309_p6 }
  0x20   : > { %p1305_p9 = pneg %p1304_p5 }
  0x22   : > { %p1312_p4 = pnand %p1311_p8, %p1305_p9 }
  0x24   : > { %1315 = shalt.err (!%p1312_p4)
}
  0x25   : > { %1248 = dma.hbm_to_vmem [thread:$0]  (!%p1481_p10), %s1798_s2, 16, %s158_s26, [#allocation7]  }
  0x26   : > { %s1316_s6 = scalar_lea.hbm %s1797_s1, 512 }
  0x27   : > { %p1317_p11 = scmp.ne.s32.totalorder %s1797_s1, %s1316_s6  ;;  %p1323_p4 = scmp.lt.u32.totalorder %s1316_s6, %s1797_s1 }
  0x29   : > { %p1319_p13 = pnand %p1317_p11, %p1497_p12 }
  0x2b   : > { %p1320_p6 = pneg %p1319_p13 }
  0x2d   : > { %p1325_p7 = pnand %p1323_p4, %p1320_p6 }
  0x2f   : > { %1328 = shalt.err (!%p1325_p7)
}
  0x30   : > { %s1329_s26 = scalar_lea.vmem %s1485_s28, 512  ;;  %p1337_p2 = scmp.lt.s32.totalorder %s1485_s28, %s1485_s28 }
  0x31   : > { %p1330_p8 = scmp.ne.s32.totalorder %s1485_s28, %s1329_s26  ;;  %p1338_p3 = scmp.lt.s32.totalorder %s1329_s26, %s1329_s26 }
  0x33   : > { %p1332_p0 = pnand %p1330_p8, %p1497_p12  ;;  %p1339_p5 = por %p1338_p3, %p1337_p2 }
  0x35   : > { %p1333_p1 = pneg %p1332_p0 }
  0x37   : > { %p1340_p9 = pnand %p1339_p5, %p1333_p1 }
  0x39   : > { %1343 = shalt.err (!%p1340_p9)
}
  0x3a   : > { %s1407_s12 = smov 128   ;;  %s1408_s13 = smov 8  }
  0x3b   : > { %1245 = dma.hbm_to_vmem [thread:$0]  (!%p1481_p10), %s1797_s1, 512, %s1485_s28, [#allocation5], %s1407_s12, %s1407_s12, %s1408_s13  }
  0x3c   : > { %s1344_s27 = scalar_lea.hbm %s1799_s3, 16 }
  0x3d   : > { %p1345_p11 = scmp.ne.s32.totalorder %s1799_s3, %s1344_s27  ;;  %p1351_p4 = scmp.lt.u32.totalorder %s1344_s27, %s1799_s3 }
  0x3f   : > { %p1347_p13 = pnand %p1345_p11, %p1497_p12 }
  0x41   : > { %p1348_p6 = pneg %p1347_p13 }
  0x43   : > { %p1353_p7 = pnand %p1351_p4, %p1348_p6 }
  0x45   : > { %1356 = shalt.err (!%p1353_p7)
}
  0x46   : > { %s1357_s9 = scalar_lea.vmem %s169_s5, 16  ;;  %s1364_s28 = scalar_lea.vmem %s169_s5, 32 }
  0x47   : > { %p1358_p8 = scmp.ne.s32.totalorder %s169_s5, %s1357_s9  ;;  %p1365_p2 = scmp.lt.s32.totalorder %s169_s5, %s169_s5 }
  0x48   : > { %p1366_p3 = scmp.lt.s32.totalorder %s1364_s28, %s1357_s9 }
  0x49   : > { %p1360_p0 = pnand %p1358_p8, %p1497_p12 }
  0x4a   : > { %p1367_p5 = por %p1366_p3, %p1365_p2 }
  0x4b   : > { %p1361_p1 = pneg %p1360_p0 }
  0x4d   : > { %p1368_p9 = pnand %p1367_p5, %p1361_p1 }
  0x4f   : > { %1371 = shalt.err (!%p1368_p9)
}
  0x50   : > { %1251 = dma.hbm_to_vmem [thread:$0]  (!%p1481_p10), %s1799_s3, 16, %s169_s5, [#allocation7]  }
  0x51   : > { %p1046_p11 = scmp.ge.s32.totalorder %s1402_s17, 2 }
  0x52   : > { %p1807_p13 = scmp.ne.s32.totalorder (!%p1046_p11), %s1803_s23, 0 }
  0x53   : > { %175 = sbr.rel (%p1046_p11) target bundleno = 110 (0x6e), region = 28 }
  0x5a   : > { %178 = sbr.rel (!%p1807_p13) target bundleno = 110 (0x6e), region = 32  ;;  %s180_s11 = sand.u32 (%p1807_p13), 1, %s1398_s16  }
  0x5b   : > { %s1109_s12 = sshll.u32 (%p1807_p13), %s1402_s17, 7  ;;  %s1047_s13 = sshll.u32 (%p1807_p13), %s180_s11, 8 }
  0x5c   : > { %s1563_s21 = scalar_lea.vmem (%p1807_p13), %s1796_s0, %s1109_s12  ;;  %s1568_s23 = scalar_lea.vmem (%p1807_p13), [#allocation3], %s1047_s13 }
  0x5d   : > { %v275_v0 = vld [vmem:[%s1563_s21] sm:$0xff] (%p1807_p13)  ;;  %v277_v1 = vld [vmem:[%s1563_s21 + $0x8] sm:$0xff] (%p1807_p13)  ;;  %v279_v2 = vld [vmem:[%s1563_s21 + $0x10] sm:$0xff] (%p1807_p13) }
  0x5e   : > { %276 = vst [vmem:[%s1568_s23] sm:$0xff] (%p1807_p13), %v275_v0  ;;  %278 = vst [vmem:[%s1568_s23 + $0x8] sm:$0xff] (%p1807_p13), %v277_v1  ;;  %v281_v3 = vld [vmem:[%s1563_s21 + $0x18] sm:$0xff] (%p1807_p13)  ;;  %v283_v4 = vld [vmem:[%s1563_s21 + $0x20] sm:$0xff] (%p1807_p13) }
  0x5f   : > { %280 = vst [vmem:[%s1568_s23 + $0x10] sm:$0xff] (%p1807_p13), %v279_v2  ;;  %v285_v5 = vld [vmem:[%s1563_s21 + $0x28] sm:$0xff] (%p1807_p13)  ;;  %282 = vst [vmem:[%s1568_s23 + $0x18] sm:$0xff] (%p1807_p13), %v281_v3  ;;  %v287_v6 = vld [vmem:[%s1563_s21 + $0x30] sm:$0xff] (%p1807_p13) }
  0x60   : > { %284 = vst [vmem:[%s1568_s23 + $0x20] sm:$0xff] (%p1807_p13), %v283_v4  ;;  %286 = vst [vmem:[%s1568_s23 + $0x28] sm:$0xff] (%p1807_p13), %v285_v5  ;;  %v289_v7 = vld [vmem:[%s1563_s21 + $0x38] sm:$0xff] (%p1807_p13)  ;;  %v291_v8 = vld [vmem:[%s1563_s21 + $0x40] sm:$0xff] (%p1807_p13) }
  0x61   : > { %288 = vst [vmem:[%s1568_s23 + $0x30] sm:$0xff] %v287_v6  ;;  %290 = vst [vmem:[%s1568_s23 + $0x38] sm:$0xff] %v289_v7  ;;  %v293_v9 = vld [vmem:[%s1563_s21 + $0x48] sm:$0xff]  ;;  %v295_v10 = vld [vmem:[%s1563_s21 + $0x50] sm:$0xff] }
  0x62   : > { %292 = vst [vmem:[%s1568_s23 + $0x40] sm:$0xff] %v291_v8  ;;  %v297_v11 = vld [vmem:[%s1563_s21 + $0x58] sm:$0xff]  ;;  %294 = vst [vmem:[%s1568_s23 + $0x48] sm:$0xff] %v293_v9  ;;  %v299_v12 = vld [vmem:[%s1563_s21 + $0x60] sm:$0xff] }
  0x63   : > { %296 = vst [vmem:[%s1568_s23 + $0x50] sm:$0xff] %v295_v10  ;;  %298 = vst [vmem:[%s1568_s23 + $0x58] sm:$0xff] %v297_v11  ;;  %v301_v13 = vld [vmem:[%s1563_s21 + $0x68] sm:$0xff]  ;;  %v303_v14 = vld [vmem:[%s1563_s21 + $0x70] sm:$0xff] }
  0x64   : > { %300 = vst [vmem:[%s1568_s23 + $0x60] sm:$0xff] %v299_v12  ;;  %302 = vst [vmem:[%s1568_s23 + $0x68] sm:$0xff] %v301_v13  ;;  %v305_v15 = vld [vmem:[%s1563_s21 + $0x78] sm:$0xff]  ;;  %v307_v16 = vld [vmem:[%s1563_s21 + $0x100] sm:$0xff] }
  0x65   : > { %304 = vst [vmem:[%s1568_s23 + $0x70] sm:$0xff] %v303_v14  ;;  %v309_v17 = vld [vmem:[%s1563_s21 + $0x108] sm:$0xff]  ;;  %306 = vst [vmem:[%s1568_s23 + $0x78] sm:$0xff] %v305_v15  ;;  %v311_v18 = vld [vmem:[%s1563_s21 + $0x110] sm:$0xff] }
  0x66   : > { %308 = vst [vmem:[%s1568_s23 + $0x80] sm:$0xff] %v307_v16  ;;  %310 = vst [vmem:[%s1568_s23 + $0x88] sm:$0xff] %v309_v17  ;;  %v313_v19 = vld [vmem:[%s1563_s21 + $0x118] sm:$0xff]  ;;  %v315_v20 = vld [vmem:[%s1563_s21 + $0x120] sm:$0xff] }
  0x67   : > { %312 = vst [vmem:[%s1568_s23 + $0x90] sm:$0xff] %v311_v18  ;;  %314 = vst [vmem:[%s1568_s23 + $0x98] sm:$0xff] %v313_v19  ;;  %v317_v21 = vld [vmem:[%s1563_s21 + $0x128] sm:$0xff]  ;;  %v319_v22 = vld [vmem:[%s1563_s21 + $0x130] sm:$0xff] }
  0x68   : > { %316 = vst [vmem:[%s1568_s23 + $0xa0] sm:$0xff] %v315_v20  ;;  %v321_v23 = vld [vmem:[%s1563_s21 + $0x138] sm:$0xff]  ;;  %318 = vst [vmem:[%s1568_s23 + $0xa8] sm:$0xff] %v317_v21  ;;  %v323_v24 = vld [vmem:[%s1563_s21 + $0x140] sm:$0xff] }
  0x69   : > { %320 = vst [vmem:[%s1568_s23 + $0xb0] sm:$0xff] %v319_v22  ;;  %322 = vst [vmem:[%s1568_s23 + $0xb8] sm:$0xff] %v321_v23  ;;  %v325_v25 = vld [vmem:[%s1563_s21 + $0x148] sm:$0xff]  ;;  %v327_v26 = vld [vmem:[%s1563_s21 + $0x150] sm:$0xff] }
  0x6a   : > { %324 = vst [vmem:[%s1568_s23 + $0xc0] sm:$0xff] %v323_v24  ;;  %326 = vst [vmem:[%s1568_s23 + $0xc8] sm:$0xff] %v325_v25  ;;  %v329_v27 = vld [vmem:[%s1563_s21 + $0x158] sm:$0xff]  ;;  %v331_v28 = vld [vmem:[%s1563_s21 + $0x160] sm:$0xff] }
  0x6b   : > { %328 = vst [vmem:[%s1568_s23 + $0xd0] sm:$0xff] %v327_v26  ;;  %v333_v29 = vld [vmem:[%s1563_s21 + $0x168] sm:$0xff]  ;;  %330 = vst [vmem:[%s1568_s23 + $0xd8] sm:$0xff] %v329_v27  ;;  %v335_v30 = vld [vmem:[%s1563_s21 + $0x170] sm:$0xff] }
  0x6c   : > { %332 = vst [vmem:[%s1568_s23 + $0xe0] sm:$0xff] %v331_v28  ;;  %334 = vst [vmem:[%s1568_s23 + $0xe8] sm:$0xff] %v333_v29  ;;  %v337_v31 = vld [vmem:[%s1563_s21 + $0x178] sm:$0xff] }
  0x6d   : > { %336 = vst [vmem:[%s1568_s23 + $0xf0] sm:$0xff] %v335_v30  ;;  %338 = vst [vmem:[%s1568_s23 + $0xf8] sm:$0xff] %v337_v31 }
  0x6e PF: > { %p1808_p10 = scmp.ne.s32.totalorder %s1804_s24, 0 }
  0x6f   : > { %s350_s17 = sand.u32 (!%p1808_p10), 1, %s1394_s15   ;;  %p1809_p12 = scmp.eq.s32.totalorder (!%p1808_p10), %s1451_s18, 0 }
  0x70   : > { %347 = sbr.rel (%p1808_p10) target bundleno = 427 (0x1ab), region = 70  ;;  %s1051_s29 = sshll.u32 (!%p1808_p10), %s350_s17, 8 }
  0x71   : > { %s1634_s5 = scalar_lea.vmem (!%p1808_p10), [#allocation3], %s1051_s29 }
  0x77   : > { %1385 = dma.done.wait (%p1809_p12), [#allocation5], 512   ;;  %p1810_p6 = pmov %p1809_p12 }
  0x79   : > { %1387 = vsyncadd (%p1810_p6), [#allocation5], 4294966784  ;;  %p1811_p4 = pmov %p1810_p6 }
  0x7b   : > { %1389 = dma.done.wait (%p1811_p4), [#allocation7], 32   ;;  %p1812_p7 = pmov %p1811_p4 }
  0x7c   : > { %p1813_p8 = scmp.ne.s32.totalorder %s1451_s18, 0 }
  0x7d   : > { %1391 = vsyncadd (%p1812_p7), [#allocation7], 4294967264  ;;  %v1409_v32 = vmov (!%p1813_p8), 0.0  }
  0x7e   : > { %386 = sbr.rel (%p1813_p8) target bundleno = 133 (0x85), region = 90  ;;  %387 = vst [vmem:[#allocation2] sm:$0x3] (!%p1813_p8), %v1409_v32 }
  0x85 PF: > { %v388_v33 = vld [vmem:[#allocation4] sm:$0xff]  ;;  %v389_v34 = vld [vmem:[#allocation4 + $0x8] sm:$0xff]  ;;  %v390_v35 = vld [vmem:[#allocation4 + $0x10] sm:$0xff]  ;;  %vm416_vm0 = vcmask 261120   ;;  %p1106_p0 = scmp.ne.s32.totalorder %s1451_s18, 1 }
  0x86   : > { %v1214_v36 = vpack.c.bf16 %v389_v34, %v388_v33  ;;  %v391_v37 = vld [vmem:[#allocation4 + $0x18] sm:$0xff]  ;;  %v394_v38 = vld [vmem:[%s1634_s5] sm:$0xff]  ;;  %v395_v41 = vld [vmem:[%s1634_s5 + $0x8] sm:$0xff] }
  0x87   : > { %v1074_v39 = vld [vmem:[%s1634_s5 + $0x80] sm:$0xff]  ;;  %v1218_v40 = vpack.c.bf16 %v391_v37, %v390_v35  ;;  %1158 = vmatprep.mubr.msk.f32.mxu0 %vm416_vm0, %v394_v38  ;;  %v1075_v42 = vld [vmem:[%s1634_s5 + $0x88] sm:$0xff]  ;;  %v396_v43 = vld [vmem:[%s1634_s5 + $0x10] sm:$0xff] }
  0x88   : > { %1190 = vmatprep.mubr.msk.f32.mxu1 %vm416_vm0, %v1074_v39  ;;  %1215 = vmatprep.subr.bf16.mxu0 %v1214_v36  ;;  %v1076_v44 = vld [vmem:[%s1634_s5 + $0x90] sm:$0xff]  ;;  %v397_v45 = vld [vmem:[%s1634_s5 + $0x18] sm:$0xff]  ;;  %v398_v47 = vld [vmem:[%s1634_s5 + $0x20] sm:$0xff] }
  0x89   : > { %1223 = vmatprep.subr.bf16.mxu1 %v1214_v36  ;;  %1217 = vmatpush3.bf16.msra.mxu0 %v1214_v36  ;;  %v1077_v46 = vld [vmem:[%s1634_s5 + $0x98] sm:$0xff]  ;;  %v1078_v48 = vld [vmem:[%s1634_s5 + $0xa0] sm:$0xff]  ;;  %v399_v49 = vld [vmem:[%s1634_s5 + $0x28] sm:$0xff] }
  0x8a   : > { %1225 = vmatpush3.bf16.msra.mxu1 %v1214_v36  ;;  %1219 = vmatprep.subr.bf16.mxu0 %v1218_v40  ;;  %v1079_v50 = vld [vmem:[%s1634_s5 + $0xa8] sm:$0xff]  ;;  %v400_v51 = vld [vmem:[%s1634_s5 + $0x30] sm:$0xff]  ;;  %v401_v53 = vld [vmem:[%s1634_s5 + $0x38] sm:$0xff] }
  0x8b   : > { %1227 = vmatprep.subr.bf16.mxu1 %v1218_v40  ;;  %v1080_v52 = vld [vmem:[%s1634_s5 + $0xb0] sm:$0xff]  ;;  %v1081_v54 = vld [vmem:[%s1634_s5 + $0xb8] sm:$0xff]  ;;  %v402_v55 = vld [vmem:[%s1634_s5 + $0x40] sm:$0xff] }
  0x8c   : > { %v1082_v56 = vld [vmem:[%s1634_s5 + $0xc0] sm:$0xff]  ;;  %v403_v57 = vld [vmem:[%s1634_s5 + $0x48] sm:$0xff]  ;;  %v404_v59 = vld [vmem:[%s1634_s5 + $0x50] sm:$0xff] }
  0x8d   : > { %1221 = vmatpush3.bf16.msra.mxu0 %v1218_v40  ;;  %v1083_v58 = vld [vmem:[%s1634_s5 + $0xc8] sm:$0xff]  ;;  %v1084_v60 = vld [vmem:[%s1634_s5 + $0xd0] sm:$0xff]  ;;  %v405_v61 = vld [vmem:[%s1634_s5 + $0x58] sm:$0xff] }
  0x8e   : > { %1229 = vmatpush3.bf16.msra.mxu1 %v1218_v40  ;;  %v1085_v62 = vld [vmem:[%s1634_s5 + $0xd8] sm:$0xff]  ;;  %v406_v63 = vld [vmem:[%s1634_s5 + $0x60] sm:$0xff]  ;;  %v407_v1 = vld [vmem:[%s1634_s5 + $0x68] sm:$0xff] }
  0x8f   : > { %v1086_v0 = vld [vmem:[%s1634_s5 + $0xe0] sm:$0xff]  ;;  %v1087_v2 = vld [vmem:[%s1634_s5 + $0xe8] sm:$0xff]  ;;  %v408_v3 = vld [vmem:[%s1634_s5 + $0x70] sm:$0xff] }
  0x90   : > { %1159 = vmatmul.mubr.msk.f32.vlgmr.msra.gmra.mrb[0].mxu0 %vm416_vm0, %v395_v41  ;;  %v1088_v4 = vld [vmem:[%s1634_s5 + $0xf0] sm:$0xff]  ;;  %v409_v5 = vld [vmem:[%s1634_s5 + $0x78] sm:$0xff]  ;;  %v1710_v7 = vld [vmem:[#allocation6] ss:$0 sm:$0xff] }
  0x91   : > { %1191 = vmatmul.mubr.msk.f32.vlgmr.msra.gmra.mrb[0].mxu1 %vm416_vm0, %v1075_v42  ;;  %1161 = vmatprep.mubr.msk.f32.mxu0 %vm416_vm0, %v396_v43  ;;  %v1089_v6 = vld [vmem:[%s1634_s5 + $0xf8] sm:$0xff]  ;;  %v1712_v8 = vld [vmem:[#allocation8] ss:$0 sm:$0xff] }
  0x92   : > { %1193 = vmatprep.mubr.msk.f32.mxu1 %vm416_vm0, %v1076_v44 }
  0x94   : > { %1162 = vmatmul.mubr.msk.f32.gmra.mrb[2].mxu0 %vm416_vm0, %v397_v45 }
  0x95   : > { %1194 = vmatmul.mubr.msk.f32.gmra.mrb[2].mxu1 %vm416_vm0, %v1077_v46  ;;  %1164 = vmatprep.mubr.msk.f32.mxu0 %vm416_vm0, %v398_v47 }
  0x96   : > { %1196 = vmatprep.mubr.msk.f32.mxu1 %vm416_vm0, %v1078_v48 }
  0x98   : > { %1165 = vmatmul.mubr.msk.f32.gmra.mrb[4].mxu0 %vm416_vm0, %v399_v49 }
  0x99   : > { %1197 = vmatmul.mubr.msk.f32.gmra.mrb[4].mxu1 %vm416_vm0, %v1079_v50  ;;  %1167 = vmatprep.mubr.msk.f32.mxu0 %vm416_vm0, %v400_v51 }
  0x9a   : > { %1199 = vmatprep.mubr.msk.f32.mxu1 %vm416_vm0, %v1080_v52 }
  0x9c   : > { %1168 = vmatmul.mubr.msk.f32.gmra.mrb[6].mxu0 %vm416_vm0, %v401_v53 }
  0x9d   : > { %1200 = vmatmul.mubr.msk.f32.gmra.mrb[6].mxu1 %vm416_vm0, %v1081_v54  ;;  %1170 = vmatprep.mubr.msk.f32.mxu0 %vm416_vm0, %v402_v55 }
  0x9e   : > { %1202 = vmatprep.mubr.msk.f32.mxu1 %vm416_vm0, %v1082_v56 }
  0xa0   : > { %1171 = vmatmul.mubr.msk.f32.gmra.mrb[8].mxu0 %vm416_vm0, %v403_v57 }
  0xa1   : > { %1203 = vmatmul.mubr.msk.f32.gmra.mrb[8].mxu1 %vm416_vm0, %v1083_v58  ;;  %1173 = vmatprep.mubr.msk.f32.mxu0 %vm416_vm0, %v404_v59 }
  0xa2   : > { %1205 = vmatprep.mubr.msk.f32.mxu1 %vm416_vm0, %v1084_v60 }
  0xa4   : > { %1174 = vmatmul.mubr.msk.f32.gmra.mrb[10].mxu0 %vm416_vm0, %v405_v61 }
  0xa5   : > { %1206 = vmatmul.mubr.msk.f32.gmra.mrb[10].mxu1 %vm416_vm0, %v1085_v62  ;;  %1176 = vmatprep.mubr.msk.f32.mxu0 %vm416_vm0, %v406_v63 }
  0xa6   : > { %1208 = vmatprep.mubr.msk.f32.mxu1 %vm416_vm0, %v1086_v0 }
  0xa8   : > { %1177 = vmatmul.mubr.msk.f32.gmra.mrb[12].mxu0 %vm416_vm0, %v407_v1 }
  0xa9   : > { %1209 = vmatmul.mubr.msk.f32.gmra.mrb[12].mxu1 %vm416_vm0, %v1087_v2  ;;  %1179 = vmatprep.mubr.msk.f32.mxu0 %vm416_vm0, %v408_v3 }
  0xaa   : > { %1211 = vmatprep.mubr.msk.f32.mxu1 %vm416_vm0, %v1088_v4 }
  0xac   : > { %1180 = vmatmul.mubr.msk.f32.gmra.mrb[14].mxu0 %vm416_vm0, %v409_v5 }
  0xad   : > { %1212 = vmatmul.mubr.msk.f32.gmra.mrb[14].mxu1 %vm416_vm0, %v1089_v6 }
 0x163   : > { %v1160_v9 = vpop.f32.mrb[0].mxu0 }
 0x164   : > { %v1192_v10 = vpop.f32.mrb[0].mxu1  ;;  %v537_v11 = vadd.f32 %v1160_v9, %v1710_v7  ;;  %v531_v13 = vpop.f32.mrb[1].mxu0 }
 0x165   : > { %v822_v12 = vadd.f32 %v1192_v10, %v1710_v7  ;;  %v816_v14 = vpop.f32.mrb[1].mxu1  ;;  %v532_v15 = vadd.f32 %v1710_v7, %v531_v13 }
 0x166   : > { %v817_v16 = vadd.f32 %v1710_v7, %v816_v14  ;;  %vm611_vm1 = vcmp.gt.f32.partialorder %v537_v11, 0.0  ;;  %v633_v17 = vmul.f32 %v1712_v8, %v537_v11 }
 0x167   : > { %vm896_vm2 = vcmp.gt.f32.partialorder %v822_v12, 0.0  ;;  %v912_v18 = vmul.f32 %v1712_v8, %v822_v12  ;;  %vm610_vm3 = vcmp.gt.f32.partialorder %v532_v15, 0.0  ;;  %v632_v19 = vmul.f32 %v1712_v8, %v532_v15  ;;  %v1163_v21 = vpop.f32.mrb[2].mxu0 }
 0x168   : > { %vm895_vm4 = vcmp.gt.f32.partialorder %v817_v16, 0.0  ;;  %v911_v20 = vmul.f32 %v1712_v8, %v817_v16  ;;  %v1195_v22 = vpop.f32.mrb[2].mxu1  ;;  %v649_v23 = vsel %vm611_vm1, %v537_v11, %v633_v17  ;;  %v547_v25 = vadd.f32 %v1163_v21, %v1710_v7  ;;  %v541_v27 = vpop.f32.mrb[3].mxu0 }
 0x169   : > { %v928_v24 = vsel %vm896_vm2, %v822_v12, %v912_v18  ;;  %v832_v26 = vadd.f32 %v1195_v22, %v1710_v7  ;;  %v826_v28 = vpop.f32.mrb[3].mxu1  ;;  %v648_v29 = vsel %vm610_vm3, %v532_v15, %v632_v19  ;;  %v542_v31 = vadd.f32 %v1710_v7, %v541_v27 }
 0x16a   : > { %v927_v30 = vsel %vm895_vm4, %v817_v16, %v911_v20  ;;  %v827_v32 = vadd.f32 %v1710_v7, %v826_v28  ;;  %v664_v33 = vadd.f32 %v649_v23, %v648_v29  ;;  %vm613_vm5 = vcmp.gt.f32.partialorder %v547_v25, 0.0 }
 0x16b   : > { %v943_v34 = vadd.f32 %v928_v24, %v927_v30  ;;  %v635_v35 = vmul.f32 %v1712_v8, %v547_v25  ;;  %v914_v36 = vmul.f32 %v1712_v8, %v832_v26  ;;  %vm612_vm6 = vcmp.gt.f32.partialorder %v542_v31, 0.0  ;;  %v1166_v38 = vpop.f32.mrb[4].mxu0 }
 0x16c   : > { %v634_v37 = vmul.f32 %v1712_v8, %v542_v31  ;;  %v1198_v39 = vpop.f32.mrb[4].mxu1  ;;  %vm898_vm7 = vcmp.gt.f32.partialorder %v832_v26, 0.0  ;;  %vm897_vm8 = vcmp.gt.f32.partialorder %v827_v32, 0.0  ;;  %v913_v40 = vmul.f32 %v1712_v8, %v827_v32  ;;  %v551_v42 = vpop.f32.mrb[5].mxu0 }
 0x16d   : > { %v557_v41 = vadd.f32 %v1166_v38, %v1710_v7  ;;  %v836_v43 = vpop.f32.mrb[5].mxu1  ;;  %v651_v44 = vsel %vm613_vm5, %v547_v25, %v635_v35  ;;  %v842_v46 = vadd.f32 %v1198_v39, %v1710_v7  ;;  %v552_v47 = vadd.f32 %v1710_v7, %v551_v42 }
 0x16e   : > { %v650_v45 = vsel %vm612_vm6, %v542_v31, %v634_v37  ;;  %v929_v49 = vsel %vm897_vm8, %v827_v32, %v913_v40  ;;  %v930_v51 = vsel %vm898_vm7, %v832_v26, %v914_v36  ;;  %v837_v58 = vadd.f32 %v1710_v7, %v836_v43 }
 0x16f   : > { %v665_v48 = vadd.f32 %v664_v33, %v650_v45  ;;  %vm615_vm9 = vcmp.gt.f32.partialorder %v557_v41, 0.0  ;;  %v637_v50 = vmul.f32 %v1712_v8, %v557_v41  ;;  %v944_v52 = vadd.f32 %v943_v34, %v929_v49  ;;  %v1169_v54 = vpop.f32.mrb[6].mxu0 }
 0x170   : > { %v916_v53 = vmul.f32 %v1712_v8, %v842_v46  ;;  %vm614_vm10 = vcmp.gt.f32.partialorder %v552_v47, 0.0  ;;  %v1201_v55 = vpop.f32.mrb[6].mxu1  ;;  %vm900_vm11 = vcmp.gt.f32.partialorder %v842_v46, 0.0  ;;  %v636_v56 = vmul.f32 %v1712_v8, %v552_v47  ;;  %v561_v59 = vpop.f32.mrb[7].mxu0 }
 0x171   : > { %v666_v57 = vadd.f32 %v665_v48, %v651_v44  ;;  %v846_v60 = vpop.f32.mrb[7].mxu1  ;;  %v653_v61 = vsel %vm615_vm9, %v557_v41, %v637_v50  ;;  %v945_v62 = vadd.f32 %v944_v52, %v930_v51  ;;  %v567_v63 = vadd.f32 %v1169_v54, %v1710_v7 }
 0x172   : > { %v852_v0 = vadd.f32 %v1201_v55, %v1710_v7  ;;  %v652_v1 = vsel %vm614_vm10, %v552_v47, %v636_v56  ;;  %vm899_vm12 = vcmp.gt.f32.partialorder %v837_v58, 0.0  ;;  %v915_v2 = vmul.f32 %v1712_v8, %v837_v58 }
 0x173   : > { %v562_v3 = vadd.f32 %v1710_v7, %v561_v59  ;;  %v932_v4 = vsel %vm900_vm11, %v842_v46, %v916_v53  ;;  %v667_v5 = vadd.f32 %v666_v57, %v652_v1  ;;  %vm617_vm13 = vcmp.gt.f32.partialorder %v567_v63, 0.0  ;;  %v1172_v9 = vpop.f32.mrb[8].mxu0 }
 0x174   : > { %v639_v6 = vmul.f32 %v1712_v8, %v567_v63  ;;  %v1204_v10 = vpop.f32.mrb[8].mxu1  ;;  %v931_v11 = vsel %vm899_vm12, %v837_v58, %v915_v2  ;;  %vm902_vm14 = vcmp.gt.f32.partialorder %v852_v0, 0.0  ;;  %v571_v13 = vpop.f32.mrb[9].mxu0  ;;  %v918_v16 = vmul.f32 %v1712_v8, %v852_v0 }
 0x175   : > { %vm616_vm15 = vcmp.gt.f32.partialorder %v562_v3, 0.0  ;;  %v638_v12 = vmul.f32 %v1712_v8, %v562_v3  ;;  %v856_v14 = vpop.f32.mrb[9].mxu1  ;;  %v946_v15 = vadd.f32 %v945_v62, %v931_v11  ;;  %v668_v17 = vadd.f32 %v667_v5, %v653_v61 }
 0x176   : > { %v847_v18 = vadd.f32 %v1710_v7, %v846_v60  ;;  %v655_v19 = vsel %vm617_vm13, %v567_v63, %v639_v6  ;;  %v577_v21 = vadd.f32 %v1172_v9, %v1710_v7  ;;  %v862_v22 = vadd.f32 %v1204_v10, %v1710_v7 }
 0x177   : > { %v654_v20 = vsel %vm616_vm15, %v562_v3, %v638_v12  ;;  %v947_v25 = vadd.f32 %v946_v15, %v932_v4  ;;  %v1175_v26 = vpop.f32.mrb[10].mxu0  ;;  %v572_v33 = vadd.f32 %v1710_v7, %v571_v13  ;;  %v857_v35 = vadd.f32 %v1710_v7, %v856_v14 }
 0x178   : > { %v669_v23 = vadd.f32 %v668_v17, %v654_v20  ;;  %vm901_vm0 = vcmp.gt.f32.partialorder %v847_v18, 0.0  ;;  %v917_v24 = vmul.f32 %v1712_v8, %v847_v18  ;;  %v1207_v27 = vpop.f32.mrb[10].mxu1  ;;  %vm619_vm1 = vcmp.gt.f32.partialorder %v577_v21, 0.0  ;;  %v581_v30 = vpop.f32.mrb[11].mxu0 }
 0x179   : > { %v641_v28 = vmul.f32 %v1712_v8, %v577_v21  ;;  %vm904_vm2 = vcmp.gt.f32.partialorder %v862_v22, 0.0  ;;  %v920_v29 = vmul.f32 %v1712_v8, %v862_v22  ;;  %v866_v31 = vpop.f32.mrb[11].mxu1  ;;  %v934_v36 = vsel %vm902_vm14, %v852_v0, %v918_v16 }
 0x17a   : > { %v933_v32 = vsel %vm901_vm0, %v847_v18, %v917_v24  ;;  %v670_v34 = vadd.f32 %v669_v23, %v655_v19  ;;  %v587_v39 = vadd.f32 %v1175_v26, %v1710_v7  ;;  %vm618_vm3 = vcmp.gt.f32.partialorder %v572_v33, 0.0 }
 0x17b   : > { %v948_v37 = vadd.f32 %v947_v25, %v933_v32  ;;  %v657_v38 = vsel %vm619_vm1, %v577_v21, %v641_v28  ;;  %v640_v40 = vmul.f32 %v1712_v8, %v572_v33  ;;  %vm903_vm4 = vcmp.gt.f32.partialorder %v857_v35, 0.0  ;;  %v1178_v42 = vpop.f32.mrb[12].mxu0 }
 0x17c   : > { %v919_v41 = vmul.f32 %v1712_v8, %v857_v35  ;;  %v1210_v43 = vpop.f32.mrb[12].mxu1  ;;  %v936_v44 = vsel %vm904_vm2, %v862_v22, %v920_v29  ;;  %vm621_vm5 = vcmp.gt.f32.partialorder %v587_v39, 0.0  ;;  %v872_v46 = vadd.f32 %v1207_v27, %v1710_v7  ;;  %v591_v47 = vpop.f32.mrb[13].mxu0 }
 0x17d   : > { %v949_v45 = vadd.f32 %v948_v37, %v934_v36  ;;  %v876_v48 = vpop.f32.mrb[13].mxu1  ;;  %v656_v49 = vsel %vm618_vm3, %v572_v33, %v640_v40  ;;  %v582_v51 = vadd.f32 %v1710_v7, %v581_v30  ;;  %v867_v52 = vadd.f32 %v1710_v7, %v866_v31 }
 0x17e   : > { %v935_v50 = vsel %vm903_vm4, %v857_v35, %v919_v41  ;;  %v671_v53 = vadd.f32 %v670_v34, %v656_v49  ;;  %v643_v55 = vmul.f32 %v1712_v8, %v587_v39  ;;  %vm906_vm6 = vcmp.gt.f32.partialorder %v872_v46, 0.0 }
 0x17f   : > { %v950_v54 = vadd.f32 %v949_v45, %v935_v50  ;;  %v922_v56 = vmul.f32 %v1712_v8, %v872_v46  ;;  %vm620_vm7 = vcmp.gt.f32.partialorder %v582_v51, 0.0  ;;  %v642_v57 = vmul.f32 %v1712_v8, %v582_v51  ;;  %v1181_v58 = vpop.f32.mrb[14].mxu0 }
 0x180   : > { %vm905_vm8 = vcmp.gt.f32.partialorder %v867_v52, 0.0  ;;  %v1213_v59 = vpop.f32.mrb[14].mxu1  ;;  %v672_v60 = vadd.f32 %v671_v53, %v657_v38  ;;  %v921_v61 = vmul.f32 %v1712_v8, %v867_v52  ;;  %v597_v63 = vadd.f32 %v1178_v42, %v1710_v7  ;;  %v601_v0 = vpop.f32.mrb[15].mxu0  ;;  %v964_v53 = vld [vmem:[#allocation2] sm:$0x3] }
 0x181   : > { %v951_v62 = vadd.f32 %v950_v54, %v936_v44  ;;  %v886_v1 = vpop.f32.mrb[15].mxu1  ;;  %v658_v2 = vsel %vm620_vm7, %v582_v51, %v642_v57  ;;  %v882_v3 = vadd.f32 %v1210_v43, %v1710_v7  ;;  %v592_v4 = vadd.f32 %v1710_v7, %v591_v47 }
 0x182   : > { %v659_v5 = vsel %vm621_vm5, %v587_v39, %v643_v55  ;;  %v673_v6 = vadd.f32 %v672_v60, %v658_v2  ;;  %v937_v9 = vsel %vm905_vm8, %v867_v52, %v921_v61  ;;  %v938_v10 = vsel %vm906_vm6, %v872_v46, %v922_v56 }
 0x183   : > { %v952_v11 = vadd.f32 %v951_v62, %v937_v9  ;;  %v645_v12 = vmul.f32 %v1712_v8, %v597_v63  ;;  %vm622_vm9 = vcmp.gt.f32.partialorder %v592_v4, 0.0  ;;  %vm623_vm10 = vcmp.gt.f32.partialorder %v597_v63, 0.0 }
 0x184   : > { %v644_v13 = vmul.f32 %v1712_v8, %v592_v4  ;;  %v674_v14 = vadd.f32 %v673_v6, %v659_v5  ;;  %v877_v15 = vadd.f32 %v1710_v7, %v876_v48  ;;  %v924_v16 = vmul.f32 %v1712_v8, %v882_v3 }
 0x185   : > { %v953_v17 = vadd.f32 %v952_v11, %v938_v10  ;;  %v607_v18 = vadd.f32 %v1181_v58, %v1710_v7  ;;  %v892_v19 = vadd.f32 %v1213_v59, %v1710_v7  ;;  %v602_v22 = vadd.f32 %v1710_v7, %v601_v0 }
 0x186   : > { %v660_v20 = vsel %vm622_vm9, %v592_v4, %v644_v13  ;;  %vm907_vm11 = vcmp.gt.f32.partialorder %v877_v15, 0.0  ;;  %v923_v21 = vmul.f32 %v1712_v8, %v877_v15  ;;  %v661_v23 = vsel %vm623_vm10, %v597_v63, %v645_v12 }
 0x187   : > { %vm908_vm12 = vcmp.gt.f32.partialorder %v882_v3, 0.0  ;;  %v675_v24 = vadd.f32 %v674_v14, %v660_v20  ;;  %v647_v26 = vmul.f32 %v1712_v8, %v607_v18  ;;  %vm624_vm13 = vcmp.gt.f32.partialorder %v602_v22, 0.0 }
 0x188   : > { %v939_v25 = vsel %vm907_vm11, %v877_v15, %v923_v21  ;;  %v646_v27 = vmul.f32 %v1712_v8, %v602_v22  ;;  %vm625_vm14 = vcmp.gt.f32.partialorder %v607_v18, 0.0  ;;  %v887_v30 = vadd.f32 %v1710_v7, %v886_v1 }
 0x189   : > { %v954_v28 = vadd.f32 %v953_v17, %v939_v25  ;;  %v676_v29 = vadd.f32 %v675_v24, %v661_v23  ;;  %v940_v31 = vsel %vm908_vm12, %v882_v3, %v924_v16  ;;  %v926_v32 = vmul.f32 %v1712_v8, %v892_v19 }
 0x18a   : > { %v662_v33 = vsel %vm624_vm13, %v602_v22, %v646_v27  ;;  %vm909_vm15 = vcmp.gt.f32.partialorder %v887_v30, 0.0  ;;  %v925_v35 = vmul.f32 %v1712_v8, %v887_v30  ;;  %v663_v37 = vsel %vm625_vm14, %v607_v18, %v647_v26 }
 0x18b   : > { %v677_v34 = vadd.f32 %v676_v29, %v662_v33  ;;  %v955_v36 = vadd.f32 %v954_v28, %v940_v31  ;;  %vm910_vm0 = vcmp.gt.f32.partialorder %v892_v19, 0.0  ;;  %vm965_vm1 = vcmask 1040384  }
 0x18c   : > { %v941_v39 = vsel %vm909_vm15, %v887_v30, %v925_v35  ;;  %v942_v41 = vsel %vm910_vm0, %v892_v19, %v926_v32 }
 0x18d   : > { %v678_v38 = vadd.f32 %v677_v34, %v663_v37  ;;  %v956_v40 = vadd.f32 %v955_v36, %v941_v39 }
 0x18f   : > { %v679_v42 = vrot.slane %v678_v38, 4  ;;  %v957_v43 = vadd.f32 %v956_v40, %v942_v41 }
 0x191   : > { %v680_v44 = vadd.f32 %v679_v42, %v678_v38  ;;  %v958_v45 = vrot.slane %v957_v43, 4 }
 0x193   : > { %v681_v7 = vrot.slane %v680_v44, 2  ;;  %v959_v46 = vadd.f32 %v958_v45, %v957_v43 }
 0x195   : > { %v682_v47 = vadd.f32 %v681_v7, %v680_v44  ;;  %v960_v48 = vrot.slane %v959_v46, 2 }
 0x197   : > { %v683_v49 = vrot.slane %v682_v47, 1  ;;  %v961_v50 = vadd.f32 %v960_v48, %v959_v46 }
 0x199   : > { %v684_v51 = vadd.f32 %v683_v49, %v682_v47  ;;  %v962_v52 = vrot.slane %v961_v50, 1 }
 0x19a   : > { %972 = sbr.rel (%p1106_p0) target bundleno = 427 (0x1ab), region = 94 }
 0x19b   : > { %v963_v8 = vadd.f32 %v962_v52, %v961_v50 }
 0x19d   : > { %v966_v54 = vsel %vm965_vm1, %v684_v51, %v963_v8 }
 0x19e   : > { %v967_v55 = vadd.f32 %v966_v54, %v964_v53 }
 0x1a0   : > { %968 = vst [vmem:[#allocation2] sm:$0x3] %v967_v55 }
 0x1a7   : > { %v973_v56 = vld [vmem:[#allocation2] sm:$0x3] }
 0x1a8   : > { %v974_v57 = vmul.f32 0.00390625, %v973_v56 }
 0x1aa   : > { %975 = vst [vmem:[%s1800_s4] sm:$0x3] %v974_v57 }
 0x1ab PF: > { %p13_p1 = scmp.ge.s32.totalorder %s1454_s19, 4   ;;  %s1814_s15 = smov %s1398_s16 }
 0x1ac   : > { %s1815_s16 = smov %s1464_s22  ;;  %s1816_s17 = smov %s1454_s19 }
 0x1ad   :  { %15 = sbr.rel (!%p13_p1) target bundleno = 3 (0x3), region = 127 }
 0x1b4   :  { %987 = vsyncpa [#allocation5], 1 }
 0x1b5   :  { %989 = vsyncpa [#allocation5 + $0x1], 1 }
 0x1b6   :  { %990 = vsyncpa [#allocation7], 1 }

// kernel: face_model_forward.3
= control target key start
LH: loop header
LB: loop body
LE: loop exit
PB: predicated region body
PF: predicated region fallthrough
CT: control target
= control target key end

     0   :  { %s6197_s0 = inlined_call_operand.vmem [shape: f32[8,128], index: 0, kind: input, shape index: {}]   ;;  %s6198_s1 = inlined_call_operand.hbm [shape: f32[128,512], index: 1, kind: input, shape index: {}]   ;;  %s6199_s2 = inlined_call_operand.hbm [shape: f32[1,512], index: 2, kind: input, shape index: {}]   ;;  %s6200_s3 = inlined_call_operand.hbm [shape: bf16[512,10240], index: 3, kind: input, shape index: {}]   ;;  %s6201_s4 = inlined_call_operand.hbm [shape: f32[1,10240], index: 4, kind: input, shape index: {}]   ;;  %s6202_s5 = inlined_call_operand.vmem [shape: f32[8,10240], index: 5, kind: output, shape index: {}]  }
   0x1   :  { %6210 = sst [smem:[#allocation11_spill]] %s6198_s1 }
   0x2   :  { %6211 = sst [smem:[#allocation12_spill]] %s6200_s3 }
   0x3   :  { %10 = vsyncpa [#allocation3], 0 }
   0x4   :  { %11 = vsyncpa [#allocation5], 0  ;;  %s5341_s18 = smov 0   ;;  %s5343_s19 = smov 0  }
   0x5   :  { %s5345_s20 = smov 0   ;;  %s5347_s21 = smov 0  }
   0x6 LB: > { %s5360_s22 = sadd.s32 4294967295, %s5299_s21   ;;  %s5363_s23 = sadd.s32 1, %s5299_s21   ;;  %s5299_s21 = sphi %s5347_s21, %s6234_s21   ;;  %s5295_s20 = sphi %s5345_s20, %s6233_s20   ;;  %s5291_s19 = sphi %s5343_s19, %s6232_s19   ;;  %s5287_s18 = sphi %s5341_s18, %s6231_s18  }
   0x7   : > { %s84_s24 = ssub.s32 %s5299_s21, %s5363_s23  ;;  %s87_s25 = sadd.s32 1, %s5295_s20 }
   0x8   : > { %p85_p0 = scmp.eq.s32.totalorder %s84_s24, 0  ;;  %p94_p1 = scmp.ne.s32.totalorder %s5295_s20, %s5291_s19 }
   0x9   : > { %p95_p2 = scmp.eq.s32.totalorder %s5299_s21, 0  ;;  %p100_p3 = scmp.ne.s32.totalorder %s5291_s19, %s5287_s18 }
   0xa   : > { %s5373_s26 = scalar_select %p85_p0, %s5295_s20, %s87_s25  }
   0xb   : > { %p5375_p4 = por %p95_p2, %p94_p1  ;;  %p6203_p5 = scmp.eq.s32.totalorder %s5360_s22, 0 }
   0xc   : > { %p3417_p6 = scmp.ge.s32.totalorder %s5299_s21, 1  ;;  %p163_p7 = scmp.lt.s32.totalorder %s5299_s21, 6 }
   0xd   : > { %p5384_p8 = por %p6203_p5, %p100_p3  ;;  %s5301_s30 = smov [#allocation2]  }
   0xe   : > { %p5388_p9 = pnand %p3417_p6, %p163_p7  ;;  %s178_s6 = sshll.u32 %s5301_s30, 4  ;;  %s179_s6 = int_to_ptr.vmem [resolvable:$true] %s178_s6 }
   0xf   : > { %s6213_s28 = scalar_select %p5384_p8, 1, 0 }
  0x10   : > { %s6214_s29 = scalar_select %p5388_p9, 1, 0 }
  0x11   : > { %p5082_p10 = pneg %p5388_p9  ;;  %p5098_p12 = scmp.lt.s32.totalorder %s5299_s21, 5 }
  0x12   : > { %s203_s8 = sand.u32 1, %s5299_s21   ;;  %s205_s9 = sand.u32 1, %s5295_s20  }
  0x13   : > { %p5396_p11 = pnand %p5082_p10, %p6203_p5  ;;  %p5405_p13 = pnand %p5098_p12, %p5375_p4 }
  0x14   : > { %s6217_s1 = sld [smem:[#allocation11_spill]] }
  0x15   : > { %s6216_s10 = scalar_select %p5405_p13, 1, 0 }
  0x16   : > { %p6207_p1 = pneg %p5396_p11 }
  0x1a   : > { %s5141_s13 = scalar_lea.hbm %s6217_s1, 8192 }
  0x1b   : > { %p5142_p0 = scmp.ne.s32.totalorder %s6217_s1, %s5141_s13  ;;  %p5148_p4 = scmp.lt.u32.totalorder %s5141_s13, %s6217_s1 }
  0x1d   : > { %p5144_p2 = pnand %p6207_p1, %p5142_p0 }
  0x1f   : > { %p5145_p3 = pneg %p5144_p2 }
  0x21   : > { %p5150_p6 = pnand %p5148_p4, %p5145_p3 }
  0x23   : > { %5153 = shalt.err (!%p5150_p6)
}
  0x24   : > { %s5154_s18 = scalar_lea.vmem %s179_s6, 8192  ;;  %p5162_p5 = scmp.lt.s32.totalorder %s179_s6, %s179_s6 }
  0x25   : > { %p5155_p7 = scmp.ne.s32.totalorder %s179_s6, %s5154_s18  ;;  %p5163_p8 = scmp.lt.s32.totalorder %s5154_s18, %s5154_s18 }
  0x27   : > { %p5157_p10 = pnand %p5155_p7, %p6207_p1  ;;  %p5164_p9 = por %p5163_p8, %p5162_p5 }
  0x29   : > { %p5158_p12 = pneg %p5157_p10 }
  0x2b   : > { %p5165_p13 = pnand %p5164_p9, %p5158_p12 }
  0x2d   : > { %5168 = shalt.err (!%p5165_p13)
}
  0x2e   : > { %s5302_s24 = smov 512   ;;  %s5303_s25 = smov 32  }
  0x2f   : > { %5085 = dma.hbm_to_vmem [thread:$0]  (!%p5396_p11), %s6217_s1, 8192, %s179_s6, [#allocation3], %s5302_s24, %s5302_s24, %s5303_s25  }
  0x30   : > { %s3421_s11 = sshll.u32 %s205_s9, 12  ;;  %s3436_s12 = sshll.u32 %s5299_s21, 10 }
  0x31   : > { %s6218_s3 = sld [smem:[#allocation12_spill]]  ;;  %s207_s16 = scalar_lea.vmem [#allocation6], %s3421_s11 }
  0x32   : > { %s214_s17 = sshll.u32 %s207_s16, 4  ;;  %s5441_s18 = scalar_lea.sflag [#allocation3], %s203_s8  ;;  %s5439_s17 = int_to_ptr.vmem [resolvable:$true] %s214_s17 }
  0x33   : > { %p6219_p8 = scmp.ne.s32.totalorder %s6216_s10, 0 }
  0x35   : > { %p6208_p9 = pneg %p6219_p8 }
  0x37   : > { %s5437_s15 = scalar_lea.hbm %s6218_s3, %s3436_s12  ;;  %s5174_s25 = scalar_lea.hbm %s6218_s3, 327680 }
  0x38   : > { %s5169_s27 = scalar_lea.hbm %s5437_s15, 65536  ;;  %p5175_p2 = scmp.lt.u32.totalorder %s5437_s15, %s6218_s3 }
  0x39   : > { %p5170_p5 = scmp.ne.s32.totalorder %s5437_s15, %s5169_s27  ;;  %p5176_p3 = scmp.lt.u32.totalorder %s5174_s25, %s5169_s27 }
  0x3a   : > { %p5178_p6 = scmp.lt.u32.totalorder %s5169_s27, %s5437_s15 }
  0x3b   : > { %p5172_p13 = pnand %p6208_p9, %p5170_p5  ;;  %p5177_p4 = por %p5176_p3, %p5175_p2 }
  0x3d   : > { %p5173_p0 = pneg %p5172_p13  ;;  %p5179_p7 = por %p5178_p6, %p5177_p4 }
  0x3f   : > { %p5180_p10 = pnand %p5179_p7, %p5173_p0 }
  0x41   : > { %5183 = shalt.err (!%p5180_p10)
}
  0x42   : > { %s5184_s8 = scalar_lea.vmem %s5439_s17, 65536  ;;  %s5304_s11 = smov [#allocation6]  }
  0x43   : > { %p5185_p12 = scmp.ne.s32.totalorder %s5439_s17, %s5184_s8  ;;  %s5189_s13 = sshll.u32 %s5304_s11, 4  ;;  %s5190_s13 = int_to_ptr.vmem [resolvable:$false] %s5189_s13 }
  0x44   : > { %s5191_s14 = scalar_lea.vmem %s5190_s13, 131072  ;;  %p5192_p1 = scmp.lt.s32.totalorder %s5439_s17, %s5190_s13 }
  0x45   : > { %p5187_p5 = pnand %p5185_p12, %p6208_p9  ;;  %p5193_p2 = scmp.lt.s32.totalorder %s5191_s14, %s5184_s8 }
  0x47   : > { %p5188_p13 = pneg %p5187_p5  ;;  %p5194_p3 = por %p5193_p2, %p5192_p1 }
  0x49   : > { %p5195_p4 = pnand %p5194_p3, %p5188_p13 }
  0x4b   : > { %5198 = shalt.err (!%p5195_p4)
}
  0x4c   : > { %s5305_s16 = smov 5120   ;;  %s5306_s27 = smov 1024  }
  0x4d   : > { %s5307_s6 = smov 64   ;;  %s5308_s24 = smov [#allocation4]  }
  0x4e   : > { %5092 = dma.hbm_to_vmem [thread:$0]  (!%p6219_p8), %s5437_s15, 65536, %s5439_s17, %s5441_s18, %s5305_s16, %s5306_s27, %s5307_s6  }
  0x4f   : > { %s192_s25 = sshll.u32 %s5308_s24, 4  ;;  %s3424_s30 = sshll.u32 %s205_s9, 4  ;;  %s193_s25 = int_to_ptr.vmem [resolvable:$true] %s192_s25 }
  0x50   : > { %s5199_s11 = scalar_lea.hbm %s6199_s2, 64  ;;  %p6220_p0 = pneg %p5396_p11 }
  0x51   : > { %p5200_p1 = scmp.ne.s32.totalorder %s6199_s2, %s5199_s11  ;;  %p5206_p10 = scmp.lt.u32.totalorder %s5199_s11, %s6199_s2 }
  0x53   : > { %p5202_p6 = pnand %p5200_p1, %p6220_p0 }
  0x55   : > { %p5203_p7 = pneg %p5202_p6 }
  0x57   : > { %p5208_p12 = pnand %p5206_p10, %p5203_p7 }
  0x59   : > { %5211 = shalt.err (!%p5208_p12)
}
  0x5a   : > { %s5212_s9 = scalar_lea.vmem %s193_s25, 64  ;;  %p6221_p13 = pmov %p6220_p0 }
  0x5b   : > { %p5213_p5 = scmp.ne.s32.totalorder %s193_s25, %s5212_s9  ;;  %p5220_p4 = scmp.lt.s32.totalorder %s193_s25, %s193_s25 }
  0x5c   : > { %p5221_p9 = scmp.lt.s32.totalorder %s5212_s9, %s5212_s9 }
  0x5d   : > { %p5215_p2 = pnand %p5213_p5, %p6221_p13 }
  0x5e   : > { %p5222_p8 = por %p5221_p9, %p5220_p4 }
  0x5f   : > { %p5216_p3 = pneg %p5215_p2 }
  0x61   : > { %p5223_p0 = pnand %p5222_p8, %p5216_p3 }
  0x63   : > { %5226 = shalt.err (!%p5223_p0)
}
  0x64   : > { %5088 = dma.hbm_to_vmem [thread:$0]  (!%p5396_p11), %s6199_s2, 64, %s193_s25, [#allocation5]  }
  0x65   : > { %s3437_s1 = sshll.u32 %s5299_s21, 8  ;;  %s228_s3 = scalar_lea.vmem [#allocation7], %s3424_s30 }
  0x66   : > { %s236_s16 = sshll.u32 %s228_s3, 4  ;;  %s234_s24 = scalar_lea.hbm %s6201_s4, %s3437_s1  ;;  %s237_s16 = int_to_ptr.vmem [resolvable:$true] %s236_s16 }
  0x67   : > { %s5227_s12 = scalar_lea.hbm %s234_s24, 256  ;;  %p6222_p8 = scmp.ne.s32.totalorder %s6216_s10, 0 }
  0x68   : > { %p5228_p9 = scmp.ne.s32.totalorder %s234_s24, %s5227_s12  ;;  %s5232_s11 = scalar_lea.hbm %s6201_s4, 1280 }
  0x69   : > { %p6223_p1 = pneg %p6222_p8  ;;  %p5233_p11 = scmp.lt.u32.totalorder %s234_s24, %s6201_s4 }
  0x6a   : > { %p5234_p10 = scmp.lt.u32.totalorder %s5232_s11, %s5227_s12  ;;  %p5236_p5 = scmp.lt.u32.totalorder %s5227_s12, %s234_s24 }
  0x6b   : > { %p5230_p6 = pnand %p5228_p9, %p6223_p1 }
  0x6c   : > { %p5235_p12 = por %p5234_p10, %p5233_p11 }
  0x6d   : > { %p5231_p7 = pneg %p5230_p6 }
  0x6e   : > { %p5237_p13 = por %p5236_p5, %p5235_p12 }
  0x70   : > { %p5238_p2 = pnand %p5237_p13, %p5231_p7 }
  0x72   : > { %5241 = shalt.err (!%p5238_p2)
}
  0x73   : > { %s5242_s21 = scalar_lea.vmem %s237_s16, 256  ;;  %p6224_p4 = pmov %p6223_p1 }
  0x74   : > { %p5243_p3 = scmp.ne.s32.totalorder %s237_s16, %s5242_s21  ;;  %s5309_s30 = smov [#allocation7]  }
  0x75   : > { %s5247_s14 = sshll.u32 %s5309_s30, 4  ;;  %s5248_s14 = int_to_ptr.vmem [resolvable:$false] %s5247_s14 }
  0x76   : > { %p5245_p0 = pnand %p5243_p3, %p6224_p4  ;;  %s5249_s9 = scalar_lea.vmem %s5248_s14, 512 }
  0x77   : > { %p5250_p1 = scmp.lt.s32.totalorder %s237_s16, %s5248_s14  ;;  %p5251_p6 = scmp.lt.s32.totalorder %s5249_s9, %s5242_s21 }
  0x78   : > { %p5246_p9 = pneg %p5245_p0 }
  0x79   : > { %p5252_p10 = por %p5251_p6, %p5250_p1 }
  0x7b   : > { %p5253_p11 = pnand %p5252_p10, %p5246_p9 }
  0x7d   : > { %5256 = shalt.err (!%p5253_p11)
}
  0x7e   : > { %5095 = dma.hbm_to_vmem [thread:$0]  (!%p6222_p8), %s234_s24, 256, %s237_s16, %s5441_s18  }
  0x7f   : > { %p6225_p7 = scmp.ne.s32.totalorder %s6214_s29, 0 }
  0x80   : > { %p6226_p12 = scmp.eq.s32.totalorder (!%p6225_p7), %s5360_s22, 0 }
  0x81   : > { %245 = sbr.rel (%p6225_p7) target bundleno = 1063 (0x427), region = 40 }
  0x88   : > { %5274 = dma.done.wait (%p6226_p12), [#allocation3], 8192   ;;  %p6227_p5 = pmov %p6226_p12 }
  0x8a   : > { %5276 = vsyncadd (%p6227_p5), [#allocation3], 4294959104  ;;  %p6228_p13 = pmov %p6227_p5 }
  0x8b   : > { %p6229_p2 = pmov %p6227_p5 }
  0x8c   : > { %5278 = dma.done.wait (%p6228_p13), [#allocation5], 64  }
  0x8d   : > { %5280 = vsyncadd (%p6229_p2), [#allocation5], 4294967232  ;;  %s255_s10 = sand.u32 1, %s5360_s22   ;;  %s257_s18 = sand.u32 1, %s5291_s19  }
  0x8e   : > { %s3430_s29 = sshll.u32 %s257_s18, 12  ;;  %s256_s15 = scalar_lea.sflag [#allocation3], %s255_s10 }
  0x8f   : > { %s5524_s17 = scalar_lea.vmem [#allocation6], %s3430_s29  ;;  %p6230_p8 = scmp.ne.s32.totalorder %s6213_s28, 0 }
  0x91   : > { %5282 = dma.done.wait (%p6230_p8), %s256_s15, 65792  }
  0x92   : > { %5284 = vsyncadd (%p6230_p8), %s256_s15, 4294901504  ;;  %v5310_v0 = vmov 0.0   ;;  %v310_v1 = vld [vmem:[#allocation2 + $0x8] sm:$0xff]  ;;  %v309_v3 = vld [vmem:[#allocation2] sm:$0xff]  ;;  %s3432_s3 = sshll.u32 %s5360_s22, 4  ;;  %s5931_s16 = sshll.u32 %s257_s18, 4 }
  0x93   : > { %459 = vmatprep.mubr.f32.mxu0 %v5310_v0  ;;  %530 = vmatprep.mubr.f32.mxu1 %v5310_v0  ;;  %v314_v2 = vld [vmem:[#allocation2 + $0x28] sm:$0xff]  ;;  %v313_v5 = vld [vmem:[#allocation2 + $0x20] sm:$0xff]  ;;  %v312_v28 = vld [vmem:[#allocation2 + $0x18] sm:$0xff]  ;;  %p303_p3 = scmp.lt.s32.totalorder %s3432_s3, 79  ;;  %s268_s22 = scalar_lea.vmem [#allocation7], %s5931_s16 }
  0x94   : > { %v3438_v4 = vpack.c.bf16 %v314_v2, %v310_v1  ;;  %v318_v6 = vld [vmem:[#allocation2 + $0x48] sm:$0xff]  ;;  %v3440_v8 = vpack.c.bf16 %v313_v5, %v309_v3  ;;  %v317_v10 = vld [vmem:[#allocation2 + $0x40] sm:$0xff]  ;;  %v316_v29 = vld [vmem:[#allocation2 + $0x38] sm:$0xff] }
  0x95   : > { %v322_v7 = vld [vmem:[#allocation2 + $0x68] sm:$0xff]  ;;  %v321_v11 = vld [vmem:[#allocation2 + $0x60] sm:$0xff]  ;;  %v311_v30 = vld [vmem:[#allocation2 + $0x10] sm:$0xff]  ;;  %v3470_v32 = vpack.c.bf16 %v316_v29, %v312_v28  ;;  %s6236_s3 = smov (!%p303_p3, %s3432_s3), 79 }
  0x96   : > { %v3442_v9 = vpack.c.bf16 %v322_v7, %v318_v6  ;;  %v326_v12 = vld [vmem:[#allocation2 + $0x88] sm:$0xff]  ;;  %3439 = vmatprep.subr.bf16.mxu0 %v3438_v4  ;;  %v3444_v14 = vpack.c.bf16 %v321_v11, %v317_v10  ;;  %v325_v16 = vld [vmem:[#allocation2 + $0x80] sm:$0xff]  ;;  %v315_v33 = vld [vmem:[#allocation2 + $0x30] sm:$0xff]  ;;  %s3433_s27 = sshll.u32 %s6236_s3, 3 }
  0x97   : > { %v330_v13 = vld [vmem:[#allocation2 + $0xa8] sm:$0xff]  ;;  %3441 = vmatpush1.bf16.msra.mxu0 %v3440_v8  ;;  %v329_v17 = vld [vmem:[#allocation2 + $0xa0] sm:$0xff]  ;;  %v320_v34 = vld [vmem:[#allocation2 + $0x58] sm:$0xff]  ;;  %v3472_v37 = vpack.c.bf16 %v315_v33, %v311_v30  ;;  %3471 = vmatprep.subr.bf16.mxu1 %v3470_v32  ;;  %s5962_s12 = scalar_lea.vmem %s6202_s5, %s3433_s27 }
  0x98   : > { %3443 = vmatprep.subr.bf16.mxu0 %v3442_v9  ;;  %v3446_v15 = vpack.c.bf16 %v330_v13, %v326_v12  ;;  %v334_v18 = vld [vmem:[#allocation2 + $0xc8] sm:$0xff]  ;;  %v3448_v20 = vpack.c.bf16 %v329_v17, %v325_v16  ;;  %v333_v22 = vld [vmem:[#allocation2 + $0xc0] sm:$0xff]  ;;  %v324_v35 = vld [vmem:[#allocation2 + $0x78] sm:$0xff] }
  0x99   : > { %v338_v19 = vld [vmem:[#allocation2 + $0xe8] sm:$0xff]  ;;  %v337_v23 = vld [vmem:[#allocation2 + $0xe0] sm:$0xff]  ;;  %v3474_v38 = vpack.c.bf16 %v324_v35, %v320_v34  ;;  %v319_v39 = vld [vmem:[#allocation2 + $0x50] sm:$0xff]  ;;  %3473 = vmatpush1.bf16.msra.mxu1 %v3472_v37 }
  0x9a   : > { %v3450_v21 = vpack.c.bf16 %v338_v19, %v334_v18  ;;  %v342_v24 = vld [vmem:[#allocation2 + $0x108] sm:$0xff]  ;;  %v341_v26 = vld [vmem:[#allocation2 + $0x100] sm:$0xff]  ;;  %v3452_v31 = vpack.c.bf16 %v337_v23, %v333_v22  ;;  %v323_v40 = vld [vmem:[#allocation2 + $0x70] sm:$0xff] }
  0x9b   : > { %3445 = vmatpush1.bf16.msra.mxu0 %v3444_v14  ;;  %v346_v25 = vld [vmem:[#allocation2 + $0x128] sm:$0xff]  ;;  %v345_v27 = vld [vmem:[#allocation2 + $0x120] sm:$0xff]  ;;  %v328_v41 = vld [vmem:[#allocation2 + $0x98] sm:$0xff]  ;;  %v3476_v45 = vpack.c.bf16 %v323_v40, %v319_v39  ;;  %3475 = vmatprep.subr.bf16.mxu1 %v3474_v38 }
  0x9c   : > { %3447 = vmatprep.subr.bf16.mxu0 %v3446_v15  ;;  %v3454_v36 = vpack.c.bf16 %v346_v25, %v342_v24  ;;  %v350_v42 = vld [vmem:[#allocation2 + $0x148] sm:$0xff]  ;;  %v332_v44 = vld [vmem:[#allocation2 + $0xb8] sm:$0xff]  ;;  %v3456_v46 = vpack.c.bf16 %v345_v27, %v341_v26  ;;  %v349_v47 = vld [vmem:[#allocation2 + $0x140] sm:$0xff] }
  0x9d   : > { %v354_v43 = vld [vmem:[#allocation2 + $0x168] sm:$0xff]  ;;  %v3478_v48 = vpack.c.bf16 %v332_v44, %v328_v41  ;;  %v327_v49 = vld [vmem:[#allocation2 + $0x90] sm:$0xff]  ;;  %v353_v52 = vld [vmem:[#allocation2 + $0x160] sm:$0xff]  ;;  %3477 = vmatpush1.bf16.msra.mxu1 %v3476_v45 }
  0x9e   : > { %v331_v50 = vld [vmem:[#allocation2 + $0xb0] sm:$0xff]  ;;  %v3458_v51 = vpack.c.bf16 %v354_v43, %v350_v42  ;;  %v336_v53 = vld [vmem:[#allocation2 + $0xd8] sm:$0xff]  ;;  %v358_v55 = vld [vmem:[#allocation2 + $0x188] sm:$0xff]  ;;  %v3460_v58 = vpack.c.bf16 %v353_v52, %v349_v47 }
  0x9f   : > { %3449 = vmatpush1.bf16.msra.mxu0 %v3448_v20  ;;  %v340_v54 = vld [vmem:[#allocation2 + $0xf8] sm:$0xff]  ;;  %v362_v56 = vld [vmem:[#allocation2 + $0x1a8] sm:$0xff]  ;;  %v3480_v57 = vpack.c.bf16 %v331_v50, %v327_v49  ;;  %v357_v59 = vld [vmem:[#allocation2 + $0x180] sm:$0xff]  ;;  %3479 = vmatprep.subr.bf16.mxu1 %v3478_v48 }
  0xa0   : > { %3451 = vmatprep.subr.bf16.mxu0 %v3450_v21  ;;  %v3482_v60 = vpack.c.bf16 %v340_v54, %v336_v53  ;;  %v335_v61 = vld [vmem:[#allocation2 + $0xd0] sm:$0xff]  ;;  %v3462_v63 = vpack.c.bf16 %v362_v56, %v358_v55  ;;  %v361_v0 = vld [vmem:[#allocation2 + $0x1a0] sm:$0xff]  ;;  %v344_v1 = vld [vmem:[#allocation2 + $0x118] sm:$0xff] }
  0xa1   : > { %v339_v62 = vld [vmem:[#allocation2 + $0xf0] sm:$0xff]  ;;  %v348_v2 = vld [vmem:[#allocation2 + $0x138] sm:$0xff]  ;;  %v366_v3 = vld [vmem:[#allocation2 + $0x1c8] sm:$0xff]  ;;  %3481 = vmatpush1.bf16.msra.mxu1 %v3480_v57  ;;  %v3464_v6 = vpack.c.bf16 %v361_v0, %v357_v59 }
  0xa2   : > { %v370_v4 = vld [vmem:[#allocation2 + $0x1e8] sm:$0xff]  ;;  %v3484_v5 = vpack.c.bf16 %v339_v62, %v335_v61  ;;  %v365_v7 = vld [vmem:[#allocation2 + $0x1c0] sm:$0xff]  ;;  %3483 = vmatprep.subr.bf16.mxu1 %v3482_v60  ;;  %v3486_v8 = vpack.c.bf16 %v348_v2, %v344_v1  ;;  %v343_v9 = vld [vmem:[#allocation2 + $0x110] sm:$0xff] }
  0xa3   : > { %3453 = vmatpush1.bf16.msra.mxu0 %v3452_v31  ;;  %v347_v10 = vld [vmem:[#allocation2 + $0x130] sm:$0xff]  ;;  %v3466_v11 = vpack.c.bf16 %v370_v4, %v366_v3  ;;  %v369_v12 = vld [vmem:[#allocation2 + $0x1e0] sm:$0xff]  ;;  %v352_v13 = vld [vmem:[#allocation2 + $0x158] sm:$0xff] }
  0xa4   : > { %3455 = vmatprep.subr.bf16.mxu0 %v3454_v36  ;;  %v356_v14 = vld [vmem:[#allocation2 + $0x178] sm:$0xff]  ;;  %v537_v15 = vld [vmem:[%s5524_s17] sm:$0xff]  ;;  %v3488_v17 = vpack.c.bf16 %v347_v10, %v343_v9  ;;  %v3468_v18 = vpack.c.bf16 %v369_v12, %v365_v7  ;;  %v351_v20 = vld [vmem:[#allocation2 + $0x150] sm:$0xff] }
  0xa5   : > { %v545_v16 = vld [vmem:[%s5524_s17 + $0x40] sm:$0xff]  ;;  %3485 = vmatpush1.bf16.msra.mxu1 %v3484_v5  ;;  %v3490_v19 = vpack.c.bf16 %v356_v14, %v352_v13  ;;  %v355_v21 = vld [vmem:[#allocation2 + $0x170] sm:$0xff]  ;;  %v360_v22 = vld [vmem:[#allocation2 + $0x198] sm:$0xff] }
  0xa6   : > { %3487 = vmatprep.subr.bf16.mxu1 %v3486_v8  ;;  %v364_v23 = vld [vmem:[#allocation2 + $0x1b8] sm:$0xff]  ;;  %v4558_v24 = vcombine.high %v537_v15, %v545_v16  ;;  %v553_v25 = vld [vmem:[%s5524_s17 + $0x80] sm:$0xff]  ;;  %v3492_v27 = vpack.c.bf16 %v355_v21, %v351_v20  ;;  %v359_v30 = vld [vmem:[#allocation2 + $0x190] sm:$0xff]  ;;  %v4559_v32 = vcombine.low %v537_v15, %v545_v16 }
  0xa7   : > { %3457 = vmatpush1.bf16.msra.mxu0 %v3456_v46  ;;  %v561_v26 = vld [vmem:[%s5524_s17 + $0xc0] sm:$0xff]  ;;  %v3494_v29 = vpack.c.bf16 %v364_v23, %v360_v22  ;;  %v363_v31 = vld [vmem:[#allocation2 + $0x1b0] sm:$0xff]  ;;  %v368_v33 = vld [vmem:[#allocation2 + $0x1d8] sm:$0xff] }
  0xa8   : > { %3459 = vmatprep.subr.bf16.mxu0 %v3458_v51  ;;  %v308_v28 = vld [vmem:[%s6197_s0] sm:$0xff]  ;;  %v372_v34 = vld [vmem:[#allocation2 + $0x1f8] sm:$0xff]  ;;  %v4560_v35 = vcombine.high %v553_v25, %v561_v26  ;;  %v3496_v38 = vpack.c.bf16 %v363_v31, %v359_v30  ;;  %v367_v40 = vld [vmem:[#allocation2 + $0x1d0] sm:$0xff]  ;;  %v4561_v42 = vcombine.low %v553_v25, %v561_v26 }
  0xa9   : > { %3489 = vmatpush1.bf16.msra.mxu1 %v3488_v17  ;;  %v569_v36 = vld [vmem:[%s5524_s17 + $0x100] sm:$0xff]  ;;  %v3498_v39 = vpack.c.bf16 %v372_v34, %v368_v33  ;;  %v371_v41 = vld [vmem:[#allocation2 + $0x1f0] sm:$0xff] }
  0xaa   : > { %3491 = vmatprep.subr.bf16.mxu1 %v3490_v19  ;;  %v577_v37 = vld [vmem:[%s5524_s17 + $0x140] sm:$0xff]  ;;  %v538_v43 = vld [vmem:[%s5524_s17 + $0x8] sm:$0xff]  ;;  %v3500_v48 = vpack.c.bf16 %v371_v41, %v367_v40 }
  0xab   : > { %3461 = vmatpush1.bf16.msra.mxu0 %v3460_v58  ;;  %v546_v44 = vld [vmem:[%s5524_s17 + $0x48] sm:$0xff]  ;;  %v4562_v45 = vcombine.high %v569_v36, %v577_v37  ;;  %v585_v46 = vld [vmem:[%s5524_s17 + $0x180] sm:$0xff]  ;;  %v4563_v50 = vcombine.low %v569_v36, %v577_v37 }
  0xac   : > { %3463 = vmatprep.subr.bf16.mxu0 %v3462_v63  ;;  %v593_v47 = vld [vmem:[%s5524_s17 + $0x1c0] sm:$0xff]  ;;  %v4622_v49 = vcombine.high %v538_v43, %v546_v44  ;;  %v554_v51 = vld [vmem:[%s5524_s17 + $0x88] sm:$0xff]  ;;  %v4623_v56 = vcombine.low %v538_v43, %v546_v44 }
  0xad   : > { %3493 = vmatpush1.bf16.msra.mxu1 %v3492_v27  ;;  %v562_v52 = vld [vmem:[%s5524_s17 + $0xc8] sm:$0xff]  ;;  %v4564_v53 = vcombine.high %v585_v46, %v593_v47  ;;  %v601_v54 = vld [vmem:[%s5524_s17 + $0x200] sm:$0xff]  ;;  %v4565_v58 = vcombine.low %v585_v46, %v593_v47 }
  0xae   : > { %3495 = vmatprep.subr.bf16.mxu1 %v3494_v29  ;;  %v609_v55 = vld [vmem:[%s5524_s17 + $0x240] sm:$0xff]  ;;  %v4624_v57 = vcombine.high %v554_v51, %v562_v52  ;;  %v570_v59 = vld [vmem:[%s5524_s17 + $0x108] sm:$0xff]  ;;  %v4625_v0 = vcombine.low %v554_v51, %v562_v52 }
  0xaf   : > { %3465 = vmatpush1.bf16.msra.mxu0 %v3464_v6  ;;  %v578_v60 = vld [vmem:[%s5524_s17 + $0x148] sm:$0xff]  ;;  %v4566_v61 = vcombine.high %v601_v54, %v609_v55  ;;  %v617_v62 = vld [vmem:[%s5524_s17 + $0x280] sm:$0xff]  ;;  %v4567_v2 = vcombine.low %v601_v54, %v609_v55 }
  0xb0   : > { %3467 = vmatprep.subr.bf16.mxu0 %v3466_v11  ;;  %v625_v63 = vld [vmem:[%s5524_s17 + $0x2c0] sm:$0xff]  ;;  %v4626_v1 = vcombine.high %v570_v59, %v578_v60  ;;  %v586_v3 = vld [vmem:[%s5524_s17 + $0x188] sm:$0xff]  ;;  %v4627_v8 = vcombine.low %v570_v59, %v578_v60 }
  0xb1   : > { %3497 = vmatpush1.bf16.msra.mxu1 %v3496_v38  ;;  %v594_v4 = vld [vmem:[%s5524_s17 + $0x1c8] sm:$0xff]  ;;  %v4568_v5 = vcombine.high %v617_v62, %v625_v63  ;;  %v633_v6 = vld [vmem:[%s5524_s17 + $0x300] sm:$0xff]  ;;  %v4569_v10 = vcombine.low %v617_v62, %v625_v63 }
  0xb2   : > { %3499 = vmatprep.subr.bf16.mxu1 %v3498_v39  ;;  %v641_v7 = vld [vmem:[%s5524_s17 + $0x340] sm:$0xff]  ;;  %v4628_v9 = vcombine.high %v586_v3, %v594_v4  ;;  %v602_v11 = vld [vmem:[%s5524_s17 + $0x208] sm:$0xff]  ;;  %v4629_v16 = vcombine.low %v586_v3, %v594_v4 }
  0xb3   : > { %3469 = vmatpush1.bf16.msra.mxu0 %v3468_v18  ;;  %v610_v12 = vld [vmem:[%s5524_s17 + $0x248] sm:$0xff]  ;;  %v4570_v13 = vcombine.high %v633_v6, %v641_v7  ;;  %v649_v14 = vld [vmem:[%s5524_s17 + $0x380] sm:$0xff]  ;;  %v4571_v18 = vcombine.low %v633_v6, %v641_v7 }
  0xb4   : > { %3503 = vmatprep.subr.bf16.mxu0 %v4558_v24  ;;  %v657_v15 = vld [vmem:[%s5524_s17 + $0x3c0] sm:$0xff]  ;;  %v4630_v17 = vcombine.high %v602_v11, %v610_v12  ;;  %v618_v19 = vld [vmem:[%s5524_s17 + $0x288] sm:$0xff]  ;;  %v4631_v24 = vcombine.low %v602_v11, %v610_v12 }
  0xb5   : > { %3501 = vmatpush1.bf16.msra.mxu1 %v3500_v48  ;;  %v626_v20 = vld [vmem:[%s5524_s17 + $0x2c8] sm:$0xff]  ;;  %v4572_v21 = vcombine.high %v649_v14, %v657_v15  ;;  %v665_v22 = vld [vmem:[%s5524_s17 + $0x400] sm:$0xff]  ;;  %v4573_v26 = vcombine.low %v649_v14, %v657_v15 }
  0xb6   : > { %460 = vmatmul.mubr.f32.vlgmr.msra.gmra.mrb[0].mxu0 %v308_v28  ;;  %3631 = vmatprep.subr.bf16.mxu1 %v4622_v49  ;;  %v673_v23 = vld [vmem:[%s5524_s17 + $0x440] sm:$0xff]  ;;  %v4632_v25 = vcombine.high %v618_v19, %v626_v20  ;;  %v634_v27 = vld [vmem:[%s5524_s17 + $0x308] sm:$0xff] }
  0xb7   : > { %3505 = vmatpush1.bf16.msra.mxu0 %v4559_v32  ;;  %v4574_v29 = vcombine.high %v665_v22, %v673_v23  ;;  %v681_v30 = vld [vmem:[%s5524_s17 + $0x480] sm:$0xff]  ;;  %v4633_v32 = vcombine.low %v618_v19, %v626_v20  ;;  %v4575_v34 = vcombine.low %v665_v22, %v673_v23  ;;  %v658_v36 = vld [vmem:[%s5524_s17 + $0x3c8] sm:$0xff] }
  0xb8   : > { %3507 = vmatprep.subr.bf16.mxu0 %v4560_v35  ;;  %531 = vmatmul.mubr.f32.vlgmr.msra.gmra.mrb[0].mxu1 %v308_v28  ;;  %v642_v28 = vld [vmem:[%s5524_s17 + $0x348] sm:$0xff]  ;;  %v689_v31 = vld [vmem:[%s5524_s17 + $0x4c0] sm:$0xff] }
  0xb9   : > { %3633 = vmatpush1.bf16.msra.mxu1 %v4623_v56  ;;  %v4634_v33 = vcombine.high %v634_v27, %v642_v28  ;;  %v650_v35 = vld [vmem:[%s5524_s17 + $0x388] sm:$0xff]  ;;  %v4576_v37 = vcombine.high %v681_v30, %v689_v31  ;;  %v697_v38 = vld [vmem:[%s5524_s17 + $0x500] sm:$0xff]  ;;  %v4635_v40 = vcombine.low %v634_v27, %v642_v28 }
  0xba   : > { %3635 = vmatprep.subr.bf16.mxu1 %v4624_v57  ;;  %v705_v39 = vld [vmem:[%s5524_s17 + $0x540] sm:$0xff]  ;;  %v4636_v41 = vcombine.high %v650_v35, %v658_v36  ;;  %v666_v43 = vld [vmem:[%s5524_s17 + $0x408] sm:$0xff]  ;;  %v4637_v48 = vcombine.low %v650_v35, %v658_v36 }
  0xbb   : > { %3509 = vmatpush1.bf16.msra.mxu0 %v4561_v42  ;;  %v4577_v42 = vcombine.low %v681_v30, %v689_v31  ;;  %v674_v44 = vld [vmem:[%s5524_s17 + $0x448] sm:$0xff]  ;;  %v713_v46 = vld [vmem:[%s5524_s17 + $0x580] sm:$0xff] }
  0xbc   : > { %3511 = vmatprep.subr.bf16.mxu0 %v4562_v45  ;;  %v4578_v45 = vcombine.high %v697_v38, %v705_v39  ;;  %v721_v47 = vld [vmem:[%s5524_s17 + $0x5c0] sm:$0xff]  ;;  %v4638_v49 = vcombine.high %v666_v43, %v674_v44  ;;  %v682_v51 = vld [vmem:[%s5524_s17 + $0x488] sm:$0xff]  ;;  %v4639_v56 = vcombine.low %v666_v43, %v674_v44 }
  0xbd   : > { %3637 = vmatpush1.bf16.msra.mxu1 %v4625_v0  ;;  %v690_v52 = vld [vmem:[%s5524_s17 + $0x4c8] sm:$0xff]  ;;  %v729_v54 = vld [vmem:[%s5524_s17 + $0x600] sm:$0xff] }
  0xbe   : > { %3639 = vmatprep.subr.bf16.mxu1 %v4626_v1  ;;  %v737_v55 = vld [vmem:[%s5524_s17 + $0x640] sm:$0xff]  ;;  %v4640_v57 = vcombine.high %v682_v51, %v690_v52  ;;  %v698_v59 = vld [vmem:[%s5524_s17 + $0x508] sm:$0xff]  ;;  %v4641_v0 = vcombine.low %v682_v51, %v690_v52 }
  0xbf   : > { %3513 = vmatpush1.bf16.msra.mxu0 %v4563_v50  ;;  %v4579_v50 = vcombine.low %v697_v38, %v705_v39  ;;  %v706_v60 = vld [vmem:[%s5524_s17 + $0x548] sm:$0xff]  ;;  %v745_v62 = vld [vmem:[%s5524_s17 + $0x680] sm:$0xff] }
  0xc0   : > { %3515 = vmatprep.subr.bf16.mxu0 %v4564_v53  ;;  %v4580_v53 = vcombine.high %v713_v46, %v721_v47  ;;  %v753_v63 = vld [vmem:[%s5524_s17 + $0x6c0] sm:$0xff]  ;;  %v4642_v1 = vcombine.high %v698_v59, %v706_v60  ;;  %v714_v3 = vld [vmem:[%s5524_s17 + $0x588] sm:$0xff] }
  0xc1   : > { %3641 = vmatpush1.bf16.msra.mxu1 %v4627_v8  ;;  %v722_v4 = vld [vmem:[%s5524_s17 + $0x5c8] sm:$0xff]  ;;  %v761_v6 = vld [vmem:[%s5524_s17 + $0x700] sm:$0xff]  ;;  %v4643_v8 = vcombine.low %v698_v59, %v706_v60 }
  0xc2   : > { %3643 = vmatprep.subr.bf16.mxu1 %v4628_v9  ;;  %v769_v7 = vld [vmem:[%s5524_s17 + $0x740] sm:$0xff]  ;;  %v4644_v9 = vcombine.high %v714_v3, %v722_v4  ;;  %v730_v11 = vld [vmem:[%s5524_s17 + $0x608] sm:$0xff]  ;;  %v4645_v14 = vcombine.low %v714_v3, %v722_v4 }
  0xc3   : > { %3517 = vmatpush1.bf16.msra.mxu0 %v4565_v58  ;;  %v4581_v58 = vcombine.low %v713_v46, %v721_v47  ;;  %v738_v12 = vld [vmem:[%s5524_s17 + $0x648] sm:$0xff]  ;;  %v785_v27 = vld [vmem:[%s5524_s17 + $0x7c0] sm:$0xff] }
  0xc4   : > { %3519 = vmatprep.subr.bf16.mxu0 %v4566_v61  ;;  %v4582_v61 = vcombine.high %v729_v54, %v737_v55  ;;  %v4646_v15 = vcombine.high %v730_v11, %v738_v12  ;;  %v4647_v19 = vcombine.low %v730_v11, %v738_v12  ;;  %v770_v22 = vld [vmem:[%s5524_s17 + $0x748] sm:$0xff]  ;;  %v801_v35 = vld [vmem:[%s5524_s17 + $0x840] sm:$0xff] }
  0xc5   : > { %3645 = vmatpush1.bf16.msra.mxu1 %v4629_v16  ;;  %v4587_v16 = vcombine.low %v761_v6, %v769_v7  ;;  %v778_v28 = vld [vmem:[%s5524_s17 + $0x788] sm:$0xff]  ;;  %v817_v51 = vld [vmem:[%s5524_s17 + $0x8c0] sm:$0xff] }
  0xc6   : > { %3647 = vmatprep.subr.bf16.mxu1 %v4630_v17  ;;  %v746_v17 = vld [vmem:[%s5524_s17 + $0x688] sm:$0xff]  ;;  %v825_v59 = vld [vmem:[%s5524_s17 + $0x900] sm:$0xff] }
  0xc7   : > { %3521 = vmatpush1.bf16.msra.mxu0 %v4567_v2  ;;  %v4583_v2 = vcombine.low %v729_v54, %v737_v55  ;;  %v786_v30 = vld [vmem:[%s5524_s17 + $0x7c8] sm:$0xff]  ;;  %v833_v60 = vld [vmem:[%s5524_s17 + $0x940] sm:$0xff] }
  0xc8   : > { %3523 = vmatprep.subr.bf16.mxu0 %v4568_v5  ;;  %v4584_v5 = vcombine.high %v745_v62, %v753_v63  ;;  %v794_v36 = vld [vmem:[%s5524_s17 + $0x808] sm:$0xff]  ;;  %v841_v4 = vld [vmem:[%s5524_s17 + $0x980] sm:$0xff] }
  0xc9   : > { %3649 = vmatpush1.bf16.msra.mxu1 %v4631_v24  ;;  %v802_v38 = vld [vmem:[%s5524_s17 + $0x848] sm:$0xff] }
  0xca   : > { %3651 = vmatprep.subr.bf16.mxu1 %v4632_v25  ;;  %v810_v52 = vld [vmem:[%s5524_s17 + $0x888] sm:$0xff] }
  0xcb   : > { %3525 = vmatpush1.bf16.msra.mxu0 %v4569_v10  ;;  %v4585_v10 = vcombine.low %v745_v62, %v753_v63  ;;  %v834_v62 = vld [vmem:[%s5524_s17 + $0x948] sm:$0xff] }
  0xcc   : > { %3527 = vmatprep.subr.bf16.mxu0 %v4570_v13  ;;  %v4586_v13 = vcombine.high %v761_v6, %v769_v7  ;;  %v842_v6 = vld [vmem:[%s5524_s17 + $0x988] sm:$0xff] }
  0xcd   : > { %3653 = vmatpush1.bf16.msra.mxu1 %v4633_v32  ;;  %v4652_v32 = vcombine.high %v778_v28, %v786_v30  ;;  %v850_v7 = vld [vmem:[%s5524_s17 + $0x9c8] sm:$0xff] }
  0xce   : > { %3655 = vmatprep.subr.bf16.mxu1 %v4634_v33  ;;  %v4653_v33 = vcombine.low %v778_v28, %v786_v30  ;;  %v4660_v12 = vcombine.high %v842_v6, %v850_v7 }
  0xcf   : > { %3529 = vmatpush1.bf16.msra.mxu0 %v4571_v18  ;;  %v754_v18 = vld [vmem:[%s5524_s17 + $0x6c8] sm:$0xff] }
  0xd0   : > { %3531 = vmatprep.subr.bf16.mxu0 %v4572_v21  ;;  %v4648_v20 = vcombine.high %v746_v17, %v754_v18  ;;  %v762_v21 = vld [vmem:[%s5524_s17 + $0x708] sm:$0xff]  ;;  %v4649_v23 = vcombine.low %v746_v17, %v754_v18 }
  0xd1   : > { %3657 = vmatpush1.bf16.msra.mxu1 %v4635_v40  ;;  %v4650_v24 = vcombine.high %v762_v21, %v770_v22  ;;  %v4651_v25 = vcombine.low %v762_v21, %v770_v22  ;;  %v4654_v40 = vcombine.high %v794_v36, %v802_v38  ;;  %v866_v17 = vld [vmem:[%s5524_s17 + $0xa48] sm:$0xff]  ;;  %v4661_v21 = vcombine.low %v842_v6, %v850_v7  ;;  %v953_v7 = vld [vmem:[%s5524_s17 + $0xd00] sm:$0xff] }
  0xd2   : > { %3659 = vmatprep.subr.bf16.mxu1 %v4636_v41  ;;  %v4655_v41 = vcombine.low %v794_v36, %v802_v38 }
  0xd3   : > { %3533 = vmatpush1.bf16.msra.mxu0 %v4573_v26  ;;  %v777_v26 = vld [vmem:[%s5524_s17 + $0x780] sm:$0xff] }
  0xd4   : > { %3535 = vmatprep.subr.bf16.mxu0 %v4574_v29  ;;  %v4588_v29 = vcombine.high %v777_v26, %v785_v27  ;;  %v4589_v31 = vcombine.low %v777_v26, %v785_v27  ;;  %v874_v26 = vld [vmem:[%s5524_s17 + $0xa88] sm:$0xff] }
  0xd5   : > { %3661 = vmatpush1.bf16.msra.mxu1 %v4637_v48  ;;  %v882_v27 = vld [vmem:[%s5524_s17 + $0xac8] sm:$0xff] }
  0xd6   : > { %3663 = vmatprep.subr.bf16.mxu1 %v4638_v49  ;;  %v809_v49 = vld [vmem:[%s5524_s17 + $0x880] sm:$0xff] }
  0xd7   : > { %3537 = vmatpush1.bf16.msra.mxu0 %v4575_v34  ;;  %v793_v34 = vld [vmem:[%s5524_s17 + $0x800] sm:$0xff] }
  0xd8   : > { %3539 = vmatprep.subr.bf16.mxu0 %v4576_v37  ;;  %v4590_v37 = vcombine.high %v793_v34, %v801_v35  ;;  %v4591_v39 = vcombine.low %v793_v34, %v801_v35  ;;  %v890_v34 = vld [vmem:[%s5524_s17 + $0xb08] sm:$0xff] }
  0xd9   : > { %3665 = vmatpush1.bf16.msra.mxu1 %v4639_v56  ;;  %v898_v35 = vld [vmem:[%s5524_s17 + $0xb48] sm:$0xff] }
  0xda   : > { %3667 = vmatprep.subr.bf16.mxu1 %v4640_v57  ;;  %v4592_v57 = vcombine.high %v809_v49, %v817_v51 }
  0xdb   : > { %3541 = vmatpush1.bf16.msra.mxu0 %v4577_v42  ;;  %v375_v42 = vlaneseq }
  0xdc   : > { %3543 = vmatprep.subr.bf16.mxu0 %v4578_v45  ;;  %v5606_v45 = vld [vmem:[#allocation4] sm:$0xf] }
  0xdd   : > { %3669 = vmatpush1.bf16.msra.mxu1 %v4641_v0  ;;  %v5601_v43 = vshrl.u32 %v375_v42, 7  ;;  %v4593_v0 = vcombine.low %v809_v49, %v817_v51  ;;  %v906_v42 = vld [vmem:[%s5524_s17 + $0xb88] sm:$0xff]  ;;  %v4667_v49 = vcombine.low %v890_v34, %v898_v35 }
  0xde   : > { %3671 = vmatprep.subr.bf16.mxu1 %v4642_v1 }
  0xdf   : > { %3545 = vmatpush1.bf16.msra.mxu0 %v4579_v50  ;;  %v5604_v44 = vsub.s32 1, %v5601_v43  ;;  %v5609_v46 = vsub.s32 0, %v5601_v43  ;;  %v5632_v63 = vsub.s32 3, %v5601_v43 }
  0xe0   : > { %3547 = vmatprep.subr.bf16.mxu0 %v4580_v53  ;;  %v818_v53 = vld [vmem:[%s5524_s17 + $0x8c8] sm:$0xff] }
  0xe1   : > { %3673 = vmatpush1.bf16.msra.mxu1 %v4643_v8  ;;  %v382_v47 = vrot.slane %v5606_v45, %v5604_v44  ;;  %v378_v48 = vrot.slane %v5606_v45, %v5609_v46  ;;  %v4657_v1 = vcombine.low %v810_v52, %v818_v53  ;;  %v390_v8 = vrot.slane %v5606_v45, %v5632_v63 }
  0xe2   : > { %3675 = vmatprep.subr.bf16.mxu1 %v4644_v9  ;;  %v4595_v9 = vcombine.low %v825_v59, %v833_v60 }
  0xe3   : > { %3549 = vmatpush1.bf16.msra.mxu0 %v4581_v58  ;;  %v4656_v58 = vcombine.high %v810_v52, %v818_v53  ;;  %v921_v52 = vld [vmem:[%s5524_s17 + $0xc00] sm:$0xff] }
  0xe4   : > { %3551 = vmatprep.subr.bf16.mxu0 %v4582_v61  ;;  %v826_v61 = vld [vmem:[%s5524_s17 + $0x908] sm:$0xff]  ;;  %v929_v53 = vld [vmem:[%s5524_s17 + $0xc40] sm:$0xff] }
  0xe5   : > { %3677 = vmatpush1.bf16.msra.mxu1 %v4645_v14  ;;  %v4658_v3 = vcombine.high %v826_v61, %v834_v62 }
  0xe6   : > { %3679 = vmatprep.subr.bf16.mxu1 %v4646_v15  ;;  %v865_v15 = vld [vmem:[%s5524_s17 + $0xa40] sm:$0xff] }
  0xe7   : > { %3553 = vmatpush1.bf16.msra.mxu0 %v4583_v2  ;;  %v4594_v2 = vcombine.high %v825_v59, %v833_v60  ;;  %v4606_v60 = vcombine.high %v921_v52, %v929_v53 }
  0xe8   : > { %3555 = vmatprep.subr.bf16.mxu0 %v4584_v5  ;;  %v849_v5 = vld [vmem:[%s5524_s17 + $0x9c0] sm:$0xff] }
  0xe9   : > { %3681 = vmatpush1.bf16.msra.mxu1 %v4647_v19  ;;  %v4596_v11 = vcombine.high %v841_v4, %v849_v5 }
  0xea   : > { %3683 = vmatprep.subr.bf16.mxu1 %v4648_v20  ;;  %v4597_v20 = vcombine.low %v841_v4, %v849_v5 }
  0xeb   : > { %3557 = vmatpush1.bf16.msra.mxu0 %v4585_v10  ;;  %v4659_v10 = vcombine.low %v826_v61, %v834_v62  ;;  %v937_v62 = vld [vmem:[%s5524_s17 + $0xc80] sm:$0xff] }
  0xec   : > { %3559 = vmatprep.subr.bf16.mxu0 %v4586_v13  ;;  %v857_v13 = vld [vmem:[%s5524_s17 + $0xa00] sm:$0xff] }
  0xed   : > { %3685 = vmatpush1.bf16.msra.mxu1 %v4649_v23  ;;  %v4598_v22 = vcombine.high %v857_v13, %v865_v15  ;;  %v4599_v28 = vcombine.low %v857_v13, %v865_v15 }
  0xee   : > { %3687 = vmatprep.subr.bf16.mxu1 %v4650_v24  ;;  %v873_v24 = vld [vmem:[%s5524_s17 + $0xa80] sm:$0xff] }
  0xef   : > { %3561 = vmatpush1.bf16.msra.mxu0 %v4587_v16  ;;  %v858_v16 = vld [vmem:[%s5524_s17 + $0xa08] sm:$0xff] }
  0xf0   : > { %3563 = vmatprep.subr.bf16.mxu0 %v4588_v29  ;;  %v4662_v23 = vcombine.high %v858_v16, %v866_v17  ;;  %v4663_v29 = vcombine.low %v858_v16, %v866_v17  ;;  %v969_v16 = vld [vmem:[%s5524_s17 + $0xd80] sm:$0xff] }
  0xf1   : > { %3689 = vmatpush1.bf16.msra.mxu1 %v4651_v25  ;;  %v881_v25 = vld [vmem:[%s5524_s17 + $0xac0] sm:$0xff] }
  0xf2   : > { %3691 = vmatprep.subr.bf16.mxu1 %v4652_v32  ;;  %v4600_v30 = vcombine.high %v873_v24, %v881_v25  ;;  %v889_v32 = vld [vmem:[%s5524_s17 + $0xb00] sm:$0xff]  ;;  %v4601_v36 = vcombine.low %v873_v24, %v881_v25 }
  0xf3   : > { %3565 = vmatpush1.bf16.msra.mxu0 %v4589_v31  ;;  %v4664_v31 = vcombine.high %v874_v26, %v882_v27  ;;  %v977_v17 = vld [vmem:[%s5524_s17 + $0xdc0] sm:$0xff] }
  0xf4   : > { %3567 = vmatprep.subr.bf16.mxu0 %v4590_v37  ;;  %v4665_v37 = vcombine.low %v874_v26, %v882_v27  ;;  %v985_v25 = vld [vmem:[%s5524_s17 + $0xe00] sm:$0xff]  ;;  %v986_v27 = vld [vmem:[%s5524_s17 + $0xe08] sm:$0xff] }
  0xf5   : > { %3693 = vmatpush1.bf16.msra.mxu1 %v4653_v33  ;;  %v897_v33 = vld [vmem:[%s5524_s17 + $0xb40] sm:$0xff] }
  0xf6   : > { %3695 = vmatprep.subr.bf16.mxu1 %v4654_v40  ;;  %v4602_v38 = vcombine.high %v889_v32, %v897_v33  ;;  %v905_v40 = vld [vmem:[%s5524_s17 + $0xb80] sm:$0xff] }
  0xf7   : > { %v993_v26 = vld [vmem:[%s5524_s17 + $0xe40] sm:$0xff] }
 0x189   : > { %v461_v50 = vpop.f32.mrb[0].mxu0 }
 0x18a   : > { %v463_v54 = vpop.f32.mrb[1].mxu0  ;;  %v5621_v56 = vadd.f32 %v461_v50, %v378_v48  ;;  %v4603_v48 = vcombine.low %v889_v32, %v897_v33  ;;  %v1001_v33 = vld [vmem:[%s5524_s17 + $0xe80] sm:$0xff] }
 0x18b   : > { %v5619_v55 = vadd.f32 %v463_v54, %v382_v47  ;;  %v5641_v14 = vpop.f32.mrb[0].mxu1  ;;  %v914_v47 = vld [vmem:[%s5524_s17 + $0xbc8] sm:$0xff] }
 0x18c   : > { %v534_v18 = vpop.f32.mrb[1].mxu1  ;;  %v4668_v51 = vcombine.high %v906_v42, %v914_v47  ;;  %v922_v54 = vld [vmem:[%s5524_s17 + $0xc08] sm:$0xff]  ;;  %v4669_v59 = vcombine.low %v906_v42, %v914_v47  ;;  %v1025_v42 = vld [vmem:[%s5524_s17 + $0xf40] sm:$0xff] }
 0x18d   : > { %2221 = vmatprep.mubr.f32.mxu0 %v5619_v55  ;;  %2363 = vmatprep.mubr.f32.mxu1 %v5619_v55  ;;  %v5646_v19 = vadd.f32 %v534_v18, %v390_v8  ;;  %v961_v8 = vld [vmem:[%s5524_s17 + $0xd40] sm:$0xff]  ;;  %v970_v18 = vld [vmem:[%s5524_s17 + $0xd88] sm:$0xff] }
 0x18e   : > { %2222 = vmatmul.mubr.f32.vlgmr.msra.gmra.mrb[2].mxu0 %v5621_v56  ;;  %2364 = vmatmul.mubr.f32.vlgmr.msra.gmra.mrb[2].mxu1 %v5621_v56  ;;  %v4610_v13 = vcombine.high %v953_v7, %v961_v8  ;;  %v1018_v47 = vld [vmem:[%s5524_s17 + $0xf08] sm:$0xff] }
 0x18f   : > { %3569 = vmatpush1.bf16.msra.mxu0 %v4591_v39  ;;  %3697 = vmatpush1.bf16.msra.mxu1 %v4655_v41  ;;  %v4666_v39 = vcombine.high %v890_v34, %v898_v35  ;;  %v913_v41 = vld [vmem:[%s5524_s17 + $0xbc0] sm:$0xff]  ;;  %v1002_v35 = vld [vmem:[%s5524_s17 + $0xe88] sm:$0xff] }
 0x190   : > { %3571 = vmatprep.subr.bf16.mxu0 %v4592_v57  ;;  %3699 = vmatprep.subr.bf16.mxu1 %v4656_v58  ;;  %v4604_v50 = vcombine.high %v905_v40, %v913_v41  ;;  %v930_v57 = vld [vmem:[%s5524_s17 + $0xc48] sm:$0xff]  ;;  %v4605_v58 = vcombine.low %v905_v40, %v913_v41  ;;  %v1009_v34 = vld [vmem:[%s5524_s17 + $0xec0] sm:$0xff] }
 0x191   : > { %2292 = vmatprep.mubr.f32.mxu0 %v5646_v19  ;;  %2434 = vmatprep.mubr.f32.mxu1 %v5646_v19  ;;  %v4670_v61 = vcombine.high %v922_v54, %v930_v57  ;;  %v4671_v4 = vcombine.low %v922_v54, %v930_v57  ;;  %v1017_v41 = vld [vmem:[%s5524_s17 + $0xf00] sm:$0xff]  ;;  %v1034_v57 = vld [vmem:[%s5524_s17 + $0xf88] sm:$0xff] }
 0x192   : > { %v1041_v54 = vld [vmem:[%s5524_s17 + $0xfc0] sm:$0xff] }
 0x193   : > { %3573 = vmatpush1.bf16.msra.mxu0 %v4593_v0  ;;  %3701 = vmatpush1.bf16.msra.mxu1 %v4657_v1  ;;  %v945_v0 = vld [vmem:[%s5524_s17 + $0xcc0] sm:$0xff]  ;;  %v938_v1 = vld [vmem:[%s5524_s17 + $0xc88] sm:$0xff] }
 0x194   : > { %3575 = vmatprep.subr.bf16.mxu0 %v4594_v2  ;;  %3703 = vmatprep.subr.bf16.mxu1 %v4658_v3  ;;  %v946_v2 = vld [vmem:[%s5524_s17 + $0xcc8] sm:$0xff]  ;;  %v4607_v3 = vcombine.low %v921_v52, %v929_v53  ;;  %v4608_v5 = vcombine.high %v937_v62, %v945_v0  ;;  %v1033_v53 = vld [vmem:[%s5524_s17 + $0xf80] sm:$0xff] }
 0x195   : > { %v4672_v6 = vcombine.high %v938_v1, %v946_v2 }
 0x197   : > { %3577 = vmatpush1.bf16.msra.mxu0 %v4595_v9  ;;  %3705 = vmatpush1.bf16.msra.mxu1 %v4659_v10  ;;  %v954_v9 = vld [vmem:[%s5524_s17 + $0xd08] sm:$0xff] }
 0x198   : > { %3579 = vmatprep.subr.bf16.mxu0 %v4596_v11  ;;  %3707 = vmatprep.subr.bf16.mxu1 %v4660_v12  ;;  %v962_v10 = vld [vmem:[%s5524_s17 + $0xd48] sm:$0xff]  ;;  %v4609_v11 = vcombine.low %v937_v62, %v945_v0  ;;  %v4673_v12 = vcombine.low %v938_v1, %v946_v2  ;;  %v4620_v62 = vcombine.high %v1033_v53, %v1041_v54  ;;  %v539_v1 = vld [vmem:[%s5524_s17 + $0x10] sm:$0xff] }
 0x199   : > { %v4674_v15 = vcombine.high %v954_v9, %v962_v10  ;;  %v547_v2 = vld [vmem:[%s5524_s17 + $0x50] sm:$0xff] }
 0x19b   : > { %3581 = vmatpush1.bf16.msra.mxu0 %v4597_v20  ;;  %3709 = vmatpush1.bf16.msra.mxu1 %v4661_v21  ;;  %v978_v20 = vld [vmem:[%s5524_s17 + $0xdc8] sm:$0xff]  ;;  %v4611_v21 = vcombine.low %v953_v7, %v961_v8  ;;  %v4686_v8 = vcombine.high %v539_v1, %v547_v2 }
 0x19c   : > { %3583 = vmatprep.subr.bf16.mxu0 %v4598_v22  ;;  %3711 = vmatprep.subr.bf16.mxu1 %v4662_v23  ;;  %v4675_v22 = vcombine.low %v954_v9, %v962_v10  ;;  %v4612_v23 = vcombine.high %v969_v16, %v977_v17  ;;  %v4676_v24 = vcombine.high %v970_v18, %v978_v20  ;;  %v555_v10 = vld [vmem:[%s5524_s17 + $0x90] sm:$0xff] }
 0x19f   : > { %3585 = vmatpush1.bf16.msra.mxu0 %v4599_v28  ;;  %3713 = vmatpush1.bf16.msra.mxu1 %v4663_v29  ;;  %v994_v28 = vld [vmem:[%s5524_s17 + $0xe48] sm:$0xff]  ;;  %v4613_v29 = vcombine.low %v969_v16, %v977_v17 }
 0x1a0   : > { %3587 = vmatprep.subr.bf16.mxu0 %v4600_v30  ;;  %3715 = vmatprep.subr.bf16.mxu1 %v4664_v31  ;;  %v4677_v30 = vcombine.low %v970_v18, %v978_v20  ;;  %v4614_v31 = vcombine.high %v985_v25, %v993_v26  ;;  %v4678_v32 = vcombine.high %v986_v27, %v994_v28  ;;  %v571_v20 = vld [vmem:[%s5524_s17 + $0x110] sm:$0xff] }
 0x1a3   : > { %3589 = vmatpush1.bf16.msra.mxu0 %v4601_v36  ;;  %3717 = vmatpush1.bf16.msra.mxu1 %v4665_v37  ;;  %v1010_v36 = vld [vmem:[%s5524_s17 + $0xec8] sm:$0xff]  ;;  %v4615_v37 = vcombine.low %v985_v25, %v993_v26 }
 0x1a4   : > { %3591 = vmatprep.subr.bf16.mxu0 %v4602_v38  ;;  %3719 = vmatprep.subr.bf16.mxu1 %v4666_v39  ;;  %v4679_v38 = vcombine.low %v986_v27, %v994_v28  ;;  %v4616_v39 = vcombine.high %v1001_v33, %v1009_v34  ;;  %v4680_v40 = vcombine.high %v1002_v35, %v1010_v36  ;;  %v587_v27 = vld [vmem:[%s5524_s17 + $0x190] sm:$0xff] }
 0x1a5   : > { %v595_v28 = vld [vmem:[%s5524_s17 + $0x1d0] sm:$0xff] }
 0x1a7   : > { %3593 = vmatpush1.bf16.msra.mxu0 %v4603_v48  ;;  %3721 = vmatpush1.bf16.msra.mxu1 %v4667_v49  ;;  %v1026_v48 = vld [vmem:[%s5524_s17 + $0xf48] sm:$0xff]  ;;  %v4617_v49 = vcombine.low %v1001_v33, %v1009_v34  ;;  %v4692_v33 = vcombine.high %v587_v27, %v595_v28 }
 0x1a8   : > { %3595 = vmatprep.subr.bf16.mxu0 %v4604_v50  ;;  %3723 = vmatprep.subr.bf16.mxu1 %v4668_v51  ;;  %v4681_v50 = vcombine.low %v1002_v35, %v1010_v36  ;;  %v4618_v51 = vcombine.high %v1017_v41, %v1025_v42  ;;  %v4682_v52 = vcombine.high %v1018_v47, %v1026_v48  ;;  %v603_v35 = vld [vmem:[%s5524_s17 + $0x210] sm:$0xff] }
 0x1a9   : > { %v611_v36 = vld [vmem:[%s5524_s17 + $0x250] sm:$0xff] }
 0x1ab   : > { %3597 = vmatpush1.bf16.msra.mxu0 %v4605_v58  ;;  %3725 = vmatpush1.bf16.msra.mxu1 %v4669_v59  ;;  %v1042_v58 = vld [vmem:[%s5524_s17 + $0xfc8] sm:$0xff]  ;;  %v5695_v59 = vsub.s32 2, %v5601_v43 }
 0x1ac   : > { %3599 = vmatprep.subr.bf16.mxu0 %v4606_v60  ;;  %3727 = vmatprep.subr.bf16.mxu1 %v4670_v61  ;;  %v4619_v60 = vcombine.low %v1017_v41, %v1025_v42  ;;  %v4683_v61 = vcombine.low %v1018_v47, %v1026_v48  ;;  %v4684_v0 = vcombine.high %v1034_v57, %v1042_v58  ;;  %v619_v47 = vld [vmem:[%s5524_s17 + $0x290] sm:$0xff] }
 0x1ad   : > { %v4685_v7 = vcombine.low %v1034_v57, %v1042_v58  ;;  %v4694_v41 = vcombine.high %v603_v35, %v611_v36  ;;  %v627_v48 = vld [vmem:[%s5524_s17 + $0x2d0] sm:$0xff] }
 0x1ae   : > { %v635_v57 = vld [vmem:[%s5524_s17 + $0x310] sm:$0xff] }
 0x1af   : > { %3601 = vmatpush1.bf16.msra.mxu0 %v4607_v3  ;;  %3729 = vmatpush1.bf16.msra.mxu1 %v4671_v4  ;;  %v540_v3 = vld [vmem:[%s5524_s17 + $0x18] sm:$0xff]  ;;  %v643_v58 = vld [vmem:[%s5524_s17 + $0x350] sm:$0xff] }
 0x1b0   : > { %3603 = vmatprep.subr.bf16.mxu0 %v4608_v5  ;;  %3731 = vmatprep.subr.bf16.mxu1 %v4672_v6  ;;  %v548_v4 = vld [vmem:[%s5524_s17 + $0x58] sm:$0xff]  ;;  %v386_v5 = vrot.slane %v5606_v45, %v5695_v59  ;;  %v4621_v6 = vcombine.low %v1033_v53, %v1041_v54  ;;  %v4687_v45 = vcombine.low %v539_v1, %v547_v2 }
 0x1b1   : > { %v4750_v9 = vcombine.high %v540_v3, %v548_v4  ;;  %v4751_v16 = vcombine.low %v540_v3, %v548_v4  ;;  %v4696_v53 = vcombine.high %v619_v47, %v627_v48  ;;  %v4698_v1 = vcombine.high %v635_v57, %v643_v58  ;;  %v651_v3 = vld [vmem:[%s5524_s17 + $0x390] sm:$0xff] }
 0x1b2   : > { %v659_v4 = vld [vmem:[%s5524_s17 + $0x3d0] sm:$0xff] }
 0x1b3   : > { %3605 = vmatpush1.bf16.msra.mxu0 %v4609_v11  ;;  %3733 = vmatpush1.bf16.msra.mxu1 %v4673_v12  ;;  %v5705_v11 = vadd.f32 %v5641_v14, %v386_v5  ;;  %v563_v12 = vld [vmem:[%s5524_s17 + $0xd0] sm:$0xff]  ;;  %v572_v14 = vld [vmem:[%s5524_s17 + $0x118] sm:$0xff] }
 0x1b4   : > { %3607 = vmatprep.subr.bf16.mxu0 %v4610_v13  ;;  %3735 = vmatprep.subr.bf16.mxu1 %v4674_v15  ;;  %v556_v13 = vld [vmem:[%s5524_s17 + $0x98] sm:$0xff]  ;;  %v4688_v17 = vcombine.high %v555_v10, %v563_v12 }
 0x1b5   : > { %v564_v15 = vld [vmem:[%s5524_s17 + $0xd8] sm:$0xff] }
 0x1b6   : > { %v4752_v18 = vcombine.high %v556_v13, %v564_v15  ;;  %v652_v5 = vld [vmem:[%s5524_s17 + $0x398] sm:$0xff] }
 0x1b7   : > { %3609 = vmatpush1.bf16.msra.mxu0 %v4611_v21  ;;  %3737 = vmatpush1.bf16.msra.mxu1 %v4675_v22  ;;  %v579_v21 = vld [vmem:[%s5524_s17 + $0x150] sm:$0xff]  ;;  %v580_v22 = vld [vmem:[%s5524_s17 + $0x158] sm:$0xff] }
 0x1b8   : > { %3611 = vmatprep.subr.bf16.mxu0 %v4612_v23  ;;  %3739 = vmatprep.subr.bf16.mxu1 %v4676_v24  ;;  %v4689_v23 = vcombine.low %v555_v10, %v563_v12  ;;  %v4753_v24 = vcombine.low %v556_v13, %v564_v15  ;;  %v4690_v25 = vcombine.high %v571_v20, %v579_v21  ;;  %v667_v12 = vld [vmem:[%s5524_s17 + $0x410] sm:$0xff]  ;;  %v668_v15 = vld [vmem:[%s5524_s17 + $0x418] sm:$0xff] }
 0x1b9   : > { %v4754_v26 = vcombine.high %v572_v14, %v580_v22  ;;  %v675_v13 = vld [vmem:[%s5524_s17 + $0x450] sm:$0xff] }
 0x1bb   : > { %3613 = vmatpush1.bf16.msra.mxu0 %v4613_v29  ;;  %3741 = vmatpush1.bf16.msra.mxu1 %v4677_v30  ;;  %v588_v29 = vld [vmem:[%s5524_s17 + $0x198] sm:$0xff] }
 0x1bc   : > { %3615 = vmatprep.subr.bf16.mxu0 %v4614_v31  ;;  %3743 = vmatprep.subr.bf16.mxu1 %v4678_v32  ;;  %v596_v30 = vld [vmem:[%s5524_s17 + $0x1d8] sm:$0xff]  ;;  %v4691_v31 = vcombine.low %v571_v20, %v579_v21  ;;  %v4755_v32 = vcombine.low %v572_v14, %v580_v22  ;;  %v683_v21 = vld [vmem:[%s5524_s17 + $0x490] sm:$0xff] }
 0x1bd   : > { %v4756_v34 = vcombine.high %v588_v29, %v596_v30  ;;  %v691_v14 = vld [vmem:[%s5524_s17 + $0x4d0] sm:$0xff]  ;;  %v684_v22 = vld [vmem:[%s5524_s17 + $0x498] sm:$0xff] }
 0x1bf   : > { %3617 = vmatpush1.bf16.msra.mxu0 %v4615_v37  ;;  %3745 = vmatpush1.bf16.msra.mxu1 %v4679_v38  ;;  %v604_v37 = vld [vmem:[%s5524_s17 + $0x218] sm:$0xff] }
 0x1c0   : > { %3619 = vmatprep.subr.bf16.mxu0 %v4616_v39  ;;  %3747 = vmatprep.subr.bf16.mxu1 %v4680_v40  ;;  %v612_v38 = vld [vmem:[%s5524_s17 + $0x258] sm:$0xff]  ;;  %v4693_v39 = vcombine.low %v587_v27, %v595_v28  ;;  %v4757_v40 = vcombine.low %v588_v29, %v596_v30  ;;  %v699_v28 = vld [vmem:[%s5524_s17 + $0x510] sm:$0xff] }
 0x1c1   : > { %v4758_v42 = vcombine.high %v604_v37, %v612_v38  ;;  %v707_v29 = vld [vmem:[%s5524_s17 + $0x550] sm:$0xff]  ;;  %v700_v30 = vld [vmem:[%s5524_s17 + $0x518] sm:$0xff] }
 0x1c3   : > { %3621 = vmatpush1.bf16.msra.mxu0 %v4617_v49  ;;  %3749 = vmatpush1.bf16.msra.mxu1 %v4681_v50  ;;  %v620_v49 = vld [vmem:[%s5524_s17 + $0x298] sm:$0xff] }
 0x1c4   : > { %3623 = vmatprep.subr.bf16.mxu0 %v4618_v51  ;;  %3751 = vmatprep.subr.bf16.mxu1 %v4682_v52  ;;  %v628_v50 = vld [vmem:[%s5524_s17 + $0x2d8] sm:$0xff]  ;;  %v4695_v51 = vcombine.low %v603_v35, %v611_v36  ;;  %v4759_v52 = vcombine.low %v604_v37, %v612_v38  ;;  %v715_v36 = vld [vmem:[%s5524_s17 + $0x590] sm:$0xff] }
 0x1c5   : > { %v4760_v54 = vcombine.high %v620_v49, %v628_v50  ;;  %v723_v37 = vld [vmem:[%s5524_s17 + $0x5d0] sm:$0xff]  ;;  %v716_v38 = vld [vmem:[%s5524_s17 + $0x598] sm:$0xff] }
 0x1c7   : > { %3625 = vmatpush1.bf16.msra.mxu0 %v4619_v60  ;;  %3753 = vmatpush1.bf16.msra.mxu1 %v4683_v61  ;;  %v636_v60 = vld [vmem:[%s5524_s17 + $0x318] sm:$0xff] }
 0x1c8   : > { %3627 = vmatprep.subr.bf16.mxu0 %v4620_v62  ;;  %3755 = vmatprep.subr.bf16.mxu1 %v4684_v0  ;;  %v644_v61 = vld [vmem:[%s5524_s17 + $0x358] sm:$0xff]  ;;  %v4697_v62 = vcombine.low %v619_v47, %v627_v48  ;;  %v4761_v0 = vcombine.low %v620_v49, %v628_v50  ;;  %v731_v48 = vld [vmem:[%s5524_s17 + $0x610] sm:$0xff] }
 0x1c9   : > { %v4762_v2 = vcombine.high %v636_v60, %v644_v61  ;;  %v739_v49 = vld [vmem:[%s5524_s17 + $0x650] sm:$0xff]  ;;  %v732_v50 = vld [vmem:[%s5524_s17 + $0x618] sm:$0xff] }
 0x1cb   : > { %3629 = vmatpush1.bf16.msra.mxu0 %v4621_v6  ;;  %3757 = vmatpush1.bf16.msra.mxu1 %v4685_v7  ;;  %v660_v6 = vld [vmem:[%s5524_s17 + $0x3d8] sm:$0xff]  ;;  %v4699_v7 = vcombine.low %v635_v57, %v643_v58  ;;  %v747_v58 = vld [vmem:[%s5524_s17 + $0x690] sm:$0xff] }
 0x1cc   : > { %3759 = vmatprep.subr.bf16.mxu0 %v4686_v8  ;;  %3887 = vmatprep.subr.bf16.mxu1 %v4750_v9  ;;  %v4763_v8 = vcombine.low %v636_v60, %v644_v61  ;;  %v4700_v9 = vcombine.high %v651_v3, %v659_v4  ;;  %v4764_v10 = vcombine.high %v652_v5, %v660_v6  ;;  %v755_v60 = vld [vmem:[%s5524_s17 + $0x6d0] sm:$0xff]  ;;  %v748_v61 = vld [vmem:[%s5524_s17 + $0x698] sm:$0xff] }
 0x1ce   : > { %2293 = vmatmul.mubr.f32.vlgmr.msra.gmra.mrb[2].mxu0 %v5705_v11  ;;  %2435 = vmatmul.mubr.f32.vlgmr.msra.gmra.mrb[2].mxu1 %v5705_v11 }
 0x1cf   : > { %3761 = vmatpush1.bf16.msra.mxu0 %v4687_v45  ;;  %2505 = vmatprep.mubr.f32.mxu0 %v5619_v55  ;;  %v676_v45 = vld [vmem:[%s5524_s17 + $0x458] sm:$0xff] }
 0x1d0   : > { %3889 = vmatpush1.bf16.msra.mxu1 %v4751_v16  ;;  %2647 = vmatprep.mubr.f32.mxu1 %v5619_v55  ;;  %v4701_v16 = vcombine.low %v651_v3, %v659_v4  ;;  %v4766_v20 = vcombine.high %v668_v15, %v676_v45  ;;  %v763_v4 = vld [vmem:[%s5524_s17 + $0x710] sm:$0xff] }
 0x1d1   : > { %3763 = vmatprep.subr.bf16.mxu0 %v4688_v17  ;;  %3891 = vmatprep.subr.bf16.mxu1 %v4752_v18  ;;  %v4765_v17 = vcombine.low %v652_v5, %v660_v6  ;;  %v4702_v18 = vcombine.high %v667_v12, %v675_v13  ;;  %v771_v5 = vld [vmem:[%s5524_s17 + $0x750] sm:$0xff]  ;;  %v764_v6 = vld [vmem:[%s5524_s17 + $0x718] sm:$0xff] }
 0x1d3   : > { %3765 = vmatpush1.bf16.msra.mxu0 %v4689_v23  ;;  %v692_v23 = vld [vmem:[%s5524_s17 + $0x4d8] sm:$0xff] }
 0x1d4   : > { %3893 = vmatpush1.bf16.msra.mxu1 %v4753_v24  ;;  %3767 = vmatprep.subr.bf16.mxu0 %v4690_v25  ;;  %v4703_v24 = vcombine.low %v667_v12, %v675_v13  ;;  %v4767_v25 = vcombine.low %v668_v15, %v676_v45  ;;  %v4768_v27 = vcombine.high %v684_v22, %v692_v23  ;;  %v779_v13 = vld [vmem:[%s5524_s17 + $0x790] sm:$0xff]  ;;  %v780_v45 = vld [vmem:[%s5524_s17 + $0x798] sm:$0xff] }
 0x1d5   : > { %3895 = vmatprep.subr.bf16.mxu1 %v4754_v26  ;;  %v4704_v26 = vcombine.high %v683_v21, %v691_v14  ;;  %v787_v15 = vld [vmem:[%s5524_s17 + $0x7d0] sm:$0xff] }
 0x1d7   : > { %3769 = vmatpush1.bf16.msra.mxu0 %v4691_v31  ;;  %v708_v31 = vld [vmem:[%s5524_s17 + $0x558] sm:$0xff] }
 0x1d8   : > { %3897 = vmatpush1.bf16.msra.mxu1 %v4755_v32  ;;  %3771 = vmatprep.subr.bf16.mxu0 %v4692_v33  ;;  %v4705_v32 = vcombine.low %v683_v21, %v691_v14  ;;  %v4769_v33 = vcombine.low %v684_v22, %v692_v23  ;;  %v4770_v35 = vcombine.high %v700_v30, %v708_v31  ;;  %v795_v14 = vld [vmem:[%s5524_s17 + $0x810] sm:$0xff]  ;;  %v796_v23 = vld [vmem:[%s5524_s17 + $0x818] sm:$0xff] }
 0x1d9   : > { %3899 = vmatprep.subr.bf16.mxu1 %v4756_v34  ;;  %v4706_v34 = vcombine.high %v699_v28, %v707_v29  ;;  %v803_v22 = vld [vmem:[%s5524_s17 + $0x850] sm:$0xff] }
 0x1db   : > { %3773 = vmatpush1.bf16.msra.mxu0 %v4693_v39  ;;  %v724_v39 = vld [vmem:[%s5524_s17 + $0x5d8] sm:$0xff] }
 0x1dc   : > { %3901 = vmatpush1.bf16.msra.mxu1 %v4757_v40  ;;  %3775 = vmatprep.subr.bf16.mxu0 %v4694_v41  ;;  %v4707_v40 = vcombine.low %v699_v28, %v707_v29  ;;  %v4771_v41 = vcombine.low %v700_v30, %v708_v31  ;;  %v4772_v47 = vcombine.high %v716_v38, %v724_v39  ;;  %v811_v29 = vld [vmem:[%s5524_s17 + $0x890] sm:$0xff] }
 0x1dd   : > { %3903 = vmatprep.subr.bf16.mxu1 %v4758_v42  ;;  %v4708_v42 = vcombine.high %v715_v36, %v723_v37  ;;  %v819_v30 = vld [vmem:[%s5524_s17 + $0x8d0] sm:$0xff]  ;;  %v4719_v31 = vcombine.low %v795_v14, %v803_v22 }
 0x1df   : > { %3777 = vmatpush1.bf16.msra.mxu0 %v4695_v51  ;;  %v740_v51 = vld [vmem:[%s5524_s17 + $0x658] sm:$0xff] }
 0x1e0   : > { %3905 = vmatpush1.bf16.msra.mxu1 %v4759_v52  ;;  %3779 = vmatprep.subr.bf16.mxu0 %v4696_v53  ;;  %v4709_v52 = vcombine.low %v715_v36, %v723_v37  ;;  %v4773_v53 = vcombine.low %v716_v38, %v724_v39  ;;  %v4774_v57 = vcombine.high %v732_v50, %v740_v51  ;;  %v827_v36 = vld [vmem:[%s5524_s17 + $0x910] sm:$0xff]  ;;  %v828_v39 = vld [vmem:[%s5524_s17 + $0x918] sm:$0xff] }
 0x1e1   : > { %3907 = vmatprep.subr.bf16.mxu1 %v4760_v54  ;;  %v4710_v54 = vcombine.high %v731_v48, %v739_v49  ;;  %v835_v37 = vld [vmem:[%s5524_s17 + $0x950] sm:$0xff] }
 0x1e3   : > { %3781 = vmatpush1.bf16.msra.mxu0 %v4697_v62  ;;  %v756_v62 = vld [vmem:[%s5524_s17 + $0x6d8] sm:$0xff] }
 0x1e4   : > { %3909 = vmatpush1.bf16.msra.mxu1 %v4761_v0  ;;  %3783 = vmatprep.subr.bf16.mxu0 %v4698_v1  ;;  %v4711_v0 = vcombine.low %v731_v48, %v739_v49  ;;  %v4775_v1 = vcombine.low %v732_v50, %v740_v51  ;;  %v4776_v3 = vcombine.high %v748_v61, %v756_v62  ;;  %v843_v49 = vld [vmem:[%s5524_s17 + $0x990] sm:$0xff]  ;;  %v844_v51 = vld [vmem:[%s5524_s17 + $0x998] sm:$0xff] }
 0x1e5   : > { %3911 = vmatprep.subr.bf16.mxu1 %v4762_v2  ;;  %v4712_v2 = vcombine.high %v747_v58, %v755_v60  ;;  %v851_v50 = vld [vmem:[%s5524_s17 + $0x9d0] sm:$0xff] }
 0x1e7   : > { %3785 = vmatpush1.bf16.msra.mxu0 %v4699_v7  ;;  %v772_v7 = vld [vmem:[%s5524_s17 + $0x758] sm:$0xff] }
 0x1e8   : > { %3913 = vmatpush1.bf16.msra.mxu1 %v4763_v8  ;;  %3787 = vmatprep.subr.bf16.mxu0 %v4700_v9  ;;  %v4713_v8 = vcombine.low %v747_v58, %v755_v60  ;;  %v4777_v9 = vcombine.low %v748_v61, %v756_v62  ;;  %v4778_v12 = vcombine.high %v764_v6, %v772_v7  ;;  %v859_v60 = vld [vmem:[%s5524_s17 + $0xa10] sm:$0xff]  ;;  %v860_v62 = vld [vmem:[%s5524_s17 + $0xa18] sm:$0xff] }
 0x1e9   : > { %3915 = vmatprep.subr.bf16.mxu1 %v4764_v10  ;;  %v4714_v10 = vcombine.high %v763_v4, %v771_v5  ;;  %v867_v61 = vld [vmem:[%s5524_s17 + $0xa50] sm:$0xff] }
 0x1eb   : > { %3789 = vmatpush1.bf16.msra.mxu0 %v4701_v16  ;;  %v788_v16 = vld [vmem:[%s5524_s17 + $0x7d8] sm:$0xff] }
 0x1ec   : > { %3917 = vmatpush1.bf16.msra.mxu1 %v4765_v17  ;;  %3791 = vmatprep.subr.bf16.mxu0 %v4702_v18  ;;  %v4715_v17 = vcombine.low %v763_v4, %v771_v5  ;;  %v4779_v18 = vcombine.low %v764_v6, %v772_v7  ;;  %v4780_v21 = vcombine.high %v780_v45, %v788_v16  ;;  %v875_v5 = vld [vmem:[%s5524_s17 + $0xa90] sm:$0xff]  ;;  %v876_v7 = vld [vmem:[%s5524_s17 + $0xa98] sm:$0xff] }
 0x1ed   : > { %3919 = vmatprep.subr.bf16.mxu1 %v4766_v20  ;;  %v4716_v20 = vcombine.high %v779_v13, %v787_v15  ;;  %v883_v6 = vld [vmem:[%s5524_s17 + $0xad0] sm:$0xff] }
 0x1ef   : > { %3793 = vmatpush1.bf16.msra.mxu0 %v4703_v24  ;;  %v804_v24 = vld [vmem:[%s5524_s17 + $0x858] sm:$0xff] }
 0x1f0   : > { %3921 = vmatpush1.bf16.msra.mxu1 %v4767_v25  ;;  %3795 = vmatprep.subr.bf16.mxu0 %v4704_v26  ;;  %v4717_v25 = vcombine.low %v779_v13, %v787_v15  ;;  %v4781_v26 = vcombine.low %v780_v45, %v788_v16  ;;  %v4782_v28 = vcombine.high %v796_v23, %v804_v24  ;;  %v891_v15 = vld [vmem:[%s5524_s17 + $0xb10] sm:$0xff]  ;;  %v892_v16 = vld [vmem:[%s5524_s17 + $0xb18] sm:$0xff] }
 0x1f1   : > { %3923 = vmatprep.subr.bf16.mxu1 %v4768_v27  ;;  %v4718_v27 = vcombine.high %v795_v14, %v803_v22  ;;  %v899_v45 = vld [vmem:[%s5524_s17 + $0xb50] sm:$0xff] }
 0x1f2   : > { %v907_v22 = vld [vmem:[%s5524_s17 + $0xb90] sm:$0xff] }
 0x1f3   : > { %3797 = vmatpush1.bf16.msra.mxu0 %v4705_v32  ;;  %v812_v32 = vld [vmem:[%s5524_s17 + $0x898] sm:$0xff] }
 0x1f4   : > { %3925 = vmatpush1.bf16.msra.mxu1 %v4769_v33  ;;  %3799 = vmatprep.subr.bf16.mxu0 %v4706_v34  ;;  %v820_v33 = vld [vmem:[%s5524_s17 + $0x8d8] sm:$0xff]  ;;  %v4783_v34 = vcombine.low %v796_v23, %v804_v24  ;;  %v915_v23 = vld [vmem:[%s5524_s17 + $0xbd0] sm:$0xff] }
 0x1f5   : > { %3927 = vmatprep.subr.bf16.mxu1 %v4770_v35  ;;  %v4720_v35 = vcombine.high %v811_v29, %v819_v30  ;;  %v4784_v38 = vcombine.high %v812_v32, %v820_v33  ;;  %v908_v24 = vld [vmem:[%s5524_s17 + $0xb98] sm:$0xff] }
 0x1f7   : > { %3801 = vmatpush1.bf16.msra.mxu0 %v4707_v40  ;;  %v836_v40 = vld [vmem:[%s5524_s17 + $0x958] sm:$0xff] }
 0x1f8   : > { %3929 = vmatpush1.bf16.msra.mxu1 %v4771_v41  ;;  %3803 = vmatprep.subr.bf16.mxu0 %v4708_v42  ;;  %v4721_v41 = vcombine.low %v811_v29, %v819_v30  ;;  %v4785_v42 = vcombine.low %v812_v32, %v820_v33  ;;  %v4786_v48 = vcombine.high %v828_v39, %v836_v40  ;;  %v923_v30 = vld [vmem:[%s5524_s17 + $0xc10] sm:$0xff]  ;;  %v924_v32 = vld [vmem:[%s5524_s17 + $0xc18] sm:$0xff] }
 0x1f9   : > { %3931 = vmatprep.subr.bf16.mxu1 %v4772_v47  ;;  %v4722_v47 = vcombine.high %v827_v36, %v835_v37  ;;  %v932_v33 = vld [vmem:[%s5524_s17 + $0xc58] sm:$0xff] }
 0x1fb   : > { %3805 = vmatpush1.bf16.msra.mxu0 %v4709_v52  ;;  %v852_v52 = vld [vmem:[%s5524_s17 + $0x9d8] sm:$0xff] }
 0x1fc   : > { %3933 = vmatpush1.bf16.msra.mxu1 %v4773_v53  ;;  %3807 = vmatprep.subr.bf16.mxu0 %v4710_v54  ;;  %v4723_v53 = vcombine.low %v827_v36, %v835_v37  ;;  %v4787_v54 = vcombine.low %v828_v39, %v836_v40  ;;  %v4788_v58 = vcombine.high %v844_v51, %v852_v52  ;;  %v947_v39 = vld [vmem:[%s5524_s17 + $0xcd0] sm:$0xff]  ;;  %v940_v40 = vld [vmem:[%s5524_s17 + $0xc98] sm:$0xff] }
 0x1fd   : > { %3935 = vmatprep.subr.bf16.mxu1 %v4774_v57  ;;  %v4724_v57 = vcombine.high %v843_v49, %v851_v50  ;;  %v4798_v37 = vcombine.high %v924_v32, %v932_v33 }
 0x1ff   : > { %3809 = vmatpush1.bf16.msra.mxu0 %v4711_v0  ;;  %v868_v0 = vld [vmem:[%s5524_s17 + $0xa58] sm:$0xff] }
 0x200   : > { %3937 = vmatpush1.bf16.msra.mxu1 %v4775_v1  ;;  %3811 = vmatprep.subr.bf16.mxu0 %v4712_v2  ;;  %v4725_v1 = vcombine.low %v843_v49, %v851_v50  ;;  %v4789_v2 = vcombine.low %v844_v51, %v852_v52  ;;  %v4790_v4 = vcombine.high %v860_v62, %v868_v0  ;;  %v955_v50 = vld [vmem:[%s5524_s17 + $0xd10] sm:$0xff]  ;;  %v956_v52 = vld [vmem:[%s5524_s17 + $0xd18] sm:$0xff] }
 0x201   : > { %3939 = vmatprep.subr.bf16.mxu1 %v4776_v3  ;;  %v4726_v3 = vcombine.high %v859_v60, %v867_v61  ;;  %v963_v51 = vld [vmem:[%s5524_s17 + $0xd50] sm:$0xff] }
 0x203   : > { %3813 = vmatpush1.bf16.msra.mxu0 %v4713_v8  ;;  %v884_v8 = vld [vmem:[%s5524_s17 + $0xad8] sm:$0xff] }
 0x204   : > { %3941 = vmatpush1.bf16.msra.mxu1 %v4777_v9  ;;  %3815 = vmatprep.subr.bf16.mxu0 %v4714_v10  ;;  %v4727_v9 = vcombine.low %v859_v60, %v867_v61  ;;  %v4791_v10 = vcombine.low %v860_v62, %v868_v0  ;;  %v4792_v13 = vcombine.high %v876_v7, %v884_v8  ;;  %v971_v61 = vld [vmem:[%s5524_s17 + $0xd90] sm:$0xff]  ;;  %v972_v0 = vld [vmem:[%s5524_s17 + $0xd98] sm:$0xff] }
 0x205   : > { %3943 = vmatprep.subr.bf16.mxu1 %v4778_v12  ;;  %v4728_v12 = vcombine.high %v875_v5, %v883_v6  ;;  %v979_v62 = vld [vmem:[%s5524_s17 + $0xdd0] sm:$0xff] }
 0x207   : > { %3817 = vmatpush1.bf16.msra.mxu0 %v4715_v17  ;;  %v900_v17 = vld [vmem:[%s5524_s17 + $0xb58] sm:$0xff] }
 0x208   : > { %3945 = vmatpush1.bf16.msra.mxu1 %v4779_v18  ;;  %3819 = vmatprep.subr.bf16.mxu0 %v4716_v20  ;;  %v4729_v18 = vcombine.low %v875_v5, %v883_v6  ;;  %v4793_v20 = vcombine.low %v876_v7, %v884_v8  ;;  %v4794_v14 = vcombine.high %v892_v16, %v900_v17  ;;  %v987_v6 = vld [vmem:[%s5524_s17 + $0xe10] sm:$0xff]  ;;  %v988_v8 = vld [vmem:[%s5524_s17 + $0xe18] sm:$0xff] }
 0x209   : > { %3947 = vmatprep.subr.bf16.mxu1 %v4780_v21  ;;  %v4730_v21 = vcombine.high %v891_v15, %v899_v45  ;;  %v995_v7 = vld [vmem:[%s5524_s17 + $0xe50] sm:$0xff] }
 0x20b   : > { %3821 = vmatpush1.bf16.msra.mxu0 %v4717_v25  ;;  %v916_v25 = vld [vmem:[%s5524_s17 + $0xbd8] sm:$0xff] }
 0x20c   : > { %3949 = vmatpush1.bf16.msra.mxu1 %v4781_v26  ;;  %3823 = vmatprep.subr.bf16.mxu0 %v4718_v27  ;;  %v4731_v26 = vcombine.low %v891_v15, %v899_v45  ;;  %v4795_v27 = vcombine.low %v892_v16, %v900_v17  ;;  %v4796_v29 = vcombine.high %v908_v24, %v916_v25  ;;  %v1003_v45 = vld [vmem:[%s5524_s17 + $0xe90] sm:$0xff]  ;;  %v1004_v17 = vld [vmem:[%s5524_s17 + $0xe98] sm:$0xff] }
 0x20d   : > { %3951 = vmatprep.subr.bf16.mxu1 %v4782_v28  ;;  %v4732_v28 = vcombine.high %v907_v22, %v915_v23  ;;  %v1011_v16 = vld [vmem:[%s5524_s17 + $0xed0] sm:$0xff] }
 0x20e   : > { %2506 = vmatmul.mubr.f32.vlgmr.msra.gmra.mrb[4].mxu0 %v5621_v56 }
 0x20f   : > { %2648 = vmatmul.mubr.f32.vlgmr.msra.gmra.mrb[4].mxu1 %v5621_v56  ;;  %3825 = vmatpush1.bf16.msra.mxu0 %v4719_v31  ;;  %v931_v31 = vld [vmem:[%s5524_s17 + $0xc50] sm:$0xff] }
 0x210   : > { %2576 = vmatprep.mubr.f32.mxu0 %v5646_v19  ;;  %3953 = vmatpush1.bf16.msra.mxu1 %v4783_v34  ;;  %v4733_v34 = vcombine.low %v907_v22, %v915_v23  ;;  %v4734_v36 = vcombine.high %v923_v30, %v931_v31  ;;  %v1019_v23 = vld [vmem:[%s5524_s17 + $0xf10] sm:$0xff] }
 0x211   : > { %2718 = vmatprep.mubr.f32.mxu1 %v5646_v19  ;;  %3827 = vmatprep.subr.bf16.mxu0 %v4720_v35  ;;  %v4797_v35 = vcombine.low %v908_v24, %v916_v25  ;;  %v1027_v24 = vld [vmem:[%s5524_s17 + $0xf50] sm:$0xff]  ;;  %v1020_v25 = vld [vmem:[%s5524_s17 + $0xf18] sm:$0xff] }
 0x212   : > { %3955 = vmatprep.subr.bf16.mxu1 %v4784_v38  ;;  %v939_v38 = vld [vmem:[%s5524_s17 + $0xc90] sm:$0xff] }
 0x213   : > { %3829 = vmatpush1.bf16.msra.mxu0 %v4721_v41  ;;  %v948_v41 = vld [vmem:[%s5524_s17 + $0xcd8] sm:$0xff] }
 0x214   : > { %3957 = vmatpush1.bf16.msra.mxu1 %v4785_v42  ;;  %3831 = vmatprep.subr.bf16.mxu0 %v4722_v47  ;;  %v4735_v42 = vcombine.low %v923_v30, %v931_v31  ;;  %v4799_v47 = vcombine.low %v924_v32, %v932_v33  ;;  %v4800_v49 = vcombine.high %v940_v40, %v948_v41  ;;  %v1035_v31 = vld [vmem:[%s5524_s17 + $0xf90] sm:$0xff]  ;;  %v1036_v33 = vld [vmem:[%s5524_s17 + $0xf98] sm:$0xff] }
 0x215   : > { %3959 = vmatprep.subr.bf16.mxu1 %v4786_v48  ;;  %v4736_v48 = vcombine.high %v939_v38, %v947_v39  ;;  %v1043_v32 = vld [vmem:[%s5524_s17 + $0xfd0] sm:$0xff] }
 0x217   : > { %3833 = vmatpush1.bf16.msra.mxu0 %v4723_v53  ;;  %v964_v53 = vld [vmem:[%s5524_s17 + $0xd58] sm:$0xff] }
 0x218   : > { %3961 = vmatpush1.bf16.msra.mxu1 %v4787_v54  ;;  %3835 = vmatprep.subr.bf16.mxu0 %v4724_v57  ;;  %v4737_v54 = vcombine.low %v939_v38, %v947_v39  ;;  %v4801_v57 = vcombine.low %v940_v40, %v948_v41  ;;  %v4802_v60 = vcombine.high %v956_v52, %v964_v53  ;;  %v541_v39 = vld [vmem:[%s5524_s17 + $0x20] sm:$0xff]  ;;  %v542_v41 = vld [vmem:[%s5524_s17 + $0x28] sm:$0xff] }
 0x219   : > { %3963 = vmatprep.subr.bf16.mxu1 %v4788_v58  ;;  %v4738_v58 = vcombine.high %v955_v50, %v963_v51  ;;  %v549_v40 = vld [vmem:[%s5524_s17 + $0x60] sm:$0xff] }
 0x21b   : > { %3837 = vmatpush1.bf16.msra.mxu0 %v4725_v1  ;;  %v980_v1 = vld [vmem:[%s5524_s17 + $0xdd8] sm:$0xff] }
 0x21c   : > { %3965 = vmatpush1.bf16.msra.mxu1 %v4789_v2  ;;  %3839 = vmatprep.subr.bf16.mxu0 %v4726_v3  ;;  %v4739_v2 = vcombine.low %v955_v50, %v963_v51  ;;  %v4803_v3 = vcombine.low %v956_v52, %v964_v53  ;;  %v4804_v5 = vcombine.high %v972_v0, %v980_v1  ;;  %v557_v51 = vld [vmem:[%s5524_s17 + $0xa0] sm:$0xff] }
 0x21d   : > { %3967 = vmatprep.subr.bf16.mxu1 %v4790_v4  ;;  %v4740_v4 = vcombine.high %v971_v61, %v979_v62  ;;  %v565_v52 = vld [vmem:[%s5524_s17 + $0xe0] sm:$0xff]  ;;  %v4815_v53 = vcombine.low %v541_v39, %v549_v40 }
 0x21f   : > { %3841 = vmatpush1.bf16.msra.mxu0 %v4727_v9  ;;  %v996_v9 = vld [vmem:[%s5524_s17 + $0xe58] sm:$0xff] }
 0x220   : > { %3969 = vmatpush1.bf16.msra.mxu1 %v4791_v10  ;;  %3843 = vmatprep.subr.bf16.mxu0 %v4728_v12  ;;  %v4741_v10 = vcombine.low %v971_v61, %v979_v62  ;;  %v4805_v12 = vcombine.low %v972_v0, %v980_v1  ;;  %v4806_v15 = vcombine.high %v988_v8, %v996_v9  ;;  %v573_v61 = vld [vmem:[%s5524_s17 + $0x120] sm:$0xff]  ;;  %v574_v1 = vld [vmem:[%s5524_s17 + $0x128] sm:$0xff] }
 0x221   : > { %3971 = vmatprep.subr.bf16.mxu1 %v4792_v13  ;;  %v4742_v13 = vcombine.high %v987_v6, %v995_v7  ;;  %v581_v62 = vld [vmem:[%s5524_s17 + $0x160] sm:$0xff] }
 0x223   : > { %3845 = vmatpush1.bf16.msra.mxu0 %v4729_v18  ;;  %v1012_v18 = vld [vmem:[%s5524_s17 + $0xed8] sm:$0xff] }
 0x224   : > { %3973 = vmatpush1.bf16.msra.mxu1 %v4793_v20  ;;  %3847 = vmatprep.subr.bf16.mxu0 %v4730_v21  ;;  %v4743_v20 = vcombine.low %v987_v6, %v995_v7  ;;  %v4807_v21 = vcombine.low %v988_v8, %v996_v9  ;;  %v4808_v22 = vcombine.high %v1004_v17, %v1012_v18  ;;  %v589_v7 = vld [vmem:[%s5524_s17 + $0x1a0] sm:$0xff]  ;;  %v590_v9 = vld [vmem:[%s5524_s17 + $0x1a8] sm:$0xff] }
 0x225   : > { %3975 = vmatprep.subr.bf16.mxu1 %v4794_v14  ;;  %v4744_v14 = vcombine.high %v1003_v45, %v1011_v16  ;;  %v597_v8 = vld [vmem:[%s5524_s17 + $0x1e0] sm:$0xff] }
 0x227   : > { %3849 = vmatpush1.bf16.msra.mxu0 %v4731_v26  ;;  %v1028_v26 = vld [vmem:[%s5524_s17 + $0xf58] sm:$0xff] }
 0x228   : > { %3977 = vmatpush1.bf16.msra.mxu1 %v4795_v27  ;;  %3851 = vmatprep.subr.bf16.mxu0 %v4732_v28  ;;  %v4745_v27 = vcombine.low %v1003_v45, %v1011_v16  ;;  %v4809_v28 = vcombine.low %v1004_v17, %v1012_v18  ;;  %v4810_v30 = vcombine.high %v1020_v25, %v1028_v26  ;;  %v605_v16 = vld [vmem:[%s5524_s17 + $0x220] sm:$0xff]  ;;  %v606_v18 = vld [vmem:[%s5524_s17 + $0x228] sm:$0xff] }
 0x229   : > { %3979 = vmatprep.subr.bf16.mxu1 %v4796_v29  ;;  %v4746_v29 = vcombine.high %v1019_v23, %v1027_v24  ;;  %v613_v17 = vld [vmem:[%s5524_s17 + $0x260] sm:$0xff] }
 0x22b   : > { %3853 = vmatpush1.bf16.msra.mxu0 %v4733_v34  ;;  %v1044_v34 = vld [vmem:[%s5524_s17 + $0xfd8] sm:$0xff] }
 0x22c   : > { %3981 = vmatpush1.bf16.msra.mxu1 %v4797_v35  ;;  %3855 = vmatprep.subr.bf16.mxu0 %v4734_v36  ;;  %v4747_v35 = vcombine.low %v1019_v23, %v1027_v24  ;;  %v4811_v36 = vcombine.low %v1020_v25, %v1028_v26  ;;  %v4812_v38 = vcombine.high %v1036_v33, %v1044_v34  ;;  %v621_v24 = vld [vmem:[%s5524_s17 + $0x2a0] sm:$0xff]  ;;  %v622_v26 = vld [vmem:[%s5524_s17 + $0x2a8] sm:$0xff] }
 0x22d   : > { %3983 = vmatprep.subr.bf16.mxu1 %v4798_v37  ;;  %v4748_v37 = vcombine.high %v1035_v31, %v1043_v32  ;;  %v629_v25 = vld [vmem:[%s5524_s17 + $0x2e0] sm:$0xff] }
 0x22f   : > { %3857 = vmatpush1.bf16.msra.mxu0 %v4735_v42  ;;  %v550_v42 = vld [vmem:[%s5524_s17 + $0x68] sm:$0xff] }
 0x230   : > { %3985 = vmatpush1.bf16.msra.mxu1 %v4799_v47  ;;  %3859 = vmatprep.subr.bf16.mxu0 %v4736_v48  ;;  %v4749_v47 = vcombine.low %v1035_v31, %v1043_v32  ;;  %v4813_v48 = vcombine.low %v1036_v33, %v1044_v34  ;;  %v4878_v50 = vcombine.high %v542_v41, %v550_v42  ;;  %v637_v32 = vld [vmem:[%s5524_s17 + $0x320] sm:$0xff]  ;;  %v638_v34 = vld [vmem:[%s5524_s17 + $0x328] sm:$0xff] }
 0x231   : > { %3987 = vmatprep.subr.bf16.mxu1 %v4800_v49  ;;  %v4814_v49 = vcombine.high %v541_v39, %v549_v40  ;;  %v645_v33 = vld [vmem:[%s5524_s17 + $0x360] sm:$0xff] }
 0x232   : > { %v653_v40 = vld [vmem:[%s5524_s17 + $0x3a0] sm:$0xff] }
 0x233   : > { %3861 = vmatpush1.bf16.msra.mxu0 %v4737_v54  ;;  %v558_v54 = vld [vmem:[%s5524_s17 + $0xa8] sm:$0xff] }
 0x234   : > { %3989 = vmatpush1.bf16.msra.mxu1 %v4801_v57  ;;  %3863 = vmatprep.subr.bf16.mxu0 %v4738_v58  ;;  %v566_v57 = vld [vmem:[%s5524_s17 + $0xe8] sm:$0xff]  ;;  %v4879_v58 = vcombine.low %v542_v41, %v550_v42  ;;  %v661_v41 = vld [vmem:[%s5524_s17 + $0x3e0] sm:$0xff] }
 0x235   : > { %3991 = vmatprep.subr.bf16.mxu1 %v4802_v60  ;;  %v4816_v60 = vcombine.high %v557_v51, %v565_v52  ;;  %v4880_v0 = vcombine.high %v558_v54, %v566_v57  ;;  %v654_v42 = vld [vmem:[%s5524_s17 + $0x3a8] sm:$0xff] }
 0x237   : > { %3865 = vmatpush1.bf16.msra.mxu0 %v4739_v2  ;;  %v582_v2 = vld [vmem:[%s5524_s17 + $0x168] sm:$0xff] }
 0x238   : > { %3993 = vmatpush1.bf16.msra.mxu1 %v4803_v3  ;;  %3867 = vmatprep.subr.bf16.mxu0 %v4740_v4  ;;  %v4817_v3 = vcombine.low %v557_v51, %v565_v52  ;;  %v4881_v4 = vcombine.low %v558_v54, %v566_v57  ;;  %v4882_v6 = vcombine.high %v574_v1, %v582_v2  ;;  %v669_v52 = vld [vmem:[%s5524_s17 + $0x420] sm:$0xff]  ;;  %v670_v54 = vld [vmem:[%s5524_s17 + $0x428] sm:$0xff] }
 0x239   : > { %3995 = vmatprep.subr.bf16.mxu1 %v4804_v5  ;;  %v4818_v5 = vcombine.high %v573_v61, %v581_v62  ;;  %v678_v57 = vld [vmem:[%s5524_s17 + $0x468] sm:$0xff] }
 0x23b   : > { %3869 = vmatpush1.bf16.msra.mxu0 %v4741_v10  ;;  %v598_v10 = vld [vmem:[%s5524_s17 + $0x1e8] sm:$0xff] }
 0x23c   : > { %3997 = vmatpush1.bf16.msra.mxu1 %v4805_v12  ;;  %3871 = vmatprep.subr.bf16.mxu0 %v4742_v13  ;;  %v4819_v12 = vcombine.low %v573_v61, %v581_v62  ;;  %v4883_v13 = vcombine.low %v574_v1, %v582_v2  ;;  %v4884_v45 = vcombine.high %v590_v9, %v598_v10  ;;  %v693_v1 = vld [vmem:[%s5524_s17 + $0x4e0] sm:$0xff]  ;;  %v686_v2 = vld [vmem:[%s5524_s17 + $0x4a8] sm:$0xff] }
 0x23d   : > { %3999 = vmatprep.subr.bf16.mxu1 %v4806_v15  ;;  %v4820_v15 = vcombine.high %v589_v7, %v597_v8  ;;  %v4894_v62 = vcombine.high %v670_v54, %v678_v57 }
 0x23f   : > { %3873 = vmatpush1.bf16.msra.mxu0 %v4743_v20  ;;  %v614_v20 = vld [vmem:[%s5524_s17 + $0x268] sm:$0xff] }
 0x240   : > { %4001 = vmatpush1.bf16.msra.mxu1 %v4807_v21  ;;  %3875 = vmatprep.subr.bf16.mxu0 %v4744_v14  ;;  %v4821_v21 = vcombine.low %v589_v7, %v597_v8  ;;  %v4885_v14 = vcombine.low %v590_v9, %v598_v10  ;;  %v4886_v23 = vcombine.high %v606_v18, %v614_v20  ;;  %v701_v8 = vld [vmem:[%s5524_s17 + $0x520] sm:$0xff]  ;;  %v702_v10 = vld [vmem:[%s5524_s17 + $0x528] sm:$0xff] }
 0x241   : > { %4003 = vmatprep.subr.bf16.mxu1 %v4808_v22  ;;  %v4822_v22 = vcombine.high %v605_v16, %v613_v17  ;;  %v709_v9 = vld [vmem:[%s5524_s17 + $0x560] sm:$0xff] }
 0x243   : > { %3877 = vmatpush1.bf16.msra.mxu0 %v4745_v27  ;;  %v630_v27 = vld [vmem:[%s5524_s17 + $0x2e8] sm:$0xff] }
 0x244   : > { %4005 = vmatpush1.bf16.msra.mxu1 %v4809_v28  ;;  %3879 = vmatprep.subr.bf16.mxu0 %v4746_v29  ;;  %v4823_v28 = vcombine.low %v605_v16, %v613_v17  ;;  %v4887_v29 = vcombine.low %v606_v18, %v614_v20  ;;  %v4888_v31 = vcombine.high %v622_v26, %v630_v27  ;;  %v717_v17 = vld [vmem:[%s5524_s17 + $0x5a0] sm:$0xff]  ;;  %v718_v20 = vld [vmem:[%s5524_s17 + $0x5a8] sm:$0xff] }
 0x245   : > { %4007 = vmatprep.subr.bf16.mxu1 %v4810_v30  ;;  %v4824_v30 = vcombine.high %v621_v24, %v629_v25  ;;  %v725_v18 = vld [vmem:[%s5524_s17 + $0x5e0] sm:$0xff] }
 0x247   : > { %3881 = vmatpush1.bf16.msra.mxu0 %v4747_v35  ;;  %v646_v35 = vld [vmem:[%s5524_s17 + $0x368] sm:$0xff] }
 0x248   : > { %4009 = vmatpush1.bf16.msra.mxu1 %v4811_v36  ;;  %3883 = vmatprep.subr.bf16.mxu0 %v4748_v37  ;;  %v4825_v36 = vcombine.low %v621_v24, %v629_v25  ;;  %v4889_v37 = vcombine.low %v622_v26, %v630_v27  ;;  %v4890_v39 = vcombine.high %v638_v34, %v646_v35  ;;  %v733_v25 = vld [vmem:[%s5524_s17 + $0x620] sm:$0xff]  ;;  %v734_v27 = vld [vmem:[%s5524_s17 + $0x628] sm:$0xff] }
 0x249   : > { %4011 = vmatprep.subr.bf16.mxu1 %v4812_v38  ;;  %v4826_v38 = vcombine.high %v637_v32, %v645_v33  ;;  %v741_v26 = vld [vmem:[%s5524_s17 + $0x660] sm:$0xff] }
 0x24b   : > { %3885 = vmatpush1.bf16.msra.mxu0 %v4749_v47  ;;  %v662_v47 = vld [vmem:[%s5524_s17 + $0x3e8] sm:$0xff] }
 0x24c   : > { %4013 = vmatpush1.bf16.msra.mxu1 %v4813_v48  ;;  %4015 = vmatprep.subr.bf16.mxu0 %v4814_v49  ;;  %v4827_v48 = vcombine.low %v637_v32, %v645_v33  ;;  %v4891_v49 = vcombine.low %v638_v34, %v646_v35  ;;  %v4892_v51 = vcombine.high %v654_v42, %v662_v47  ;;  %v749_v33 = vld [vmem:[%s5524_s17 + $0x6a0] sm:$0xff]  ;;  %v750_v35 = vld [vmem:[%s5524_s17 + $0x6a8] sm:$0xff] }
 0x24d   : > { %4143 = vmatprep.subr.bf16.mxu1 %v4878_v50  ;;  %v4828_v50 = vcombine.high %v653_v40, %v661_v41  ;;  %v757_v34 = vld [vmem:[%s5524_s17 + $0x6e0] sm:$0xff] }
 0x24e   : > { %2577 = vmatmul.mubr.f32.vlgmr.msra.gmra.mrb[4].mxu0 %v5705_v11 }
 0x24f   : > { %2719 = vmatmul.mubr.f32.vlgmr.msra.gmra.mrb[4].mxu1 %v5705_v11  ;;  %4017 = vmatpush1.bf16.msra.mxu0 %v4815_v53  ;;  %v677_v53 = vld [vmem:[%s5524_s17 + $0x460] sm:$0xff] }
 0x250   : > { %2789 = vmatprep.mubr.f32.mxu0 %v5619_v55  ;;  %4145 = vmatpush1.bf16.msra.mxu1 %v4879_v58  ;;  %v4829_v58 = vcombine.low %v653_v40, %v661_v41  ;;  %v4830_v61 = vcombine.high %v669_v52, %v677_v53  ;;  %v765_v41 = vld [vmem:[%s5524_s17 + $0x720] sm:$0xff] }
 0x251   : > { %2931 = vmatprep.mubr.f32.mxu1 %v5619_v55  ;;  %4019 = vmatprep.subr.bf16.mxu0 %v4816_v60  ;;  %v4893_v60 = vcombine.low %v654_v42, %v662_v47  ;;  %v773_v42 = vld [vmem:[%s5524_s17 + $0x760] sm:$0xff]  ;;  %v766_v47 = vld [vmem:[%s5524_s17 + $0x728] sm:$0xff] }
 0x252   : > { %4147 = vmatprep.subr.bf16.mxu1 %v4880_v0  ;;  %v685_v0 = vld [vmem:[%s5524_s17 + $0x4a0] sm:$0xff] }
 0x253   : > { %4021 = vmatpush1.bf16.msra.mxu0 %v4817_v3  ;;  %v694_v3 = vld [vmem:[%s5524_s17 + $0x4e8] sm:$0xff] }
 0x254   : > { %4149 = vmatpush1.bf16.msra.mxu1 %v4881_v4  ;;  %4023 = vmatprep.subr.bf16.mxu0 %v4818_v5  ;;  %v4831_v4 = vcombine.low %v669_v52, %v677_v53  ;;  %v4895_v5 = vcombine.low %v670_v54, %v678_v57  ;;  %v4896_v7 = vcombine.high %v686_v2, %v694_v3  ;;  %v781_v53 = vld [vmem:[%s5524_s17 + $0x7a0] sm:$0xff]  ;;  %v782_v57 = vld [vmem:[%s5524_s17 + $0x7a8] sm:$0xff] }
 0x255   : > { %4151 = vmatprep.subr.bf16.mxu1 %v4882_v6  ;;  %v4832_v6 = vcombine.high %v685_v0, %v693_v1  ;;  %v789_v54 = vld [vmem:[%s5524_s17 + $0x7e0] sm:$0xff] }
 0x257   : > { %4025 = vmatpush1.bf16.msra.mxu0 %v4819_v12  ;;  %v710_v12 = vld [vmem:[%s5524_s17 + $0x568] sm:$0xff] }
 0x258   : > { %4153 = vmatpush1.bf16.msra.mxu1 %v4883_v13  ;;  %4027 = vmatprep.subr.bf16.mxu0 %v4820_v15  ;;  %v4833_v13 = vcombine.low %v685_v0, %v693_v1  ;;  %v4897_v15 = vcombine.low %v686_v2, %v694_v3  ;;  %v4898_v16 = vcombine.high %v702_v10, %v710_v12  ;;  %v797_v1 = vld [vmem:[%s5524_s17 + $0x820] sm:$0xff]  ;;  %v798_v3 = vld [vmem:[%s5524_s17 + $0x828] sm:$0xff] }
 0x259   : > { %4155 = vmatprep.subr.bf16.mxu1 %v4884_v45  ;;  %v4834_v45 = vcombine.high %v701_v8, %v709_v9  ;;  %v805_v2 = vld [vmem:[%s5524_s17 + $0x860] sm:$0xff] }
 0x25b   : > { %4029 = vmatpush1.bf16.msra.mxu0 %v4821_v21  ;;  %v726_v21 = vld [vmem:[%s5524_s17 + $0x5e8] sm:$0xff] }
 0x25c   : > { %4157 = vmatpush1.bf16.msra.mxu1 %v4885_v14  ;;  %4031 = vmatprep.subr.bf16.mxu0 %v4822_v22  ;;  %v4835_v14 = vcombine.low %v701_v8, %v709_v9  ;;  %v4899_v22 = vcombine.low %v702_v10, %v710_v12  ;;  %v4900_v24 = vcombine.high %v718_v20, %v726_v21  ;;  %v813_v9 = vld [vmem:[%s5524_s17 + $0x8a0] sm:$0xff] }
 0x25d   : > { %4159 = vmatprep.subr.bf16.mxu1 %v4886_v23  ;;  %v4836_v23 = vcombine.high %v717_v17, %v725_v18  ;;  %v821_v10 = vld [vmem:[%s5524_s17 + $0x8e0] sm:$0xff]  ;;  %v4847_v12 = vcombine.low %v797_v1, %v805_v2 }
 0x25f   : > { %4033 = vmatpush1.bf16.msra.mxu0 %v4823_v28  ;;  %v742_v28 = vld [vmem:[%s5524_s17 + $0x668] sm:$0xff] }
 0x260   : > { %4161 = vmatpush1.bf16.msra.mxu1 %v4887_v29  ;;  %4035 = vmatprep.subr.bf16.mxu0 %v4824_v30  ;;  %v4837_v29 = vcombine.low %v717_v17, %v725_v18  ;;  %v4901_v30 = vcombine.low %v718_v20, %v726_v21  ;;  %v4902_v32 = vcombine.high %v734_v27, %v742_v28  ;;  %v829_v17 = vld [vmem:[%s5524_s17 + $0x920] sm:$0xff]  ;;  %v830_v21 = vld [vmem:[%s5524_s17 + $0x928] sm:$0xff] }
 0x261   : > { %4163 = vmatprep.subr.bf16.mxu1 %v4888_v31  ;;  %v4838_v31 = vcombine.high %v733_v25, %v741_v26  ;;  %v837_v18 = vld [vmem:[%s5524_s17 + $0x960] sm:$0xff] }
 0x263   : > { %4037 = vmatpush1.bf16.msra.mxu0 %v4825_v36  ;;  %v758_v36 = vld [vmem:[%s5524_s17 + $0x6e8] sm:$0xff] }
 0x264   : > { %4165 = vmatpush1.bf16.msra.mxu1 %v4889_v37  ;;  %4039 = vmatprep.subr.bf16.mxu0 %v4826_v38  ;;  %v4839_v37 = vcombine.low %v733_v25, %v741_v26  ;;  %v4903_v38 = vcombine.low %v734_v27, %v742_v28  ;;  %v4904_v40 = vcombine.high %v750_v35, %v758_v36  ;;  %v845_v26 = vld [vmem:[%s5524_s17 + $0x9a0] sm:$0xff]  ;;  %v846_v28 = vld [vmem:[%s5524_s17 + $0x9a8] sm:$0xff] }
 0x265   : > { %4167 = vmatprep.subr.bf16.mxu1 %v4890_v39  ;;  %v4840_v39 = vcombine.high %v749_v33, %v757_v34  ;;  %v853_v27 = vld [vmem:[%s5524_s17 + $0x9e0] sm:$0xff] }
 0x267   : > { %4041 = vmatpush1.bf16.msra.mxu0 %v4827_v48  ;;  %v774_v48 = vld [vmem:[%s5524_s17 + $0x768] sm:$0xff] }
 0x268   : > { %4169 = vmatpush1.bf16.msra.mxu1 %v4891_v49  ;;  %4043 = vmatprep.subr.bf16.mxu0 %v4828_v50  ;;  %v4841_v49 = vcombine.low %v749_v33, %v757_v34  ;;  %v4905_v50 = vcombine.low %v750_v35, %v758_v36  ;;  %v4906_v52 = vcombine.high %v766_v47, %v774_v48  ;;  %v861_v34 = vld [vmem:[%s5524_s17 + $0xa20] sm:$0xff]  ;;  %v862_v36 = vld [vmem:[%s5524_s17 + $0xa28] sm:$0xff] }
 0x269   : > { %4171 = vmatprep.subr.bf16.mxu1 %v4892_v51  ;;  %v4842_v51 = vcombine.high %v765_v41, %v773_v42  ;;  %v869_v35 = vld [vmem:[%s5524_s17 + $0xa60] sm:$0xff] }
 0x26b   : > { %4045 = vmatpush1.bf16.msra.mxu0 %v4829_v58  ;;  %v790_v58 = vld [vmem:[%s5524_s17 + $0x7e8] sm:$0xff] }
 0x26c   : > { %4173 = vmatpush1.bf16.msra.mxu1 %v4893_v60  ;;  %4047 = vmatprep.subr.bf16.mxu0 %v4830_v61  ;;  %v4843_v60 = vcombine.low %v765_v41, %v773_v42  ;;  %v4907_v61 = vcombine.low %v766_v47, %v774_v48  ;;  %v4908_v0 = vcombine.high %v782_v57, %v790_v58  ;;  %v877_v42 = vld [vmem:[%s5524_s17 + $0xaa0] sm:$0xff]  ;;  %v878_v48 = vld [vmem:[%s5524_s17 + $0xaa8] sm:$0xff] }
 0x26d   : > { %4175 = vmatprep.subr.bf16.mxu1 %v4894_v62  ;;  %v4844_v62 = vcombine.high %v781_v53, %v789_v54  ;;  %v885_v47 = vld [vmem:[%s5524_s17 + $0xae0] sm:$0xff] }
 0x26f   : > { %4049 = vmatpush1.bf16.msra.mxu0 %v4831_v4  ;;  %v806_v4 = vld [vmem:[%s5524_s17 + $0x868] sm:$0xff] }
 0x270   : > { %4177 = vmatpush1.bf16.msra.mxu1 %v4895_v5  ;;  %4051 = vmatprep.subr.bf16.mxu0 %v4832_v6  ;;  %v4845_v5 = vcombine.low %v781_v53, %v789_v54  ;;  %v4909_v6 = vcombine.low %v782_v57, %v790_v58  ;;  %v4910_v8 = vcombine.high %v798_v3, %v806_v4  ;;  %v893_v57 = vld [vmem:[%s5524_s17 + $0xb20] sm:$0xff] }
 0x271   : > { %4179 = vmatprep.subr.bf16.mxu1 %v4896_v7  ;;  %v4846_v7 = vcombine.high %v797_v1, %v805_v2  ;;  %v4856_v53 = vcombine.high %v877_v42, %v885_v47  ;;  %v901_v58 = vld [vmem:[%s5524_s17 + $0xb60] sm:$0xff] }
 0x273   : > { %4053 = vmatpush1.bf16.msra.mxu0 %v4833_v13  ;;  %v814_v13 = vld [vmem:[%s5524_s17 + $0x8a8] sm:$0xff] }
 0x274   : > { %4181 = vmatpush1.bf16.msra.mxu1 %v4897_v15  ;;  %4055 = vmatprep.subr.bf16.mxu0 %v4834_v45  ;;  %v822_v15 = vld [vmem:[%s5524_s17 + $0x8e8] sm:$0xff]  ;;  %v4911_v45 = vcombine.low %v798_v3, %v806_v4  ;;  %v4857_v3 = vcombine.low %v877_v42, %v885_v47 }
 0x275   : > { %4183 = vmatprep.subr.bf16.mxu1 %v4898_v16  ;;  %v4848_v16 = vcombine.high %v813_v9, %v821_v10  ;;  %v4912_v20 = vcombine.high %v814_v13, %v822_v15  ;;  %v958_v42 = vld [vmem:[%s5524_s17 + $0xd28] sm:$0xff] }
 0x276   : > { %v966_v47 = vld [vmem:[%s5524_s17 + $0xd68] sm:$0xff] }
 0x277   : > { %4057 = vmatpush1.bf16.msra.mxu0 %v4835_v14  ;;  %v838_v14 = vld [vmem:[%s5524_s17 + $0x968] sm:$0xff] }
 0x278   : > { %4185 = vmatpush1.bf16.msra.mxu1 %v4899_v22  ;;  %4059 = vmatprep.subr.bf16.mxu0 %v4836_v23  ;;  %v4849_v22 = vcombine.low %v813_v9, %v821_v10  ;;  %v4913_v23 = vcombine.low %v814_v13, %v822_v15  ;;  %v4914_v25 = vcombine.high %v830_v21, %v838_v14  ;;  %v909_v9 = vld [vmem:[%s5524_s17 + $0xba0] sm:$0xff] }
 0x279   : > { %4187 = vmatprep.subr.bf16.mxu1 %v4900_v24  ;;  %v4850_v24 = vcombine.high %v829_v17, %v837_v18  ;;  %v917_v10 = vld [vmem:[%s5524_s17 + $0xbe0] sm:$0xff] }
 0x27b   : > { %4061 = vmatpush1.bf16.msra.mxu0 %v4837_v29  ;;  %v854_v29 = vld [vmem:[%s5524_s17 + $0x9e8] sm:$0xff] }
 0x27c   : > { %4189 = vmatpush1.bf16.msra.mxu1 %v4901_v30  ;;  %4063 = vmatprep.subr.bf16.mxu0 %v4838_v31  ;;  %v4851_v30 = vcombine.low %v829_v17, %v837_v18  ;;  %v4915_v31 = vcombine.low %v830_v21, %v838_v14  ;;  %v4916_v33 = vcombine.high %v846_v28, %v854_v29  ;;  %v918_v17 = vld [vmem:[%s5524_s17 + $0xbe8] sm:$0xff] }
 0x27d   : > { %4191 = vmatprep.subr.bf16.mxu1 %v4902_v32  ;;  %v4852_v32 = vcombine.high %v845_v26, %v853_v27  ;;  %v4859_v21 = vcombine.low %v893_v57, %v901_v58 }
 0x27f   : > { %4065 = vmatpush1.bf16.msra.mxu0 %v4839_v37  ;;  %v870_v37 = vld [vmem:[%s5524_s17 + $0xa68] sm:$0xff] }
 0x280   : > { %4193 = vmatpush1.bf16.msra.mxu1 %v4903_v38  ;;  %4067 = vmatprep.subr.bf16.mxu0 %v4840_v39  ;;  %v4853_v38 = vcombine.low %v845_v26, %v853_v27  ;;  %v4917_v39 = vcombine.low %v846_v28, %v854_v29  ;;  %v4918_v41 = vcombine.high %v862_v36, %v870_v37  ;;  %v926_v26 = vld [vmem:[%s5524_s17 + $0xc28] sm:$0xff] }
 0x281   : > { %4195 = vmatprep.subr.bf16.mxu1 %v4904_v40  ;;  %v4854_v40 = vcombine.high %v861_v34, %v869_v35  ;;  %v934_v27 = vld [vmem:[%s5524_s17 + $0xc68] sm:$0xff]  ;;  %v4861_v28 = vcombine.low %v909_v9, %v917_v10 }
 0x283   : > { %4069 = vmatpush1.bf16.msra.mxu0 %v4841_v49  ;;  %v886_v49 = vld [vmem:[%s5524_s17 + $0xae8] sm:$0xff] }
 0x284   : > { %4197 = vmatpush1.bf16.msra.mxu1 %v4905_v50  ;;  %4071 = vmatprep.subr.bf16.mxu0 %v4842_v51  ;;  %v4855_v50 = vcombine.low %v861_v34, %v869_v35  ;;  %v5944_v51 = vld [vmem:[%s268_s22] sm:$0xff]  ;;  %v4920_v54 = vcombine.high %v878_v48, %v886_v49  ;;  %v4921_v4 = vcombine.low %v878_v48, %v886_v49  ;;  %v942_v34 = vld [vmem:[%s5524_s17 + $0xca8] sm:$0xff] }
 0x285   : > { %4199 = vmatprep.subr.bf16.mxu1 %v4906_v52  ;;  %v4919_v52 = vcombine.low %v862_v36, %v870_v37  ;;  %v2084_v1 = vrot.slane %v5944_v51, %v5604_v44  ;;  %v2092_v2 = vrot.slane %v5944_v51, %v5632_v63  ;;  %v950_v35 = vld [vmem:[%s5524_s17 + $0xce8] sm:$0xff]  ;;  %v4927_v37 = vcombine.low %v926_v26, %v934_v27 }
 0x286   : > { %v4929_v49 = vcombine.low %v942_v34, %v950_v35 }
 0x287   : > { %4073 = vmatpush1.bf16.msra.mxu0 %v4843_v60  ;;  %v2080_v60 = vrot.slane %v5944_v51, %v5609_v46 }
 0x288   : > { %4201 = vmatpush1.bf16.msra.mxu1 %v4907_v61  ;;  %4075 = vmatprep.subr.bf16.mxu0 %v4844_v62  ;;  %v2088_v61 = vrot.slane %v5944_v51, %v5695_v59  ;;  %v894_v62 = vld [vmem:[%s5524_s17 + $0xb28] sm:$0xff] }
 0x289   : > { %4203 = vmatprep.subr.bf16.mxu1 %v4908_v0  ;;  %v902_v0 = vld [vmem:[%s5524_s17 + $0xb68] sm:$0xff] }
 0x28a   : > { %v4923_v14 = vcombine.low %v894_v62, %v902_v0 }
 0x28b   : > { %4077 = vmatpush1.bf16.msra.mxu0 %v4845_v5  ;;  %v4858_v5 = vcombine.high %v893_v57, %v901_v58  ;;  %v974_v57 = vld [vmem:[%s5524_s17 + $0xda8] sm:$0xff] }
 0x28c   : > { %4205 = vmatpush1.bf16.msra.mxu1 %v4909_v6  ;;  %4079 = vmatprep.subr.bf16.mxu0 %v4846_v7  ;;  %v982_v58 = vld [vmem:[%s5524_s17 + $0xde8] sm:$0xff] }
 0x28d   : > { %4207 = vmatprep.subr.bf16.mxu1 %v4910_v8  ;;  %v4922_v8 = vcombine.high %v894_v62, %v902_v0  ;;  %v4932_v0 = vcombine.high %v974_v57, %v982_v58 }
 0x28e   : > { %2790 = vmatmul.mubr.f32.vlgmr.msra.gmra.mrb[6].mxu0 %v5621_v56 }
 0x28f   : > { %2932 = vmatmul.mubr.f32.vlgmr.msra.gmra.mrb[6].mxu1 %v5621_v56  ;;  %4081 = vmatpush1.bf16.msra.mxu0 %v4847_v12 }
 0x290   : > { %2860 = vmatprep.mubr.f32.mxu0 %v5646_v19  ;;  %4209 = vmatpush1.bf16.msra.mxu1 %v4911_v45 }
 0x291   : > { %3002 = vmatprep.mubr.f32.mxu1 %v5646_v19  ;;  %4083 = vmatprep.subr.bf16.mxu0 %v4848_v16  ;;  %v910_v16 = vld [vmem:[%s5524_s17 + $0xba8] sm:$0xff] }
 0x292   : > { %4211 = vmatprep.subr.bf16.mxu1 %v4912_v20  ;;  %v4925_v29 = vcombine.low %v910_v16, %v918_v17 }
 0x293   : > { %4085 = vmatpush1.bf16.msra.mxu0 %v4849_v22  ;;  %v4860_v22 = vcombine.high %v909_v9, %v917_v10  ;;  %v1005_v9 = vld [vmem:[%s5524_s17 + $0xea0] sm:$0xff] }
 0x294   : > { %4213 = vmatpush1.bf16.msra.mxu1 %v4913_v23  ;;  %4087 = vmatprep.subr.bf16.mxu0 %v4850_v24  ;;  %v4924_v23 = vcombine.high %v910_v16, %v918_v17  ;;  %v925_v24 = vld [vmem:[%s5524_s17 + $0xc20] sm:$0xff] }
 0x295   : > { %4215 = vmatprep.subr.bf16.mxu1 %v4914_v25  ;;  %v933_v25 = vld [vmem:[%s5524_s17 + $0xc60] sm:$0xff] }
 0x296   : > { %v4863_v36 = vcombine.low %v925_v24, %v933_v25  ;;  %v1013_v10 = vld [vmem:[%s5524_s17 + $0xee0] sm:$0xff] }
 0x297   : > { %4089 = vmatpush1.bf16.msra.mxu0 %v4851_v30  ;;  %v4862_v30 = vcombine.high %v925_v24, %v933_v25  ;;  %v4872_v16 = vcombine.high %v1005_v9, %v1013_v10 }
 0x298   : > { %4217 = vmatpush1.bf16.msra.mxu1 %v4915_v31  ;;  %4091 = vmatprep.subr.bf16.mxu0 %v4852_v32  ;;  %v4926_v31 = vcombine.high %v926_v26, %v934_v27  ;;  %v941_v32 = vld [vmem:[%s5524_s17 + $0xca0] sm:$0xff] }
 0x299   : > { %4219 = vmatprep.subr.bf16.mxu1 %v4916_v33  ;;  %v949_v33 = vld [vmem:[%s5524_s17 + $0xce0] sm:$0xff] }
 0x29a   : > { %v4865_v48 = vcombine.low %v941_v32, %v949_v33  ;;  %v1037_v26 = vld [vmem:[%s5524_s17 + $0xfa0] sm:$0xff] }
 0x29b   : > { %4093 = vmatpush1.bf16.msra.mxu0 %v4853_v38  ;;  %v4864_v38 = vcombine.high %v941_v32, %v949_v33  ;;  %v1045_v27 = vld [vmem:[%s5524_s17 + $0xfe0] sm:$0xff] }
 0x29c   : > { %4221 = vmatpush1.bf16.msra.mxu1 %v4917_v39  ;;  %4095 = vmatprep.subr.bf16.mxu0 %v4854_v40  ;;  %v4928_v39 = vcombine.high %v942_v34, %v950_v35  ;;  %v957_v40 = vld [vmem:[%s5524_s17 + $0xd20] sm:$0xff]  ;;  %v4876_v32 = vcombine.high %v1037_v26, %v1045_v27  ;;  %v543_v34 = vld [vmem:[%s5524_s17 + $0x30] sm:$0xff] }
 0x29d   : > { %4223 = vmatprep.subr.bf16.mxu1 %v4918_v41  ;;  %v965_v41 = vld [vmem:[%s5524_s17 + $0xd60] sm:$0xff]  ;;  %v551_v35 = vld [vmem:[%s5524_s17 + $0x70] sm:$0xff] }
 0x29f   : > { %4097 = vmatpush1.bf16.msra.mxu0 %v4855_v50  ;;  %v4866_v50 = vcombine.high %v957_v40, %v965_v41 }
 0x2a0   : > { %4225 = vmatpush1.bf16.msra.mxu1 %v4919_v52  ;;  %4099 = vmatprep.subr.bf16.mxu0 %v4856_v53  ;;  %v4930_v52 = vcombine.high %v958_v42, %v966_v47  ;;  %v973_v53 = vld [vmem:[%s5524_s17 + $0xda0] sm:$0xff] }
 0x2a1   : > { %v2294_v6 = vpop.f32.mrb[2].mxu0  ;;  %v2436_v7 = vpop.f32.mrb[2].mxu1  ;;  %4227 = vmatprep.subr.bf16.mxu1 %v4920_v54  ;;  %v981_v54 = vld [vmem:[%s5524_s17 + $0xde0] sm:$0xff] }
 0x2a2   : > { %v4526_v12 = vadd.f32 %v2294_v6, %v2080_v60  ;;  %v4528_v13 = vadd.f32 %v2436_v7, %v2088_v61  ;;  %v2296_v15 = vpop.f32.mrb[3].mxu0  ;;  %v2438_v45 = vpop.f32.mrb[3].mxu1  ;;  %v4867_v60 = vcombine.low %v957_v40, %v965_v41  ;;  %v4931_v61 = vcombine.low %v958_v42, %v966_v47  ;;  %v559_v42 = vld [vmem:[%s5524_s17 + $0xb0] sm:$0xff] }
 0x2a3   : > { %v4527_v18 = vadd.f32 %v2296_v15, %v2084_v1  ;;  %v4529_v20 = vadd.f32 %v2438_v45, %v2092_v2  ;;  %4101 = vmatpush1.bf16.msra.mxu0 %v4857_v3  ;;  %v4868_v62 = vcombine.high %v973_v53, %v981_v54  ;;  %v989_v1 = vld [vmem:[%s5524_s17 + $0xe20] sm:$0xff]  ;;  %v990_v3 = vld [vmem:[%s5524_s17 + $0xe28] sm:$0xff]  ;;  %v4933_v6 = vcombine.low %v974_v57, %v982_v58  ;;  %v567_v47 = vld [vmem:[%s5524_s17 + $0xf0] sm:$0xff] }
 0x2a4   : > { %3293 = vst [vmem:[%s5962_s12] sm:$0xff] %v4526_v12  ;;  %3295 = vst [vmem:[%s5962_s12 + $0x10] sm:$0xff] %v4528_v13  ;;  %4229 = vmatpush1.bf16.msra.mxu1 %v4921_v4  ;;  %4103 = vmatprep.subr.bf16.mxu0 %v4858_v5  ;;  %v997_v2 = vld [vmem:[%s5524_s17 + $0xe60] sm:$0xff]  ;;  %v998_v4 = vld [vmem:[%s5524_s17 + $0xe68] sm:$0xff]  ;;  %v4869_v5 = vcombine.low %v973_v53, %v981_v54  ;;  %v4942_v40 = vcombine.high %v543_v34, %v551_v35 }
 0x2a5   : > { %3294 = vst [vmem:[%s5962_s12 + $0x8] sm:$0xff] %v4527_v18  ;;  %3296 = vst [vmem:[%s5962_s12 + $0x18] sm:$0xff] %v4529_v20  ;;  %4231 = vmatprep.subr.bf16.mxu1 %v4922_v8  ;;  %v4870_v7 = vcombine.high %v989_v1, %v997_v2  ;;  %v4934_v8 = vcombine.high %v990_v3, %v998_v4  ;;  %v1006_v12 = vld [vmem:[%s5524_s17 + $0xea8] sm:$0xff]  ;;  %v4871_v15 = vcombine.low %v989_v1, %v997_v2  ;;  %v1021_v18 = vld [vmem:[%s5524_s17 + $0xf20] sm:$0xff] }
 0x2a6   : > { %v1014_v13 = vld [vmem:[%s5524_s17 + $0xee8] sm:$0xff]  ;;  %v4935_v45 = vcombine.low %v990_v3, %v998_v4  ;;  %v1029_v20 = vld [vmem:[%s5524_s17 + $0xf60] sm:$0xff]  ;;  %v4944_v53 = vcombine.high %v559_v42, %v567_v47  ;;  %v575_v54 = vld [vmem:[%s5524_s17 + $0x130] sm:$0xff] }
 0x2a7   : > { %4105 = vmatpush1.bf16.msra.mxu0 %v4859_v21  ;;  %v4936_v17 = vcombine.high %v1006_v12, %v1014_v13  ;;  %v1022_v21 = vld [vmem:[%s5524_s17 + $0xf28] sm:$0xff]  ;;  %v4874_v24 = vcombine.high %v1021_v18, %v1029_v20  ;;  %v583_v57 = vld [vmem:[%s5524_s17 + $0x170] sm:$0xff] }
 0x2a8   : > { %4233 = vmatpush1.bf16.msra.mxu1 %v4923_v14  ;;  %4107 = vmatprep.subr.bf16.mxu0 %v4860_v22  ;;  %v1030_v14 = vld [vmem:[%s5524_s17 + $0xf68] sm:$0xff]  ;;  %v4873_v22 = vcombine.low %v1005_v9, %v1013_v10  ;;  %v4946_v1 = vcombine.high %v575_v54, %v583_v57  ;;  %v591_v3 = vld [vmem:[%s5524_s17 + $0x1b0] sm:$0xff] }
 0x2a9   : > { %4235 = vmatprep.subr.bf16.mxu1 %v4924_v23  ;;  %v4937_v23 = vcombine.low %v1006_v12, %v1014_v13  ;;  %v4938_v25 = vcombine.high %v1022_v21, %v1030_v14  ;;  %v599_v4 = vld [vmem:[%s5524_s17 + $0x1f0] sm:$0xff]  ;;  %v608_v13 = vld [vmem:[%s5524_s17 + $0x238] sm:$0xff] }
 0x2aa   : > { %v4948_v9 = vcombine.high %v591_v3, %v599_v4  ;;  %v607_v10 = vld [vmem:[%s5524_s17 + $0x230] sm:$0xff] }
 0x2ab   : > { %4109 = vmatpush1.bf16.msra.mxu0 %v4861_v28  ;;  %v1038_v28 = vld [vmem:[%s5524_s17 + $0xfa8] sm:$0xff]  ;;  %v615_v12 = vld [vmem:[%s5524_s17 + $0x270] sm:$0xff] }
 0x2ac   : > { %4237 = vmatpush1.bf16.msra.mxu1 %v4925_v29  ;;  %4111 = vmatprep.subr.bf16.mxu0 %v4862_v30  ;;  %v1046_v29 = vld [vmem:[%s5524_s17 + $0xfe8] sm:$0xff]  ;;  %v4875_v30 = vcombine.low %v1021_v18, %v1029_v20  ;;  %v623_v20 = vld [vmem:[%s5524_s17 + $0x2b0] sm:$0xff] }
 0x2ad   : > { %4239 = vmatprep.subr.bf16.mxu1 %v4926_v31  ;;  %v4939_v31 = vcombine.low %v1022_v21, %v1030_v14  ;;  %v4940_v33 = vcombine.high %v1038_v28, %v1046_v29  ;;  %v631_v21 = vld [vmem:[%s5524_s17 + $0x2f0] sm:$0xff]  ;;  %v624_v14 = vld [vmem:[%s5524_s17 + $0x2b8] sm:$0xff] }
 0x2af   : > { %4113 = vmatpush1.bf16.msra.mxu0 %v4863_v36  ;;  %v544_v36 = vld [vmem:[%s5524_s17 + $0x38] sm:$0xff] }
 0x2b0   : > { %4241 = vmatpush1.bf16.msra.mxu1 %v4927_v37  ;;  %4115 = vmatprep.subr.bf16.mxu0 %v4864_v38  ;;  %v552_v37 = vld [vmem:[%s5524_s17 + $0x78] sm:$0xff]  ;;  %v4877_v38 = vcombine.low %v1037_v26, %v1045_v27  ;;  %v639_v27 = vld [vmem:[%s5524_s17 + $0x330] sm:$0xff] }
 0x2b1   : > { %4243 = vmatprep.subr.bf16.mxu1 %v4928_v39  ;;  %v4941_v39 = vcombine.low %v1038_v28, %v1046_v29  ;;  %v5006_v41 = vcombine.high %v544_v36, %v552_v37  ;;  %v647_v28 = vld [vmem:[%s5524_s17 + $0x370] sm:$0xff]  ;;  %v640_v29 = vld [vmem:[%s5524_s17 + $0x338] sm:$0xff] }
 0x2b3   : > { %4117 = vmatpush1.bf16.msra.mxu0 %v4865_v48  ;;  %v4943_v48 = vcombine.low %v543_v34, %v551_v35  ;;  %v655_v35 = vld [vmem:[%s5524_s17 + $0x3b0] sm:$0xff] }
 0x2b4   : > { %4245 = vmatpush1.bf16.msra.mxu1 %v4929_v49  ;;  %4119 = vmatprep.subr.bf16.mxu0 %v4866_v50  ;;  %v560_v49 = vld [vmem:[%s5524_s17 + $0xb8] sm:$0xff] }
 0x2b5   : > { %4247 = vmatprep.subr.bf16.mxu1 %v4930_v52  ;;  %v568_v50 = vld [vmem:[%s5524_s17 + $0xf8] sm:$0xff]  ;;  %v5007_v52 = vcombine.low %v544_v36, %v552_v37  ;;  %v663_v36 = vld [vmem:[%s5524_s17 + $0x3f0] sm:$0xff] }
 0x2b6   : > { %v5008_v58 = vcombine.high %v560_v49, %v568_v50  ;;  %v656_v37 = vld [vmem:[%s5524_s17 + $0x3b8] sm:$0xff] }
 0x2b7   : > { %4121 = vmatpush1.bf16.msra.mxu0 %v4867_v60  ;;  %v576_v60 = vld [vmem:[%s5524_s17 + $0x138] sm:$0xff] }
 0x2b8   : > { %4249 = vmatpush1.bf16.msra.mxu1 %v4931_v61  ;;  %4123 = vmatprep.subr.bf16.mxu0 %v4868_v62  ;;  %v584_v61 = vld [vmem:[%s5524_s17 + $0x178] sm:$0xff]  ;;  %v4945_v62 = vcombine.low %v559_v42, %v567_v47  ;;  %v671_v47 = vld [vmem:[%s5524_s17 + $0x430] sm:$0xff] }
 0x2b9   : > { %4251 = vmatprep.subr.bf16.mxu1 %v4932_v0  ;;  %v5009_v0 = vcombine.low %v560_v49, %v568_v50  ;;  %v5010_v2 = vcombine.high %v576_v60, %v584_v61  ;;  %v672_v49 = vld [vmem:[%s5524_s17 + $0x438] sm:$0xff] }
 0x2ba   : > { %v680_v50 = vld [vmem:[%s5524_s17 + $0x478] sm:$0xff] }
 0x2bb   : > { %4125 = vmatpush1.bf16.msra.mxu0 %v4869_v5  ;;  %v592_v5 = vld [vmem:[%s5524_s17 + $0x1b8] sm:$0xff] }
 0x2bc   : > { %4253 = vmatpush1.bf16.msra.mxu1 %v4933_v6  ;;  %4127 = vmatprep.subr.bf16.mxu0 %v4870_v7  ;;  %v600_v6 = vld [vmem:[%s5524_s17 + $0x1f8] sm:$0xff]  ;;  %v4947_v7 = vcombine.low %v575_v54, %v583_v57  ;;  %v5022_v57 = vcombine.high %v672_v49, %v680_v50 }
 0x2bd   : > { %4255 = vmatprep.subr.bf16.mxu1 %v4934_v8  ;;  %v5011_v8 = vcombine.low %v576_v60, %v584_v61  ;;  %v695_v60 = vld [vmem:[%s5524_s17 + $0x4f0] sm:$0xff]  ;;  %v688_v61 = vld [vmem:[%s5524_s17 + $0x4b8] sm:$0xff] }
 0x2bf   : > { %4129 = vmatpush1.bf16.msra.mxu0 %v4871_v15  ;;  %v616_v15 = vld [vmem:[%s5524_s17 + $0x278] sm:$0xff] }
 0x2c0   : > { %4257 = vmatpush1.bf16.msra.mxu1 %v4935_v45  ;;  %4131 = vmatprep.subr.bf16.mxu0 %v4872_v16  ;;  %v4949_v45 = vcombine.low %v591_v3, %v599_v4  ;;  %v5013_v16 = vcombine.low %v592_v5, %v600_v6  ;;  %v5014_v18 = vcombine.high %v608_v13, %v616_v15  ;;  %v703_v4 = vld [vmem:[%s5524_s17 + $0x530] sm:$0xff] }
 0x2c1   : > { %4259 = vmatprep.subr.bf16.mxu1 %v4936_v17  ;;  %v4950_v17 = vcombine.high %v607_v10, %v615_v12 }
 0x2c3   : > { %4133 = vmatpush1.bf16.msra.mxu0 %v4873_v22  ;;  %v632_v22 = vld [vmem:[%s5524_s17 + $0x2f8] sm:$0xff] }
 0x2c4   : > { %4261 = vmatpush1.bf16.msra.mxu1 %v4937_v23  ;;  %4135 = vmatprep.subr.bf16.mxu0 %v4874_v24  ;;  %v4951_v23 = vcombine.low %v607_v10, %v615_v12  ;;  %v5015_v24 = vcombine.low %v608_v13, %v616_v15  ;;  %v5016_v26 = vcombine.high %v624_v14, %v632_v22  ;;  %v719_v12 = vld [vmem:[%s5524_s17 + $0x5b0] sm:$0xff]  ;;  %v720_v15 = vld [vmem:[%s5524_s17 + $0x5b8] sm:$0xff] }
 0x2c5   : > { %4263 = vmatprep.subr.bf16.mxu1 %v4938_v25  ;;  %v4952_v25 = vcombine.high %v623_v20, %v631_v21  ;;  %v727_v13 = vld [vmem:[%s5524_s17 + $0x5f0] sm:$0xff] }
 0x2c7   : > { %4137 = vmatpush1.bf16.msra.mxu0 %v4875_v30  ;;  %v648_v30 = vld [vmem:[%s5524_s17 + $0x378] sm:$0xff] }
 0x2c8   : > { %4265 = vmatpush1.bf16.msra.mxu1 %v4939_v31  ;;  %4139 = vmatprep.subr.bf16.mxu0 %v4876_v32  ;;  %v4953_v31 = vcombine.low %v623_v20, %v631_v21  ;;  %v5017_v32 = vcombine.low %v624_v14, %v632_v22  ;;  %v5018_v34 = vcombine.high %v640_v29, %v648_v30  ;;  %v735_v21 = vld [vmem:[%s5524_s17 + $0x630] sm:$0xff]  ;;  %v736_v22 = vld [vmem:[%s5524_s17 + $0x638] sm:$0xff] }
 0x2c9   : > { %4267 = vmatprep.subr.bf16.mxu1 %v4940_v33  ;;  %v4954_v33 = vcombine.high %v639_v27, %v647_v28  ;;  %v743_v14 = vld [vmem:[%s5524_s17 + $0x670] sm:$0xff] }
 0x2cb   : > { %4141 = vmatpush1.bf16.msra.mxu0 %v4877_v38  ;;  %v664_v38 = vld [vmem:[%s5524_s17 + $0x3f8] sm:$0xff] }
 0x2cc   : > { %4269 = vmatpush1.bf16.msra.mxu1 %v4941_v39  ;;  %4271 = vmatprep.subr.bf16.mxu0 %v4942_v40  ;;  %v4955_v39 = vcombine.low %v639_v27, %v647_v28  ;;  %v5019_v40 = vcombine.low %v640_v29, %v648_v30  ;;  %v5020_v42 = vcombine.high %v656_v37, %v664_v38  ;;  %v751_v28 = vld [vmem:[%s5524_s17 + $0x6b0] sm:$0xff]  ;;  %v752_v30 = vld [vmem:[%s5524_s17 + $0x6b8] sm:$0xff] }
 0x2cd   : > { %4399 = vmatprep.subr.bf16.mxu1 %v5006_v41  ;;  %v4956_v41 = vcombine.high %v655_v35, %v663_v36  ;;  %v759_v29 = vld [vmem:[%s5524_s17 + $0x6f0] sm:$0xff] }
 0x2ce   : > { %2861 = vmatmul.mubr.f32.vlgmr.msra.gmra.mrb[6].mxu0 %v5705_v11 }
 0x2cf   : > { %3003 = vmatmul.mubr.f32.vlgmr.msra.gmra.mrb[6].mxu1 %v5705_v11  ;;  %4273 = vmatpush1.bf16.msra.mxu0 %v4943_v48  ;;  %v679_v48 = vld [vmem:[%s5524_s17 + $0x470] sm:$0xff] }
 0x2d0   : > { %3073 = vmatprep.mubr.f32.mxu0 %v5619_v55  ;;  %4401 = vmatpush1.bf16.msra.mxu1 %v5007_v52  ;;  %v4957_v52 = vcombine.low %v655_v35, %v663_v36  ;;  %v4958_v54 = vcombine.high %v671_v47, %v679_v48  ;;  %v767_v36 = vld [vmem:[%s5524_s17 + $0x730] sm:$0xff] }
 0x2d1   : > { %3215 = vmatprep.mubr.f32.mxu1 %v5619_v55  ;;  %4275 = vmatprep.subr.bf16.mxu0 %v4944_v53  ;;  %v5012_v55 = vcombine.high %v592_v5, %v600_v6  ;;  %v5021_v53 = vcombine.low %v656_v37, %v664_v38  ;;  %v711_v5 = vld [vmem:[%s5524_s17 + $0x570] sm:$0xff]  ;;  %v704_v6 = vld [vmem:[%s5524_s17 + $0x538] sm:$0xff] }
 0x2d2   : > { %4403 = vmatprep.subr.bf16.mxu1 %v5008_v58  ;;  %v687_v58 = vld [vmem:[%s5524_s17 + $0x4b0] sm:$0xff]  ;;  %v768_v38 = vld [vmem:[%s5524_s17 + $0x738] sm:$0xff] }
 0x2d3   : > { %4277 = vmatpush1.bf16.msra.mxu0 %v4945_v62  ;;  %v696_v62 = vld [vmem:[%s5524_s17 + $0x4f8] sm:$0xff]  ;;  %v775_v37 = vld [vmem:[%s5524_s17 + $0x770] sm:$0xff] }
 0x2d4   : > { %4405 = vmatpush1.bf16.msra.mxu1 %v5009_v0  ;;  %4279 = vmatprep.subr.bf16.mxu0 %v4946_v1  ;;  %v4959_v0 = vcombine.low %v671_v47, %v679_v48  ;;  %v5023_v1 = vcombine.low %v672_v49, %v680_v50  ;;  %v5024_v3 = vcombine.high %v688_v61, %v696_v62  ;;  %v783_v48 = vld [vmem:[%s5524_s17 + $0x7b0] sm:$0xff]  ;;  %v784_v50 = vld [vmem:[%s5524_s17 + $0x7b8] sm:$0xff] }
 0x2d5   : > { %4407 = vmatprep.subr.bf16.mxu1 %v5010_v2  ;;  %v4960_v2 = vcombine.high %v687_v58, %v695_v60  ;;  %v791_v49 = vld [vmem:[%s5524_s17 + $0x7f0] sm:$0xff] }
 0x2d7   : > { %4281 = vmatpush1.bf16.msra.mxu0 %v4947_v7  ;;  %v712_v7 = vld [vmem:[%s5524_s17 + $0x578] sm:$0xff] }
 0x2d8   : > { %4409 = vmatpush1.bf16.msra.mxu1 %v5011_v8  ;;  %4283 = vmatprep.subr.bf16.mxu0 %v4948_v9  ;;  %v4961_v8 = vcombine.low %v687_v58, %v695_v60  ;;  %v5025_v9 = vcombine.low %v688_v61, %v696_v62  ;;  %v5026_v10 = vcombine.high %v704_v6, %v712_v7  ;;  %v799_v60 = vld [vmem:[%s5524_s17 + $0x830] sm:$0xff]  ;;  %v800_v62 = vld [vmem:[%s5524_s17 + $0x838] sm:$0xff] }
 0x2d9   : > { %4411 = vmatprep.subr.bf16.mxu1 %v5012_v55  ;;  %v4962_v55 = vcombine.high %v703_v4, %v711_v5  ;;  %v807_v61 = vld [vmem:[%s5524_s17 + $0x870] sm:$0xff] }
 0x2db   : > { %4285 = vmatpush1.bf16.msra.mxu0 %v4949_v45  ;;  %v728_v45 = vld [vmem:[%s5524_s17 + $0x5f8] sm:$0xff] }
 0x2dc   : > { %4413 = vmatpush1.bf16.msra.mxu1 %v5013_v16  ;;  %4287 = vmatprep.subr.bf16.mxu0 %v4950_v17  ;;  %v4963_v16 = vcombine.low %v703_v4, %v711_v5  ;;  %v5027_v17 = vcombine.low %v704_v6, %v712_v7  ;;  %v5028_v20 = vcombine.high %v720_v15, %v728_v45  ;;  %v815_v5 = vld [vmem:[%s5524_s17 + $0x8b0] sm:$0xff] }
 0x2dd   : > { %4415 = vmatprep.subr.bf16.mxu1 %v5014_v18  ;;  %v4964_v18 = vcombine.high %v719_v12, %v727_v13  ;;  %v823_v6 = vld [vmem:[%s5524_s17 + $0x8f0] sm:$0xff]  ;;  %v4975_v7 = vcombine.low %v799_v60, %v807_v61 }
 0x2df   : > { %4289 = vmatpush1.bf16.msra.mxu0 %v4951_v23  ;;  %v744_v23 = vld [vmem:[%s5524_s17 + $0x678] sm:$0xff] }
 0x2e0   : > { %4417 = vmatpush1.bf16.msra.mxu1 %v5015_v24  ;;  %4291 = vmatprep.subr.bf16.mxu0 %v4952_v25  ;;  %v4965_v24 = vcombine.low %v719_v12, %v727_v13  ;;  %v5029_v25 = vcombine.low %v720_v15, %v728_v45  ;;  %v5030_v27 = vcombine.high %v736_v22, %v744_v23  ;;  %v831_v12 = vld [vmem:[%s5524_s17 + $0x930] sm:$0xff]  ;;  %v832_v45 = vld [vmem:[%s5524_s17 + $0x938] sm:$0xff] }
 0x2e1   : > { %4419 = vmatprep.subr.bf16.mxu1 %v5016_v26  ;;  %v4966_v26 = vcombine.high %v735_v21, %v743_v14  ;;  %v839_v13 = vld [vmem:[%s5524_s17 + $0x970] sm:$0xff] }
 0x2e3   : > { %4293 = vmatpush1.bf16.msra.mxu0 %v4953_v31  ;;  %v760_v31 = vld [vmem:[%s5524_s17 + $0x6f8] sm:$0xff] }
 0x2e4   : > { %4421 = vmatpush1.bf16.msra.mxu1 %v5017_v32  ;;  %4295 = vmatprep.subr.bf16.mxu0 %v4954_v33  ;;  %v4967_v32 = vcombine.low %v735_v21, %v743_v14  ;;  %v5031_v33 = vcombine.low %v736_v22, %v744_v23  ;;  %v5032_v35 = vcombine.high %v752_v30, %v760_v31  ;;  %v847_v14 = vld [vmem:[%s5524_s17 + $0x9b0] sm:$0xff]  ;;  %v848_v23 = vld [vmem:[%s5524_s17 + $0x9b8] sm:$0xff] }
 0x2e5   : > { %4423 = vmatprep.subr.bf16.mxu1 %v5018_v34  ;;  %v4968_v34 = vcombine.high %v751_v28, %v759_v29  ;;  %v855_v22 = vld [vmem:[%s5524_s17 + $0x9f0] sm:$0xff] }
 0x2e7   : > { %4297 = vmatpush1.bf16.msra.mxu0 %v4955_v39  ;;  %v776_v39 = vld [vmem:[%s5524_s17 + $0x778] sm:$0xff] }
 0x2e8   : > { %4425 = vmatpush1.bf16.msra.mxu1 %v5019_v40  ;;  %4299 = vmatprep.subr.bf16.mxu0 %v4956_v41  ;;  %v4969_v40 = vcombine.low %v751_v28, %v759_v29  ;;  %v5033_v41 = vcombine.low %v752_v30, %v760_v31  ;;  %v5034_v47 = vcombine.high %v768_v38, %v776_v39  ;;  %v871_v28 = vld [vmem:[%s5524_s17 + $0xa70] sm:$0xff]  ;;  %v864_v29 = vld [vmem:[%s5524_s17 + $0xa38] sm:$0xff] }
 0x2e9   : > { %4427 = vmatprep.subr.bf16.mxu1 %v5020_v42  ;;  %v4970_v42 = vcombine.high %v767_v36, %v775_v37  ;;  %v872_v30 = vld [vmem:[%s5524_s17 + $0xa78] sm:$0xff]  ;;  %v4981_v31 = vcombine.low %v847_v14, %v855_v22 }
 0x2eb   : > { %4301 = vmatpush1.bf16.msra.mxu0 %v4957_v52  ;;  %v792_v52 = vld [vmem:[%s5524_s17 + $0x7f8] sm:$0xff] }
 0x2ec   : > { %4429 = vmatpush1.bf16.msra.mxu1 %v5021_v53  ;;  %4303 = vmatprep.subr.bf16.mxu0 %v4958_v54  ;;  %v4971_v53 = vcombine.low %v767_v36, %v775_v37  ;;  %v5035_v54 = vcombine.low %v768_v38, %v776_v39  ;;  %v5036_v58 = vcombine.high %v784_v50, %v792_v52  ;;  %v887_v36 = vld [vmem:[%s5524_s17 + $0xaf0] sm:$0xff]  ;;  %v2095_v37 = vsub.s32 4, %v5601_v43  ;;  %v880_v38 = vld [vmem:[%s5524_s17 + $0xab8] sm:$0xff] }
 0x2ed   : > { %4431 = vmatprep.subr.bf16.mxu1 %v5022_v57  ;;  %v4972_v57 = vcombine.high %v783_v48, %v791_v49  ;;  %v888_v39 = vld [vmem:[%s5524_s17 + $0xaf8] sm:$0xff] }
 0x2ef   : > { %4305 = vmatpush1.bf16.msra.mxu0 %v4959_v0  ;;  %v808_v0 = vld [vmem:[%s5524_s17 + $0x878] sm:$0xff] }
 0x2f0   : > { %4433 = vmatpush1.bf16.msra.mxu1 %v5023_v1  ;;  %4307 = vmatprep.subr.bf16.mxu0 %v4960_v2  ;;  %v4973_v1 = vcombine.low %v783_v48, %v791_v49  ;;  %v5037_v2 = vcombine.low %v784_v50, %v792_v52  ;;  %v5038_v4 = vcombine.high %v800_v62, %v808_v0  ;;  %v2107_v48 = vsub.s32 7, %v5601_v43  ;;  %v895_v52 = vld [vmem:[%s5524_s17 + $0xb30] sm:$0xff] }
 0x2f1   : > { %4435 = vmatprep.subr.bf16.mxu1 %v5024_v3  ;;  %v4974_v3 = vcombine.high %v799_v60, %v807_v61  ;;  %v5048_v50 = vcombine.high %v880_v38, %v888_v39 }
 0x2f3   : > { %4309 = vmatpush1.bf16.msra.mxu0 %v4961_v8  ;;  %v816_v8 = vld [vmem:[%s5524_s17 + $0x8b8] sm:$0xff] }
 0x2f4   : > { %4437 = vmatpush1.bf16.msra.mxu1 %v5025_v9  ;;  %4311 = vmatprep.subr.bf16.mxu0 %v4962_v55  ;;  %v824_v9 = vld [vmem:[%s5524_s17 + $0x8f8] sm:$0xff]  ;;  %v5039_v55 = vcombine.low %v800_v62, %v808_v0  ;;  %v2108_v0 = vrot.slane %v5944_v51, %v2107_v48 }
 0x2f5   : > { %4439 = vmatprep.subr.bf16.mxu1 %v5026_v10  ;;  %v4976_v10 = vcombine.high %v815_v5, %v823_v6  ;;  %v5040_v15 = vcombine.high %v816_v8, %v824_v9 }
 0x2f7   : > { %4313 = vmatpush1.bf16.msra.mxu0 %v4963_v16  ;;  %v840_v16 = vld [vmem:[%s5524_s17 + $0x978] sm:$0xff] }
 0x2f8   : > { %4441 = vmatpush1.bf16.msra.mxu1 %v5027_v17  ;;  %4315 = vmatprep.subr.bf16.mxu0 %v4964_v18  ;;  %v4977_v17 = vcombine.low %v815_v5, %v823_v6  ;;  %v5041_v18 = vcombine.low %v816_v8, %v824_v9  ;;  %v5042_v21 = vcombine.high %v832_v45, %v840_v16  ;;  %v911_v5 = vld [vmem:[%s5524_s17 + $0xbb0] sm:$0xff] }
 0x2f9   : > { %4443 = vmatprep.subr.bf16.mxu1 %v5028_v20  ;;  %v4978_v20 = vcombine.high %v831_v12, %v839_v13  ;;  %v919_v6 = vld [vmem:[%s5524_s17 + $0xbf0] sm:$0xff] }
 0x2fb   : > { %4317 = vmatpush1.bf16.msra.mxu0 %v4965_v24  ;;  %v4979_v24 = vcombine.low %v831_v12, %v839_v13 }
 0x2fc   : > { %4445 = vmatpush1.bf16.msra.mxu1 %v5029_v25  ;;  %4319 = vmatprep.subr.bf16.mxu0 %v4966_v26  ;;  %v5043_v25 = vcombine.low %v832_v45, %v840_v16  ;;  %v4980_v26 = vcombine.high %v847_v14, %v855_v22  ;;  %v928_v14 = vld [vmem:[%s5524_s17 + $0xc38] sm:$0xff] }
 0x2fd   : > { %4447 = vmatprep.subr.bf16.mxu1 %v5030_v27  ;;  %v863_v27 = vld [vmem:[%s5524_s17 + $0xa30] sm:$0xff]  ;;  %v936_v22 = vld [vmem:[%s5524_s17 + $0xc78] sm:$0xff] }
 0x2ff   : > { %4321 = vmatpush1.bf16.msra.mxu0 %v4967_v32 }
 0x300   : > { %4449 = vmatpush1.bf16.msra.mxu1 %v5031_v33  ;;  %4323 = vmatprep.subr.bf16.mxu0 %v4968_v34  ;;  %v4982_v33 = vcombine.high %v863_v27, %v871_v28  ;;  %v5046_v34 = vcombine.high %v864_v29, %v872_v30 }
 0x301   : > { %4451 = vmatprep.subr.bf16.mxu1 %v5032_v35  ;;  %v879_v35 = vld [vmem:[%s5524_s17 + $0xab0] sm:$0xff] }
 0x302   : > { %v4984_v49 = vcombine.high %v879_v35, %v887_v36  ;;  %v4985_v62 = vcombine.low %v879_v35, %v887_v36  ;;  %v960_v35 = vld [vmem:[%s5524_s17 + $0xd38] sm:$0xff] }
 0x303   : > { %4325 = vmatpush1.bf16.msra.mxu0 %v4969_v40  ;;  %v4983_v40 = vcombine.low %v863_v27, %v871_v28  ;;  %v944_v27 = vld [vmem:[%s5524_s17 + $0xcb8] sm:$0xff] }
 0x304   : > { %4453 = vmatpush1.bf16.msra.mxu1 %v5033_v41  ;;  %4327 = vmatprep.subr.bf16.mxu0 %v4970_v42  ;;  %v2103_v41 = vsub.s32 6, %v5601_v43  ;;  %v2099_v42 = vsub.s32 5, %v5601_v43  ;;  %v952_v28 = vld [vmem:[%s5524_s17 + $0xcf8] sm:$0xff] }
 0x305   : > { %4455 = vmatprep.subr.bf16.mxu1 %v5034_v47  ;;  %v5047_v47 = vcombine.low %v864_v29, %v872_v30  ;;  %v5055_v30 = vcombine.low %v928_v14, %v936_v22  ;;  %v968_v36 = vld [vmem:[%s5524_s17 + $0xd78] sm:$0xff] }
 0x306   : > { %v2104_v60 = vrot.slane %v5944_v51, %v2103_v41  ;;  %v2100_v61 = vrot.slane %v5944_v51, %v2099_v42 }
 0x307   : > { %4329 = vmatpush1.bf16.msra.mxu0 %v4971_v53  ;;  %v903_v53 = vld [vmem:[%s5524_s17 + $0xb70] sm:$0xff] }
 0x308   : > { %4457 = vmatpush1.bf16.msra.mxu1 %v5035_v54  ;;  %4331 = vmatprep.subr.bf16.mxu0 %v4972_v57  ;;  %v2096_v54 = vrot.slane %v5944_v51, %v2095_v37  ;;  %v896_v57 = vld [vmem:[%s5524_s17 + $0xb38] sm:$0xff] }
 0x309   : > { %4459 = vmatprep.subr.bf16.mxu1 %v5036_v58  ;;  %v904_v58 = vld [vmem:[%s5524_s17 + $0xb78] sm:$0xff] }
 0x30a   : > { %v5051_v16 = vcombine.low %v896_v57, %v904_v58 }
 0x30b   : > { %4333 = vmatpush1.bf16.msra.mxu0 %v4973_v1  ;;  %v5049_v1 = vcombine.low %v880_v38, %v888_v39  ;;  %v5057_v39 = vcombine.low %v944_v27, %v952_v28 }
 0x30c   : > { %4461 = vmatpush1.bf16.msra.mxu1 %v5037_v2  ;;  %4335 = vmatprep.subr.bf16.mxu0 %v4974_v3  ;;  %v4986_v2 = vcombine.high %v895_v52, %v903_v53 }
 0x30d   : > { %4463 = vmatprep.subr.bf16.mxu1 %v5038_v4  ;;  %v5050_v4 = vcombine.high %v896_v57, %v904_v58  ;;  %v5059_v57 = vcombine.low %v960_v35, %v968_v36 }
 0x30e   : > { %3074 = vmatmul.mubr.f32.vlgmr.msra.gmra.mrb[8].mxu0 %v5621_v56 }
 0x30f   : > { %3216 = vmatmul.mubr.f32.vlgmr.msra.gmra.mrb[8].mxu1 %v5621_v56  ;;  %4337 = vmatpush1.bf16.msra.mxu0 %v4975_v7  ;;  %v856_v56 = vld [vmem:[%s5524_s17 + $0x9f8] sm:$0xff] }
 0x310   : > { %3144 = vmatprep.mubr.f32.mxu0 %v5646_v19  ;;  %4465 = vmatpush1.bf16.msra.mxu1 %v5039_v55  ;;  %v5045_v32 = vcombine.low %v848_v23, %v856_v56  ;;  %v912_v55 = vld [vmem:[%s5524_s17 + $0xbb8] sm:$0xff] }
 0x311   : > { %3286 = vmatprep.mubr.f32.mxu1 %v5646_v19  ;;  %4339 = vmatprep.subr.bf16.mxu0 %v4976_v10  ;;  %v5044_v19 = vcombine.high %v848_v23, %v856_v56  ;;  %v920_v10 = vld [vmem:[%s5524_s17 + $0xbf8] sm:$0xff]  ;;  %v4989_v23 = vcombine.low %v911_v5, %v919_v6 }
 0x312   : > { %4467 = vmatprep.subr.bf16.mxu1 %v5040_v15  ;;  %v4987_v15 = vcombine.low %v895_v52, %v903_v53  ;;  %v5053_v56 = vcombine.low %v912_v55, %v920_v10  ;;  %v976_v52 = vld [vmem:[%s5524_s17 + $0xdb8] sm:$0xff] }
 0x313   : > { %4341 = vmatpush1.bf16.msra.mxu0 %v4977_v17  ;;  %v4988_v17 = vcombine.high %v911_v5, %v919_v6  ;;  %v984_v53 = vld [vmem:[%s5524_s17 + $0xdf8] sm:$0xff]  ;;  %v1007_v6 = vld [vmem:[%s5524_s17 + $0xeb0] sm:$0xff] }
 0x314   : > { %4469 = vmatpush1.bf16.msra.mxu1 %v5041_v18  ;;  %4343 = vmatprep.subr.bf16.mxu0 %v4978_v20  ;;  %v5052_v18 = vcombine.high %v912_v55, %v920_v10  ;;  %v927_v20 = vld [vmem:[%s5524_s17 + $0xc30] sm:$0xff] }
 0x315   : > { %4471 = vmatprep.subr.bf16.mxu1 %v5042_v21  ;;  %v935_v21 = vld [vmem:[%s5524_s17 + $0xc70] sm:$0xff] }
 0x316   : > { %v4991_v29 = vcombine.low %v927_v20, %v935_v21 }
 0x317   : > { %4345 = vmatpush1.bf16.msra.mxu0 %v4979_v24  ;;  %v4990_v24 = vcombine.high %v927_v20, %v935_v21 }
 0x318   : > { %4473 = vmatpush1.bf16.msra.mxu1 %v5043_v25  ;;  %4347 = vmatprep.subr.bf16.mxu0 %v4980_v26  ;;  %v5054_v25 = vcombine.high %v928_v14, %v936_v22  ;;  %v943_v26 = vld [vmem:[%s5524_s17 + $0xcb0] sm:$0xff] }
 0x319   : > { %4475 = vmatprep.subr.bf16.mxu1 %v5044_v19  ;;  %v951_v19 = vld [vmem:[%s5524_s17 + $0xcf0] sm:$0xff] }
 0x31a   : > { %v4993_v38 = vcombine.low %v943_v26, %v951_v19  ;;  %v1039_v14 = vld [vmem:[%s5524_s17 + $0xfb0] sm:$0xff] }
 0x31b   : > { %4349 = vmatpush1.bf16.msra.mxu0 %v4981_v31  ;;  %v4992_v31 = vcombine.high %v943_v26, %v951_v19  ;;  %v1047_v22 = vld [vmem:[%s5524_s17 + $0xff0] sm:$0xff] }
 0x31c   : > { %4477 = vmatpush1.bf16.msra.mxu1 %v5045_v32  ;;  %4351 = vmatprep.subr.bf16.mxu0 %v4982_v33  ;;  %v5056_v32 = vcombine.high %v944_v27, %v952_v28  ;;  %v959_v33 = vld [vmem:[%s5524_s17 + $0xd30] sm:$0xff]  ;;  %v5004_v26 = vcombine.high %v1039_v14, %v1047_v22  ;;  %v5005_v27 = vcombine.low %v1039_v14, %v1047_v22 }
 0x31d   : > { %4479 = vmatprep.subr.bf16.mxu1 %v5046_v34  ;;  %v967_v34 = vld [vmem:[%s5524_s17 + $0xd70] sm:$0xff] }
 0x31f   : > { %4353 = vmatpush1.bf16.msra.mxu0 %v4983_v40  ;;  %v4994_v40 = vcombine.high %v959_v33, %v967_v34 }
 0x320   : > { %4481 = vmatpush1.bf16.msra.mxu1 %v5047_v47  ;;  %4355 = vmatprep.subr.bf16.mxu0 %v4984_v49  ;;  %v5058_v47 = vcombine.high %v960_v35, %v968_v36  ;;  %v975_v49 = vld [vmem:[%s5524_s17 + $0xdb0] sm:$0xff] }
 0x321   : > { %v2578_v3 = vpop.f32.mrb[4].mxu0  ;;  %4483 = vmatprep.subr.bf16.mxu1 %v5048_v50  ;;  %v983_v50 = vld [vmem:[%s5524_s17 + $0xdf0] sm:$0xff] }
 0x322   : > { %v4530_v7 = vadd.f32 %v2578_v3, %v2096_v54  ;;  %v2720_v8 = vpop.f32.mrb[4].mxu1  ;;  %v2580_v9 = vpop.f32.mrb[5].mxu0  ;;  %v4995_v54 = vcombine.low %v959_v33, %v967_v34  ;;  %v4996_v58 = vcombine.high %v975_v49, %v983_v50  ;;  %v5061_v3 = vcombine.low %v976_v52, %v984_v53 }
 0x323   : > { %v4532_v12 = vadd.f32 %v2720_v8, %v2104_v60  ;;  %v4531_v51 = vadd.f32 %v2580_v9, %v2100_v61  ;;  %v2722_v13 = vpop.f32.mrb[5].mxu1  ;;  %4357 = vmatpush1.bf16.msra.mxu0 %v4985_v62  ;;  %v5060_v60 = vcombine.high %v976_v52, %v984_v53  ;;  %v991_v61 = vld [vmem:[%s5524_s17 + $0xe30] sm:$0xff]  ;;  %v1008_v8 = vld [vmem:[%s5524_s17 + $0xeb8] sm:$0xff] }
 0x324   : > { %3297 = vst [vmem:[%s5962_s12 + $0x20] sm:$0xff] %v4530_v7  ;;  %v4533_v45 = vadd.f32 %v2722_v13, %v2108_v0  ;;  %4485 = vmatpush1.bf16.msra.mxu1 %v5049_v1  ;;  %4359 = vmatprep.subr.bf16.mxu0 %v4986_v2  ;;  %v999_v62 = vld [vmem:[%s5524_s17 + $0xe70] sm:$0xff]  ;;  %v992_v0 = vld [vmem:[%s5524_s17 + $0xe38] sm:$0xff]  ;;  %v4997_v2 = vcombine.low %v975_v49, %v983_v50 }
 0x325   : > { %3299 = vst [vmem:[%s5962_s12 + $0x30] sm:$0xff] %v4532_v12  ;;  %3298 = vst [vmem:[%s5962_s12 + $0x28] sm:$0xff] %v4531_v51  ;;  %4487 = vmatprep.subr.bf16.mxu1 %v5050_v4  ;;  %v1000_v1 = vld [vmem:[%s5524_s17 + $0xe78] sm:$0xff]  ;;  %v4998_v4 = vcombine.high %v991_v61, %v999_v62  ;;  %v1015_v7 = vld [vmem:[%s5524_s17 + $0xef0] sm:$0xff]  ;;  %v4999_v55 = vcombine.low %v991_v61, %v999_v62 }
 0x326   : > { %3300 = vst [vmem:[%s5962_s12 + $0x38] sm:$0xff] %v4533_v45  ;;  %v5062_v5 = vcombine.high %v992_v0, %v1000_v1  ;;  %v1016_v9 = vld [vmem:[%s5524_s17 + $0xef8] sm:$0xff]  ;;  %v5063_v10 = vcombine.low %v992_v0, %v1000_v1  ;;  %v5000_v12 = vcombine.high %v1007_v6, %v1015_v7  ;;  %v1023_v13 = vld [vmem:[%s5524_s17 + $0xf30] sm:$0xff] }
 0x327   : > { %4361 = vmatpush1.bf16.msra.mxu0 %v4987_v15  ;;  %v5064_v51 = vcombine.high %v1008_v8, %v1016_v9  ;;  %v1031_v15 = vld [vmem:[%s5524_s17 + $0xf70] sm:$0xff]  ;;  %v1024_v45 = vld [vmem:[%s5524_s17 + $0xf38] sm:$0xff] }
 0x328   : > { %4489 = vmatpush1.bf16.msra.mxu1 %v5051_v16  ;;  %4363 = vmatprep.subr.bf16.mxu0 %v4988_v17  ;;  %v1032_v16 = vld [vmem:[%s5524_s17 + $0xf78] sm:$0xff]  ;;  %v5001_v17 = vcombine.low %v1007_v6, %v1015_v7  ;;  %v5002_v20 = vcombine.high %v1023_v13, %v1031_v15 }
 0x329   : > { %4491 = vmatprep.subr.bf16.mxu1 %v5052_v18  ;;  %v5065_v18 = vcombine.low %v1008_v8, %v1016_v9  ;;  %v5066_v21 = vcombine.high %v1024_v45, %v1032_v16 }
 0x32b   : > { %4365 = vmatpush1.bf16.msra.mxu0 %v4989_v23  ;;  %v1040_v23 = vld [vmem:[%s5524_s17 + $0xfb8] sm:$0xff] }
 0x32c   : > { %4493 = vmatpush1.bf16.msra.mxu1 %v5053_v56  ;;  %4367 = vmatprep.subr.bf16.mxu0 %v4990_v24  ;;  %v1048_v56 = vld [vmem:[%s5524_s17 + $0xff8] sm:$0xff]  ;;  %v5003_v24 = vcombine.low %v1023_v13, %v1031_v15 }
 0x32d   : > { %4495 = vmatprep.subr.bf16.mxu1 %v5054_v25  ;;  %v5067_v25 = vcombine.low %v1024_v45, %v1032_v16  ;;  %v5068_v19 = vcombine.high %v1040_v23, %v1048_v56  ;;  %v5069_v28 = vcombine.low %v1040_v23, %v1048_v56 }
 0x32f   : > { %4369 = vmatpush1.bf16.msra.mxu0 %v4991_v29  ;;  %v2074_v29 = vld [vmem:[%s268_s22 + $0x8] sm:$0xff] }
 0x330   : > { %4497 = vmatpush1.bf16.msra.mxu1 %v5055_v30  ;;  %4371 = vmatprep.subr.bf16.mxu0 %v4992_v31  ;;  %v2112_v30 = vrot.slane %v2074_v29, %v5609_v46  ;;  %v2120_v31 = vrot.slane %v2074_v29, %v5695_v59  ;;  %v2124_v33 = vrot.slane %v2074_v29, %v5632_v63 }
 0x331   : > { %4499 = vmatprep.subr.bf16.mxu1 %v5056_v32  ;;  %v2116_v32 = vrot.slane %v2074_v29, %v5604_v44  ;;  %v2128_v44 = vrot.slane %v2074_v29, %v2095_v37  ;;  %v2136_v46 = vrot.slane %v2074_v29, %v2103_v41  ;;  %v2132_v63 = vrot.slane %v2074_v29, %v2099_v42 }
 0x332   : > { %v2140_v59 = vrot.slane %v2074_v29, %v2107_v48 }
 0x333   : > { %4373 = vmatpush1.bf16.msra.mxu0 %v4993_v38 }
 0x334   : > { %4501 = vmatpush1.bf16.msra.mxu1 %v5057_v39  ;;  %4375 = vmatprep.subr.bf16.mxu0 %v4994_v40 }
 0x335   : > { %4503 = vmatprep.subr.bf16.mxu1 %v5058_v47 }
 0x337   : > { %4377 = vmatpush1.bf16.msra.mxu0 %v4995_v54 }
 0x338   : > { %4505 = vmatpush1.bf16.msra.mxu1 %v5059_v57  ;;  %4379 = vmatprep.subr.bf16.mxu0 %v4996_v58 }
 0x339   : > { %4507 = vmatprep.subr.bf16.mxu1 %v5060_v60 }
 0x33b   : > { %4381 = vmatpush1.bf16.msra.mxu0 %v4997_v2 }
 0x33c   : > { %4509 = vmatpush1.bf16.msra.mxu1 %v5061_v3  ;;  %4383 = vmatprep.subr.bf16.mxu0 %v4998_v4 }
 0x33d   : > { %4511 = vmatprep.subr.bf16.mxu1 %v5062_v5 }
 0x33f   : > { %4385 = vmatpush1.bf16.msra.mxu0 %v4999_v55 }
 0x340   : > { %4513 = vmatpush1.bf16.msra.mxu1 %v5063_v10  ;;  %4387 = vmatprep.subr.bf16.mxu0 %v5000_v12 }
 0x341   : > { %4515 = vmatprep.subr.bf16.mxu1 %v5064_v51 }
 0x343   : > { %4389 = vmatpush1.bf16.msra.mxu0 %v5001_v17 }
 0x344   : > { %4517 = vmatpush1.bf16.msra.mxu1 %v5065_v18  ;;  %4391 = vmatprep.subr.bf16.mxu0 %v5002_v20 }
 0x345   : > { %4519 = vmatprep.subr.bf16.mxu1 %v5066_v21 }
 0x347   : > { %4393 = vmatpush1.bf16.msra.mxu0 %v5003_v24 }
 0x348   : > { %4521 = vmatpush1.bf16.msra.mxu1 %v5067_v25  ;;  %4395 = vmatprep.subr.bf16.mxu0 %v5004_v26 }
 0x349   : > { %4523 = vmatprep.subr.bf16.mxu1 %v5068_v19 }
 0x34b   : > { %4397 = vmatpush1.bf16.msra.mxu0 %v5005_v27 }
 0x34c   : > { %4525 = vmatpush1.bf16.msra.mxu1 %v5069_v28 }
 0x34e   : > { %3145 = vmatmul.mubr.f32.vlgmr.msra.gmra.mrb[8].mxu0 %v5705_v11 }
 0x34f   : > { %3287 = vmatmul.mubr.f32.vlgmr.msra.gmra.mrb[8].mxu1 %v5705_v11 }
 0x3a1   : > { %v2862_v34 = vpop.f32.mrb[6].mxu0 }
 0x3a2   : > { %v4534_v35 = vadd.f32 %v2862_v34, %v2112_v30  ;;  %v3004_v36 = vpop.f32.mrb[6].mxu1  ;;  %v2864_v38 = vpop.f32.mrb[7].mxu0 }
 0x3a3   : > { %v4536_v39 = vadd.f32 %v3004_v36, %v2120_v31  ;;  %v4535_v40 = vadd.f32 %v2864_v38, %v2116_v32  ;;  %v3006_v47 = vpop.f32.mrb[7].mxu1 }
 0x3a4   : > { %3301 = vst [vmem:[%s5962_s12 + $0x40] sm:$0xff] %v4534_v35  ;;  %v4537_v11 = vadd.f32 %v3006_v47, %v2124_v33 }
 0x3a5   : > { %3303 = vst [vmem:[%s5962_s12 + $0x50] sm:$0xff] %v4536_v39  ;;  %3302 = vst [vmem:[%s5962_s12 + $0x48] sm:$0xff] %v4535_v40 }
 0x3a6   : > { %3304 = vst [vmem:[%s5962_s12 + $0x58] sm:$0xff] %v4537_v11 }
 0x421   : > { %v3146_v49 = vpop.f32.mrb[8].mxu0 }
 0x422   : > { %v4538_v50 = vadd.f32 %v3146_v49, %v2128_v44  ;;  %v3288_v52 = vpop.f32.mrb[8].mxu1  ;;  %v3148_v53 = vpop.f32.mrb[9].mxu0 }
 0x423   : > { %v4540_v54 = vadd.f32 %v3288_v52, %v2136_v46  ;;  %v4539_v57 = vadd.f32 %v3148_v53, %v2132_v63  ;;  %v3290_v58 = vpop.f32.mrb[9].mxu1 }
 0x424   : > { %3305 = vst [vmem:[%s5962_s12 + $0x60] sm:$0xff] %v4538_v50  ;;  %v4541_v60 = vadd.f32 %v3290_v58, %v2140_v59 }
 0x425   : > { %3307 = vst [vmem:[%s5962_s12 + $0x70] sm:$0xff] %v4540_v54  ;;  %3306 = vst [vmem:[%s5962_s12 + $0x68] sm:$0xff] %v4539_v57 }
 0x426   : > { %3308 = vst [vmem:[%s5962_s12 + $0x78] sm:$0xff] %v4541_v60 }
 0x427 PF: > { %p14_p4 = scmp.ge.s32.totalorder %s5363_s23, 7   ;;  %s6231_s18 = smov %s5291_s19 }
 0x428   : > { %s6232_s19 = smov %s5295_s20  ;;  %s6233_s20 = smov %s5373_s26 }
 0x429   : > { %s6234_s21 = smov %s5363_s23  ;;  %16 = sbr.rel (!%p14_p4) target bundleno = 6 (0x6), region = 98 }
 0x430   :  { %3331 = vsyncpa [#allocation3], 1 }
 0x431   :  { %3333 = vsyncpa [#allocation3 + $0x1], 1 }
 0x432   :  { %3334 = vsyncpa [#allocation5], 1 }

</bundles_post_ra>
